<compile_context>
chip_gen: v7x
topology: tpu7x:2x2x1
jax: 0.10.0
libtpu: 0.0.40
codegen_flags: <defaults>
</compile_context>

<pallas_src>
import functools

import jax
import jax.numpy as jnp
from jax.experimental import pallas as pl
from jax.experimental.pallas import tpu as pltpu


# -----------------------------------------------------------------------------
# In-kernel helpers
# -----------------------------------------------------------------------------
def _layernorm(x, w, b, eps):
    # PyTorch nn.LayerNorm: biased variance over the last dim, f32 math.
    mu = jnp.mean(x, axis=-1, keepdims=True)
    var = jnp.mean((x - mu) ** 2, axis=-1, keepdims=True)
    return (x - mu) * jax.lax.rsqrt(var + eps) * w + b


# -----------------------------------------------------------------------------
# Kernel 1: patch embedding  (Conv2d with stride == kernel  ==  patch matmul)
# -----------------------------------------------------------------------------
def patch_embed_kernel(patches_ref, w_ref, b_ref, pos_ref, out_ref):
    p = patches_ref[0]                                      # [N, patch_dim] bf16
    emb = jnp.dot(p, w_ref[...], preferred_element_type=jnp.float32)
    out_ref[0] = (emb + b_ref[...] + pos_ref[...]).astype(out_ref.dtype)


# -----------------------------------------------------------------------------
# Kernel 2: one transformer encoder layer (pre-LN MHA + pre-LN MLP),
#           optionally fused with the final post-LayerNorm.
# -----------------------------------------------------------------------------
def encoder_layer_kernel(x_ref, ln1w_ref, ln1b_ref,
                         wq_ref, bq_ref, wk_ref, bk_ref, wv_ref, bv_ref,
                         wo_ref, bo_ref,
                         ln2w_ref, ln2b_ref,
                         w1_ref, b1_ref, w2_ref, b2_ref,
                         *rest, batch_tile, seq_len, num_heads, eps, fuse_final_ln):
    if fuse_final_ln:
        postw_ref, postb_ref, out_ref = rest
    else:
        (out_ref,) = rest

    Bt, N, H = batch_tile, seq_len, num_heads
    D = x_ref.shape[-1]
    hd = D // H

    # Residual stream in f32; all matmul M-dims use the folded (Bt*N) rows.
    x = x_ref[...].reshape(Bt * N, D).astype(jnp.float32)

    # ---- self-attention block (pre-LN); 1/sqrt(head_dim) folded into wq/bq at init ----
    h = _layernorm(x, ln1w_ref[...], ln1b_ref[...], eps)
    hb = h.astype(jnp.bfloat16)                             # cast only at the MXU boundary
    q = jnp.dot(hb, wq_ref[...], preferred_element_type=jnp.float32) + bq_ref[...]
    k = jnp.dot(hb, wk_ref[...], preferred_element_type=jnp.float32) + bk_ref[...]
    v = jnp.dot(hb, wv_ref[...], preferred_element_type=jnp.float32) + bv_ref[...]

    def split_heads(t):
        # [rows, D] -> [H, rows, hd]: head axis becomes a leading batch dim so both
        # attention matmuls are lane-dense batched einsums (no per-head lane slicing).
        t3 = t.reshape(t.shape[0], H, hd)
        return pltpu.einshape("nhd->hnd", t3)

    # Attention is per image; row blocks are contiguous multiples of N (N % 8 == 0 when
    # batch folding is enabled), so these are clean unmasked row selects.
    # TODO(synk): at real seq lengths / head counts, flash-tile over KV and loop heads
    # with fori_loop instead of this small static unroll.
    attn_rows = []
    for b in range(Bt):
        qh = split_heads(q[b * N:(b + 1) * N]).astype(jnp.bfloat16)   # [H, N, hd]
        kh = split_heads(k[b * N:(b + 1) * N]).astype(jnp.bfloat16)
        vh = split_heads(v[b * N:(b + 1) * N]).astype(jnp.bfloat16)
        s = jnp.einsum("hnd,hmd->hnm", qh, kh,
                       preferred_element_type=jnp.float32)            # [H, N, N]
        s = s - jnp.max(s, axis=-1, keepdims=True)
        e = jnp.exp(s)
        inv = pl.reciprocal(jnp.sum(e, axis=-1, keepdims=True), approx=True)
        p = (e * inv).astype(jnp.bfloat16)
        o = jnp.einsum("hnm,hmd->hnd", p, vh,
                       preferred_element_type=jnp.float32)            # [H, N, hd]
        attn_rows.append(pltpu.einshape("hnd->nhd", o).reshape(N, D))
    attn = attn_rows[0] if Bt == 1 else jnp.concatenate(attn_rows, axis=0)

    attn = jnp.dot(attn.astype(jnp.bfloat16), wo_ref[...],
                   preferred_element_type=jnp.float32) + bo_ref[...]
    x = x + attn

    # ---- MLP block (pre-LN), gelu(tanh) as in SigLIP ----
    # TODO(synk): K-tile these two matmuls over the intermediate dim for v7x-sized models.
    h2 = _layernorm(x, ln2w_ref[...], ln2b_ref[...], eps)
    a1 = jnp.dot(h2.astype(jnp.bfloat16), w1_ref[...],
                 preferred_element_type=jnp.float32) + b1_ref[...]
    g = jax.nn.gelu(a1, approximate=True).astype(jnp.bfloat16)        # bf16 into fc2
    a2 = jnp.dot(g, w2_ref[...], preferred_element_type=jnp.float32) + b2_ref[...]
    y = x + a2

    if fuse_final_ln:                                       # fused final post-LayerNorm
        y = _layernorm(y, postw_ref[...], postb_ref[...], eps)
    out_ref[...] = y.reshape(Bt, N, D).astype(out_ref.dtype)


# -----------------------------------------------------------------------------
# Kernel 3: standalone final post-layernorm (only used if there are 0 layers)
# -----------------------------------------------------------------------------
def final_ln_kernel(x_ref, w_ref, b_ref, out_ref, *, eps):
    out_ref[0] = _layernorm(x_ref[0].astype(jnp.float32), w_ref[...], b_ref[...], eps)


# -----------------------------------------------------------------------------
# pallas_call plumbing
# -----------------------------------------------------------------------------
@functools.lru_cache(maxsize=None)
def _vmem_limit_bytes():
    # Explicit scoped-VMEM budget (defaults are only 16/32 MiB). ~75% of physical VMEM:
    # 96 MiB on v5e/v6e (128 MiB), 48 MiB on v7x (64 MiB per TensorCore).
    try:
        cap = pltpu.get_tpu_info().vmem_capacity_bytes
    except Exception:
        cap = 64 * 1024 * 1024
    return int(min(cap * 3 // 4, 96 * 1024 * 1024))


def _compiler_params():
    # TODO(synk): on v7x verify the batch axis is sharded across both TensorCores;
    # if not, switch to pltpu.CORE_PARALLEL or pl.core_map(create_tensorcore_mesh).
    return pltpu.CompilerParams(
        dimension_semantics=("parallel",),
        vmem_limit_bytes=_vmem_limit_bytes(),
    )


@functools.lru_cache(maxsize=None)
def _weight_pipeline_mode():
    # Single-buffer constant-index weight operands (their block index never changes with
    # the grid, so double-buffering is pure VMEM waste). Probe once, eagerly (even when
    # first reached under a jit trace), and fall back cleanly if unsupported.
    try:
        mode = pl.Buffered(1)

        def _copy(x_ref, o_ref):
            o_ref[...] = x_ref[...]

        with jax.ensure_compile_time_eval():
            pl.pallas_call(
                _copy,
                out_shape=jax.ShapeDtypeStruct((8, 128), jnp.float32),
                grid=(1,),
                in_specs=[pl.BlockSpec((8, 128), lambda i: (0, 0), pipeline_mode=mode)],
                out_specs=pl.BlockSpec((8, 128), lambda i: (0, 0)),
            )(jnp.zeros((8, 128), jnp.float32))
        return mode
    except Exception:
        return None


def _const_spec(shape):
    n = len(shape)
    kwargs = {}
    mode = _weight_pipeline_mode()
    if mode is not None:
        kwargs["pipeline_mode"] = mode
    return pl.BlockSpec(shape, lambda b, _n=n: (0,) * _n, **kwargs)


def _pick_batch_tile(batch, seq, target_rows=256):
    # Fold several images per grid step so the matmul M-dim (= Bt*N rows) better fills the
    # MXU and resident weights are amortized. Only fold when N is sublane-aligned so the
    # in-kernel (Bt, N, D) -> (Bt*N, D) reshape is a pure tile regroup.
    if seq % 8 != 0:
        return 1
    bt = max(1, min(batch, max(1, target_rows // seq)))
    while bt > 1 and batch % bt:
        bt -= 1
    return bt


def patch_embed(patches, w, b, pos, out_dtype=jnp.bfloat16):
    B, N, PD = patches.shape
    D = w.shape[1]
    bytes_accessed = int(patches.size * patches.dtype.itemsize
                         + B * N * D * jnp.dtype(out_dtype).itemsize
                         + w.size * w.dtype.itemsize + (b.size + pos.size) * 4)
    return pl.pallas_call(
        patch_embed_kernel,
        out_shape=jax.ShapeDtypeStruct((B, N, D), out_dtype),
        grid=(B,),
        in_specs=[
            pl.BlockSpec((1, N, PD), lambda i: (i, 0, 0)),
            _const_spec(w.shape),
            _const_spec(b.shape),
            _const_spec(pos.shape),
        ],
        out_specs=pl.BlockSpec((1, N, D), lambda i: (i, 0, 0)),
        compiler_params=_compiler_params(),
        cost_estimate=pl.CostEstimate(flops=2 * B * N * PD * D, transcendentals=0,
                                      bytes_accessed=bytes_accessed),
    )(patches, w, b, pos)


def encoder_layer(x, layer_params, num_heads, eps, post_ln=None,
                  out_dtype=jnp.bfloat16, batch_tile=1):
    B, N, D = x.shape
    Bt = batch_tile
    assert B % Bt == 0
    fuse = post_ln is not None
    extra = list(post_ln) if fuse else []
    consts = list(layer_params) + extra
    args = [x] + consts

    in_specs = [pl.BlockSpec((Bt, N, D), lambda b: (b, 0, 0))]
    in_specs += [_const_spec(p.shape) for p in consts]

    I = layer_params[12].shape[1]                     # fc1 weight: (D, I)
    flops = 2 * B * N * D * (4 * D + 2 * I + 2 * N)
    transcendentals = B * N * (num_heads * N + I)
    bytes_accessed = int(x.size * x.dtype.itemsize
                         + B * N * D * jnp.dtype(out_dtype).itemsize
                         + sum(p.size * p.dtype.itemsize for p in consts))

    kernel = functools.partial(encoder_layer_kernel, batch_tile=Bt, seq_len=N,
                               num_heads=num_heads, eps=eps, fuse_final_ln=fuse)
    # TODO(synk): cross-call prefetch of the next layer's weights (pl.ANY refs + semaphore
    # outputs) to hide the per-layer weight DMA at real model sizes.
    return pl.pallas_call(
        kernel,
        out_shape=jax.ShapeDtypeStruct((B, N, D), out_dtype),
        grid=(B // Bt,),
        in_specs=in_specs,
        out_specs=pl.BlockSpec((Bt, N, D), lambda b: (b, 0, 0)),
        compiler_params=_compiler_params(),
        cost_estimate=pl.CostEstimate(flops=flops, transcendentals=transcendentals,
                                      bytes_accessed=bytes_accessed),
    )(*args)


def final_layernorm(x, w, b, eps):
    B, N, D = x.shape
    return pl.pallas_call(
        functools.partial(final_ln_kernel, eps=eps),
        out_shape=jax.ShapeDtypeStruct((B, N, D), jnp.float32),
        grid=(B,),
        in_specs=[
            pl.BlockSpec((1, N, D), lambda i: (i, 0, 0)),
            _const_spec(w.shape),
            _const_spec(b.shape),
        ],
        out_specs=pl.BlockSpec((1, N, D), lambda i: (i, 0, 0)),
        compiler_params=_compiler_params(),
    )(x, w, b)


# -----------------------------------------------------------------------------
# Plain-JAX glue: patch extraction (matches PyTorch Conv2d(stride=patch) + flatten).
# The trailing bf16 cast fuses with the transpose under jit (single HBM pass) and halves
# the patch-embedding kernel's input DMA.
# -----------------------------------------------------------------------------
def extract_patches(pixel_values, patch_size):
    B, C, H, W = pixel_values.shape              # NCHW, same as PyTorch
    P = patch_size
    nh, nw = H // P, W // P
    x = pixel_values.reshape(B, C, nh, P, nw, P)
    x = x.transpose(0, 2, 4, 1, 3, 5)            # [B, nh, nw, C, P, P]
    x = x.reshape(B, nh * nw, C * P * P)         # flattened (C, P, P) matches conv weight
    return x.astype(jnp.bfloat16)


def vision_transformer_forward(pixel_values, params, cfg):
    patches = extract_patches(pixel_values, cfg["patch_size"])
    B, N = patches.shape[0], patches.shape[1]
    bt = _pick_batch_tile(B, N)

    layers = params["layers"]
    x = patch_embed(patches, params["patch_w"], params["patch_b"], params["pos_emb"],
                    out_dtype=jnp.bfloat16 if layers else jnp.float32)
    for li, layer_params in enumerate(layers):
        last = li == len(layers) - 1
        post = (params["post_ln_w"], params["post_ln_b"]) if last else None   # fuse final LN
        x = encoder_layer(x, layer_params, cfg["num_attention_heads"],
                          cfg["layer_norm_eps"], post_ln=post,
                          out_dtype=jnp.float32 if last else jnp.bfloat16,
                          batch_tile=bt)
    if not layers:
        x = final_layernorm(x, params["post_ln_w"], params["post_ln_b"],
                            cfg["layer_norm_eps"])
    return x   # [B, num_patches, hidden_size] f32


# -----------------------------------------------------------------------------
# Deterministic parameter initialization (shapes follow the PyTorch module).
# Matmul weights live in bf16 (MXU-native); biases / LN params / pos-emb stay f32.
# The attention scale 1/sqrt(head_dim) is folded into wq/bq here (the kernel does not
# apply it); loading real PyTorch weights requires the same fold.
# -----------------------------------------------------------------------------
def init_params(key, cfg):
    D = cfg["hidden_size"]
    I = cfg["intermediate_size"]
    C = cfg["num_channels"]
    P = cfg["patch_size"]
    H = cfg["num_attention_heads"]
    q_scale = (D // H) ** -0.5
    num_patches = (cfg["image_size"] // P) ** 2
    patch_dim = C * P * P

    def nrm(k, shape, std=0.02, mult=1.0, dtype=jnp.bfloat16):
        return (mult * std * jax.random.normal(k, shape, jnp.float32)).astype(dtype)

    keys = jax.random.split(key, 4 + cfg["num_hidden_layers"])
    params = {
        # NOTE: to load real PyTorch Conv2d weights use weight.reshape(D, C*P*P).T
        # so the flatten order matches extract_patches' (C, P, P) layout.
        "patch_w": nrm(keys[0], (patch_dim, D)),
        "patch_b": jnp.zeros((1, D), jnp.float32),
        "pos_emb": nrm(keys[1], (num_patches, D), dtype=jnp.float32),
        "post_ln_w": jnp.ones((1, D), jnp.float32),
        "post_ln_b": jnp.zeros((1, D), jnp.float32),
        "layers": [],
    }
    for li in range(cfg["num_hidden_layers"]):
        lk = jax.random.split(keys[4 + li], 6)
        layer = (
            jnp.ones((1, D), jnp.float32), jnp.zeros((1, D), jnp.float32),   # ln1 w, b
            nrm(lk[0], (D, D), mult=q_scale),                                # wq (scale folded)
            q_scale * jnp.zeros((1, D), jnp.float32),                        # bq (scale folded)
            nrm(lk[1], (D, D)), jnp.zeros((1, D), jnp.float32),              # wk, bk
            nrm(lk[2], (D, D)), jnp.zeros((1, D), jnp.float32),              # wv, bv
            nrm(lk[3], (D, D)), jnp.zeros((1, D), jnp.float32),              # wo, bo
            jnp.ones((1, D), jnp.float32), jnp.zeros((1, D), jnp.float32),   # ln2 w, b
            nrm(lk[4], (D, I)), jnp.zeros((1, I), jnp.float32),              # fc1 w, b
            nrm(lk[5], (I, D)), jnp.zeros((1, D), jnp.float32),              # fc2 w, b
        )
        params["layers"].append(layer)
    return params


if __name__ == "__main__":
    cfg = dict(
        hidden_size=128,
        intermediate_size=256,
        num_hidden_layers=2,
        num_attention_heads=4,
        num_channels=3,
        image_size=32,
        patch_size=8,
        layer_norm_eps=1e-6,
    )
    key = jax.random.PRNGKey(0)
    k_params, k_x = jax.random.split(key)
    params = init_params(k_params, cfg)

    # pixel_values: [Batch, Channels, Height, Width] = [2, 3, 32, 32]
    pixel_values = jax.random.normal(
        k_x, (2, cfg["num_channels"], cfg["image_size"], cfg["image_size"]), jnp.float32)

    _ = _weight_pipeline_mode()   # run the Buffered(1) probe eagerly, outside any trace

    fwd = jax.jit(lambda px, prm: vision_transformer_forward(px, prm, cfg))
    out = jax.block_until_ready(fwd(pixel_values, params))

    num_patches = (cfg["image_size"] // cfg["patch_size"]) ** 2
    assert out.shape == (2, num_patches, cfg["hidden_size"]), out.shape
    assert out.dtype == jnp.float32, out.dtype
    assert bool(jnp.all(jnp.isfinite(out)))
    print("KERNEL_OK")
</pallas_src>

<mosaic_0001>
module attributes {stable_mosaic.version = 11 : i64} {
  func.func @_copy(%arg0: i32, %arg1: memref<8x128xf32, #tpu.memory_space<vmem>>, %arg2: memref<8x128xf32, #tpu.memory_space<vmem>>) attributes {dimension_semantics = [#tpu.dimension_semantics<arbitrary>], iteration_bounds = array<i64: 1>, scalar_prefetch = 0 : i64, scratch_operands = 0 : i64, tpu.core_type = #tpu.core_type<tc>, window_params = [{pipeline_mode = #tpu.pipeline_mode<synchronous>, transform_indices = @transform_0, window_bounds = array<i64: 8, 128>}, {pipeline_mode = #tpu.pipeline_mode<synchronous>, transform_indices = @transform_1, window_bounds = array<i64: 8, 128>}]} {
    %c0 = arith.constant 0 : index
    %c0_0 = arith.constant 0 : index
    %0 = vector.load %arg1[%c0, %c0_0] : memref<8x128xf32, #tpu.memory_space<vmem>>, vector<8x128xf32>
    %c0_1 = arith.constant 0 : index
    %c0_2 = arith.constant 0 : index
    %1 = vector.load %arg2[%c0_1, %c0_2] : memref<8x128xf32, #tpu.memory_space<vmem>>, vector<8x128xf32>
    tpu.vector_store %arg2[%c0_1, %c0_2], %0 {strides = array<i32>} : memref<8x128xf32, #tpu.memory_space<vmem>>, vector<8x128xf32>,
    return
  }
  func.func @transform_0(%arg0: i32) -> (i32, i32) {
    %c0_i32 = arith.constant 0 : i32
    %c0_i32_0 = arith.constant 0 : i32
    %c0_i32_1 = arith.constant 0 : i32
    return %c0_i32, %c0_i32_0 : i32, i32
  }
  func.func @transform_1(%arg0: i32) -> (i32, i32) {
    %c0_i32 = arith.constant 0 : i32
    %c0_i32_0 = arith.constant 0 : i32
    %c0_i32_1 = arith.constant 0 : i32
    return %c0_i32, %c0_i32_0 : i32, i32
  }
}

module attributes {stable_mosaic.version = 11 : i64} {
  func.func @patch_embed_kernel(%arg0: i32, %arg1: memref<1x16x192xbf16, #tpu.memory_space<vmem>>, %arg2: memref<192x128xbf16, #tpu.memory_space<vmem>>, %arg3: memref<1x128xf32, #tpu.memory_space<vmem>>, %arg4: memref<16x128xf32, #tpu.memory_space<vmem>>, %arg5: memref<1x16x128xbf16, #tpu.memory_space<vmem>>) attributes {dimension_semantics = [#tpu.dimension_semantics<parallel>], iteration_bounds = array<i64: 2>, scalar_prefetch = 0 : i64, scratch_operands = 0 : i64, tpu.core_type = #tpu.core_type<tc>, window_params = [{transform_indices = @transform_0, window_bounds = array<i64: 1, 16, 192>}, {pipeline_mode = #tpu.pipeline_mode<synchronous>, transform_indices = @transform_1, window_bounds = array<i64: 192, 128>}, {pipeline_mode = #tpu.pipeline_mode<synchronous>, transform_indices = @transform_2, window_bounds = array<i64: 1, 128>}, {pipeline_mode = #tpu.pipeline_mode<synchronous>, transform_indices = @transform_3, window_bounds = array<i64: 16, 128>}, {transform_indices = @transform_4, window_bounds = array<i64: 1, 16, 128>}]} {
    %c0 = arith.constant 0 : index
    %c0_0 = arith.constant 0 : index
    %c0_1 = arith.constant 0 : index
    %0 = vector.load %arg1[%c0, %c0_0, %c0_1] : memref<1x16x192xbf16, #tpu.memory_space<vmem>>, vector<1x16x192xbf16>
    %1 = vector.shape_cast %0 : vector<1x16x192xbf16> to vector<16x192xbf16>
    %c0_2 = arith.constant 0 : index
    %c0_3 = arith.constant 0 : index
    %2 = vector.load %arg2[%c0_2, %c0_3] : memref<192x128xbf16, #tpu.memory_space<vmem>>, vector<192x128xbf16>
    %cst = arith.constant dense<0.000000e+00> : vector<16x128xf32>
    %3 = tpu.matmul %1, %2, %cst {dimension_numbers = #tpu.dot_dimension_numbers<[1], [0], [0], [1], [0, 0, 1, 1], [], []>} : vector<16x192xbf16>, vector<192x128xbf16>, vector<16x128xf32> -> vector<16x128xf32>
    %c0_4 = arith.constant 0 : index
    %c0_5 = arith.constant 0 : index
    %4 = vector.load %arg3[%c0_4, %c0_5] : memref<1x128xf32, #tpu.memory_space<vmem>>, vector<1x128xf32>
    %5 = vector.broadcast %4 : vector<1x128xf32> to vector<16x128xf32>
    %6 = arith.addf %3, %5 : vector<16x128xf32>
    %c0_6 = arith.constant 0 : index
    %c0_7 = arith.constant 0 : index
    %7 = vector.load %arg4[%c0_6, %c0_7] : memref<16x128xf32, #tpu.memory_space<vmem>>, vector<16x128xf32>
    %8 = arith.addf %6, %7 : vector<16x128xf32>
    %9 = arith.truncf %8 : vector<16x128xf32> to vector<16x128xbf16>
    %c0_8 = arith.constant 0 : index
    %c0_9 = arith.constant 0 : index
    %c0_10 = arith.constant 0 : index
    %10 = vector.load %arg5[%c0_8, %c0_9, %c0_10] : memref<1x16x128xbf16, #tpu.memory_space<vmem>>, vector<1x16x128xbf16>
    %11 = vector.shape_cast %10 : vector<1x16x128xbf16> to vector<16x128xbf16>
    %12 = vector.shape_cast %9 : vector<16x128xbf16> to vector<1x16x128xbf16>
    tpu.vector_store %arg5[%c0_8, %c0_9, %c0_10], %12 {strides = array<i32>} : memref<1x16x128xbf16, #tpu.memory_space<vmem>>, vector<1x16x128xbf16>,
    return
  }
  func.func @transform_0(%arg0: i32) -> (i32, i32, i32) {
    %c0_i32 = arith.constant 0 : i32
    %c0_i32_0 = arith.constant 0 : i32
    %c0_i32_1 = arith.constant 0 : i32
    return %arg0, %c0_i32, %c0_i32_0 : i32, i32, i32
  }
  func.func @transform_1(%arg0: i32) -> (i32, i32) {
    %c0_i32 = arith.constant 0 : i32
    %c0_i32_0 = arith.constant 0 : i32
    %c0_i32_1 = arith.constant 0 : i32
    return %c0_i32, %c0_i32_0 : i32, i32
  }
  func.func @transform_2(%arg0: i32) -> (i32, i32) {
    %c0_i32 = arith.constant 0 : i32
    %c0_i32_0 = arith.constant 0 : i32
    %c0_i32_1 = arith.constant 0 : i32
    return %c0_i32, %c0_i32_0 : i32, i32
  }
  func.func @transform_3(%arg0: i32) -> (i32, i32) {
    %c0_i32 = arith.constant 0 : i32
    %c0_i32_0 = arith.constant 0 : i32
    %c0_i32_1 = arith.constant 0 : i32
    return %c0_i32, %c0_i32_0 : i32, i32
  }
  func.func @transform_4(%arg0: i32) -> (i32, i32, i32) {
    %c0_i32 = arith.constant 0 : i32
    %c0_i32_0 = arith.constant 0 : i32
    %c0_i32_1 = arith.constant 0 : i32
    return %arg0, %c0_i32, %c0_i32_0 : i32, i32, i32
  }
}

module attributes {stable_mosaic.version = 11 : i64} {
  func.func @encoder_layer_kernel(%arg0: i32, %arg1: memref<2x16x128xbf16, #tpu.memory_space<vmem>>, %arg2: memref<1x128xf32, #tpu.memory_space<vmem>>, %arg3: memref<1x128xf32, #tpu.memory_space<vmem>>, %arg4: memref<128x128xbf16, #tpu.memory_space<vmem>>, %arg5: memref<1x128xf32, #tpu.memory_space<vmem>>, %arg6: memref<128x128xbf16, #tpu.memory_space<vmem>>, %arg7: memref<1x128xf32, #tpu.memory_space<vmem>>, %arg8: memref<128x128xbf16, #tpu.memory_space<vmem>>, %arg9: memref<1x128xf32, #tpu.memory_space<vmem>>, %arg10: memref<128x128xbf16, #tpu.memory_space<vmem>>, %arg11: memref<1x128xf32, #tpu.memory_space<vmem>>, %arg12: memref<1x128xf32, #tpu.memory_space<vmem>>, %arg13: memref<1x128xf32, #tpu.memory_space<vmem>>, %arg14: memref<128x256xbf16, #tpu.memory_space<vmem>>, %arg15: memref<1x256xf32, #tpu.memory_space<vmem>>, %arg16: memref<256x128xbf16, #tpu.memory_space<vmem>>, %arg17: memref<1x128xf32, #tpu.memory_space<vmem>>, %arg18: memref<2x16x128xbf16, #tpu.memory_space<vmem>>) attributes {dimension_semantics = [#tpu.dimension_semantics<parallel>], iteration_bounds = array<i64: 1>, scalar_prefetch = 0 : i64, scratch_operands = 0 : i64, tpu.core_type = #tpu.core_type<tc>, window_params = [{transform_indices = @transform_0, window_bounds = array<i64: 2, 16, 128>}, {pipeline_mode = #tpu.pipeline_mode<synchronous>, transform_indices = @transform_1, window_bounds = array<i64: 1, 128>}, {pipeline_mode = #tpu.pipeline_mode<synchronous>, transform_indices = @transform_2, window_bounds = array<i64: 1, 128>}, {pipeline_mode = #tpu.pipeline_mode<synchronous>, transform_indices = @transform_3, window_bounds = array<i64: 128, 128>}, {pipeline_mode = #tpu.pipeline_mode<synchronous>, transform_indices = @transform_4, window_bounds = array<i64: 1, 128>}, {pipeline_mode = #tpu.pipeline_mode<synchronous>, transform_indices = @transform_5, window_bounds = array<i64: 128, 128>}, {pipeline_mode = #tpu.pipeline_mode<synchronous>, transform_indices = @transform_6, window_bounds = array<i64: 1, 128>}, {pipeline_mode = #tpu.pipeline_mode<synchronous>, transform_indices = @transform_7, window_bounds = array<i64: 128, 128>}, {pipeline_mode = #tpu.pipeline_mode<synchronous>, transform_indices = @transform_8, window_bounds = array<i64: 1, 128>}, {pipeline_mode = #tpu.pipeline_mode<synchronous>, transform_indices = @transform_9, window_bounds = array<i64: 128, 128>}, {pipeline_mode = #tpu.pipeline_mode<synchronous>, transform_indices = @transform_10, window_bounds = array<i64: 1, 128>}, {pipeline_mode = #tpu.pipeline_mode<synchronous>, transform_indices = @transform_11, window_bounds = array<i64: 1, 128>}, {pipeline_mode = #tpu.pipeline_mode<synchronous>, transform_indices = @transform_12, window_bounds = array<i64: 1, 128>}, {pipeline_mode = #tpu.pipeline_mode<synchronous>, transform_indices = @transform_13, window_bounds = array<i64: 128, 256>}, {pipeline_mode = #tpu.pipeline_mode<synchronous>, transform_indices = @transform_14, window_bounds = array<i64: 1, 256>}, {pipeline_mode = #tpu.pipeline_mode<synchronous>, transform_indices = @transform_15, window_bounds = array<i64: 256, 128>}, {pipeline_mode = #tpu.pipeline_mode<synchronous>, transform_indices = @transform_16, window_bounds = array<i64: 1, 128>}, {transform_indices = @transform_17, window_bounds = array<i64: 2, 16, 128>}]} {
    %c0 = arith.constant 0 : index
    %c0_0 = arith.constant 0 : index
    %c0_1 = arith.constant 0 : index
    %0 = vector.load %arg1[%c0, %c0_0, %c0_1] : memref<2x16x128xbf16, #tpu.memory_space<vmem>>, vector<2x16x128xbf16>
    %1 = vector.shape_cast %0 : vector<2x16x128xbf16> to vector<32x128xbf16>
    %2 = arith.extf %1 : vector<32x128xbf16> to vector<32x128xf32>
    %c0_2 = arith.constant 0 : index
    %c0_3 = arith.constant 0 : index
    %3 = vector.load %arg2[%c0_2, %c0_3] : memref<1x128xf32, #tpu.memory_space<vmem>>, vector<1x128xf32>
    %c0_4 = arith.constant 0 : index
    %c0_5 = arith.constant 0 : index
    %4 = vector.load %arg3[%c0_4, %c0_5] : memref<1x128xf32, #tpu.memory_space<vmem>>, vector<1x128xf32>
    %cst = arith.constant dense<0.000000e+00> : vector<32xf32>
    %5 = vector.multi_reduction <add>, %2, %cst [1] : vector<32x128xf32> to vector<32xf32>
    %6 = vector.shape_cast %5 : vector<32xf32> to vector<32x1xf32>
    %cst_6 = arith.constant 1.280000e+02 : f32
    %7 = vector.broadcast %cst_6 : f32 to vector<32x1xf32>
    %8 = arith.divf %6, %7 : vector<32x1xf32>
    %9 = vector.broadcast %8 : vector<32x1xf32> to vector<32x128xf32>
    %10 = arith.subf %2, %9 : vector<32x128xf32>
    %11 = arith.mulf %10, %10 : vector<32x128xf32>
    %cst_7 = arith.constant dense<0.000000e+00> : vector<32xf32>
    %12 = vector.multi_reduction <add>, %11, %cst_7 [1] : vector<32x128xf32> to vector<32xf32>
    %13 = vector.shape_cast %12 : vector<32xf32> to vector<32x1xf32>
    %cst_8 = arith.constant 1.280000e+02 : f32
    %14 = vector.broadcast %cst_8 : f32 to vector<32x1xf32>
    %15 = arith.divf %13, %14 : vector<32x1xf32>
    %16 = vector.broadcast %8 : vector<32x1xf32> to vector<32x128xf32>
    %17 = arith.subf %2, %16 : vector<32x128xf32>
    %cst_9 = arith.constant 9.99999997E-7 : f32
    %18 = vector.broadcast %cst_9 : f32 to vector<32x1xf32>
    %19 = arith.addf %15, %18 : vector<32x1xf32>
    %20 = math.rsqrt %19 : vector<32x1xf32>
    %21 = vector.broadcast %20 : vector<32x1xf32> to vector<32x128xf32>
    %22 = arith.mulf %17, %21 : vector<32x128xf32>
    %23 = vector.broadcast %3 : vector<1x128xf32> to vector<32x128xf32>
    %24 = arith.mulf %22, %23 : vector<32x128xf32>
    %25 = vector.broadcast %4 : vector<1x128xf32> to vector<32x128xf32>
    %26 = arith.addf %24, %25 : vector<32x128xf32>
    %27 = arith.truncf %26 : vector<32x128xf32> to vector<32x128xbf16>
    %c0_10 = arith.constant 0 : index
    %c0_11 = arith.constant 0 : index
    %28 = vector.load %arg4[%c0_10, %c0_11] : memref<128x128xbf16, #tpu.memory_space<vmem>>, vector<128x128xbf16>
    %cst_12 = arith.constant dense<0.000000e+00> : vector<32x128xf32>
    %29 = tpu.matmul %27, %28, %cst_12 {dimension_numbers = #tpu.dot_dimension_numbers<[1], [0], [0], [1], [0, 0, 1, 1], [], []>} : vector<32x128xbf16>, vector<128x128xbf16>, vector<32x128xf32> -> vector<32x128xf32>
    %c0_13 = arith.constant 0 : index
    %c0_14 = arith.constant 0 : index
    %30 = vector.load %arg5[%c0_13, %c0_14] : memref<1x128xf32, #tpu.memory_space<vmem>>, vector<1x128xf32>
    %31 = vector.broadcast %30 : vector<1x128xf32> to vector<32x128xf32>
    %32 = arith.addf %29, %31 : vector<32x128xf32>
    %c0_15 = arith.constant 0 : index
    %c0_16 = arith.constant 0 : index
    %33 = vector.load %arg6[%c0_15, %c0_16] : memref<128x128xbf16, #tpu.memory_space<vmem>>, vector<128x128xbf16>
    %cst_17 = arith.constant dense<0.000000e+00> : vector<32x128xf32>
    %34 = tpu.matmul %27, %33, %cst_17 {dimension_numbers = #tpu.dot_dimension_numbers<[1], [0], [0], [1], [0, 0, 1, 1], [], []>} : vector<32x128xbf16>, vector<128x128xbf16>, vector<32x128xf32> -> vector<32x128xf32>
    %c0_18 = arith.constant 0 : index
    %c0_19 = arith.constant 0 : index
    %35 = vector.load %arg7[%c0_18, %c0_19] : memref<1x128xf32, #tpu.memory_space<vmem>>, vector<1x128xf32>
    %36 = vector.broadcast %35 : vector<1x128xf32> to vector<32x128xf32>
    %37 = arith.addf %34, %36 : vector<32x128xf32>
    %c0_20 = arith.constant 0 : index
    %c0_21 = arith.constant 0 : index
    %38 = vector.load %arg8[%c0_20, %c0_21] : memref<128x128xbf16, #tpu.memory_space<vmem>>, vector<128x128xbf16>
    %cst_22 = arith.constant dense<0.000000e+00> : vector<32x128xf32>
    %39 = tpu.matmul %27, %38, %cst_22 {dimension_numbers = #tpu.dot_dimension_numbers<[1], [0], [0], [1], [0, 0, 1, 1], [], []>} : vector<32x128xbf16>, vector<128x128xbf16>, vector<32x128xf32> -> vector<32x128xf32>
    %c0_23 = arith.constant 0 : index
    %c0_24 = arith.constant 0 : index
    %40 = vector.load %arg9[%c0_23, %c0_24] : memref<1x128xf32, #tpu.memory_space<vmem>>, vector<1x128xf32>
    %41 = vector.broadcast %40 : vector<1x128xf32> to vector<32x128xf32>
    %42 = arith.addf %39, %41 : vector<32x128xf32>
    %43 = vector.extract_strided_slice %32 {offsets = [0, 0], sizes = [16, 128], strides = [1, 1]} : vector<32x128xf32> to vector<16x128xf32>
    %44 = vector.shape_cast %43 : vector<16x128xf32> to vector<16x4x32xf32>
    %45 = tpu.transpose %44, [1, 0, 2] : vector<16x4x32xf32> -> vector<4x16x32xf32>
    %46 = arith.truncf %45 : vector<4x16x32xf32> to vector<4x16x32xbf16>
    %47 = vector.extract_strided_slice %37 {offsets = [0, 0], sizes = [16, 128], strides = [1, 1]} : vector<32x128xf32> to vector<16x128xf32>
    %48 = vector.shape_cast %47 : vector<16x128xf32> to vector<16x4x32xf32>
    %49 = tpu.transpose %48, [1, 0, 2] : vector<16x4x32xf32> -> vector<4x16x32xf32>
    %50 = arith.truncf %49 : vector<4x16x32xf32> to vector<4x16x32xbf16>
    %51 = vector.extract_strided_slice %42 {offsets = [0, 0], sizes = [16, 128], strides = [1, 1]} : vector<32x128xf32> to vector<16x128xf32>
    %52 = vector.shape_cast %51 : vector<16x128xf32> to vector<16x4x32xf32>
    %53 = tpu.transpose %52, [1, 0, 2] : vector<16x4x32xf32> -> vector<4x16x32xf32>
    %54 = arith.truncf %53 : vector<4x16x32xf32> to vector<4x16x32xbf16>
    "tpu.trace_start"() <{level = 10 : i32, message = "hnd,hmd->hnm"}> : () -> ()
    %cst_25 = arith.constant dense<0.000000e+00> : vector<4x16x16xf32>
    %55 = tpu.matmul %46, %50, %cst_25 {dimension_numbers = #tpu.dot_dimension_numbers<[2], [2], [1], [1], [0, 0, 0, 1, 1, 1], [0], [0]>} : vector<4x16x32xbf16>, vector<4x16x32xbf16>, vector<4x16x16xf32> -> vector<4x16x16xf32>
    "tpu.trace_stop"() : () -> ()
    %cst_26 = arith.constant dense<0xFF800000> : vector<4x16xf32>
    %56 = vector.multi_reduction <maximumf>, %55, %cst_26 [2] : vector<4x16x16xf32> to vector<4x16xf32>
    %57 = vector.shape_cast %56 : vector<4x16xf32> to vector<4x16x1xf32>
    %58 = vector.broadcast %57 : vector<4x16x1xf32> to vector<4x16x16xf32>
    %59 = arith.subf %55, %58 : vector<4x16x16xf32>
    %60 = math.exp %59 : vector<4x16x16xf32>
    %cst_27 = arith.constant dense<0.000000e+00> : vector<4x16xf32>
    %61 = vector.multi_reduction <add>, %60, %cst_27 [2] : vector<4x16x16xf32> to vector<4x16xf32>
    %62 = vector.shape_cast %61 : vector<4x16xf32> to vector<4x16x1xf32>
    %63 = tpu.reciprocal %62 {approx = true} : vector<4x16x1xf32> -> vector<4x16x1xf32>
    %64 = vector.broadcast %63 : vector<4x16x1xf32> to vector<4x16x16xf32>
    %65 = arith.mulf %60, %64 : vector<4x16x16xf32>
    %66 = arith.truncf %65 : vector<4x16x16xf32> to vector<4x16x16xbf16>
    "tpu.trace_start"() <{level = 10 : i32, message = "hnm,hmd->hnd"}> : () -> ()
    %cst_28 = arith.constant dense<0.000000e+00> : vector<4x16x32xf32>
    %67 = tpu.matmul %66, %54, %cst_28 {dimension_numbers = #tpu.dot_dimension_numbers<[2], [1], [1], [2], [0, 0, 0, 1, 1, 2], [0], [0]>} : vector<4x16x16xbf16>, vector<4x16x32xbf16>, vector<4x16x32xf32> -> vector<4x16x32xf32>
    "tpu.trace_stop"() : () -> ()
    %68 = tpu.transpose %67, [1, 0, 2] : vector<4x16x32xf32> -> vector<16x4x32xf32>
    %69 = vector.shape_cast %68 : vector<16x4x32xf32> to vector<16x128xf32>
    %70 = vector.extract_strided_slice %32 {offsets = [16, 0], sizes = [16, 128], strides = [1, 1]} : vector<32x128xf32> to vector<16x128xf32>
    %71 = vector.shape_cast %70 : vector<16x128xf32> to vector<16x4x32xf32>
    %72 = tpu.transpose %71, [1, 0, 2] : vector<16x4x32xf32> -> vector<4x16x32xf32>
    %73 = arith.truncf %72 : vector<4x16x32xf32> to vector<4x16x32xbf16>
    %74 = vector.extract_strided_slice %37 {offsets = [16, 0], sizes = [16, 128], strides = [1, 1]} : vector<32x128xf32> to vector<16x128xf32>
    %75 = vector.shape_cast %74 : vector<16x128xf32> to vector<16x4x32xf32>
    %76 = tpu.transpose %75, [1, 0, 2] : vector<16x4x32xf32> -> vector<4x16x32xf32>
    %77 = arith.truncf %76 : vector<4x16x32xf32> to vector<4x16x32xbf16>
    %78 = vector.extract_strided_slice %42 {offsets = [16, 0], sizes = [16, 128], strides = [1, 1]} : vector<32x128xf32> to vector<16x128xf32>
    %79 = vector.shape_cast %78 : vector<16x128xf32> to vector<16x4x32xf32>
    %80 = tpu.transpose %79, [1, 0, 2] : vector<16x4x32xf32> -> vector<4x16x32xf32>
    %81 = arith.truncf %80 : vector<4x16x32xf32> to vector<4x16x32xbf16>
    "tpu.trace_start"() <{level = 10 : i32, message = "hnd,hmd->hnm"}> : () -> ()
    %cst_29 = arith.constant dense<0.000000e+00> : vector<4x16x16xf32>
    %82 = tpu.matmul %73, %77, %cst_29 {dimension_numbers = #tpu.dot_dimension_numbers<[2], [2], [1], [1], [0, 0, 0, 1, 1, 1], [0], [0]>} : vector<4x16x32xbf16>, vector<4x16x32xbf16>, vector<4x16x16xf32> -> vector<4x16x16xf32>
    "tpu.trace_stop"() : () -> ()
    %cst_30 = arith.constant dense<0xFF800000> : vector<4x16xf32>
    %83 = vector.multi_reduction <maximumf>, %82, %cst_30 [2] : vector<4x16x16xf32> to vector<4x16xf32>
    %84 = vector.shape_cast %83 : vector<4x16xf32> to vector<4x16x1xf32>
    %85 = vector.broadcast %84 : vector<4x16x1xf32> to vector<4x16x16xf32>
    %86 = arith.subf %82, %85 : vector<4x16x16xf32>
    %87 = math.exp %86 : vector<4x16x16xf32>
    %cst_31 = arith.constant dense<0.000000e+00> : vector<4x16xf32>
    %88 = vector.multi_reduction <add>, %87, %cst_31 [2] : vector<4x16x16xf32> to vector<4x16xf32>
    %89 = vector.shape_cast %88 : vector<4x16xf32> to vector<4x16x1xf32>
    %90 = tpu.reciprocal %89 {approx = true} : vector<4x16x1xf32> -> vector<4x16x1xf32>
    %91 = vector.broadcast %90 : vector<4x16x1xf32> to vector<4x16x16xf32>
    %92 = arith.mulf %87, %91 : vector<4x16x16xf32>
    %93 = arith.truncf %92 : vector<4x16x16xf32> to vector<4x16x16xbf16>
    "tpu.trace_start"() <{level = 10 : i32, message = "hnm,hmd->hnd"}> : () -> ()
    %cst_32 = arith.constant dense<0.000000e+00> : vector<4x16x32xf32>
    %94 = tpu.matmul %93, %81, %cst_32 {dimension_numbers = #tpu.dot_dimension_numbers<[2], [1], [1], [2], [0, 0, 0, 1, 1, 2], [0], [0]>} : vector<4x16x16xbf16>, vector<4x16x32xbf16>, vector<4x16x32xf32> -> vector<4x16x32xf32>
    "tpu.trace_stop"() : () -> ()
    %95 = tpu.transpose %94, [1, 0, 2] : vector<4x16x32xf32> -> vector<16x4x32xf32>
    %96 = vector.shape_cast %95 : vector<16x4x32xf32> to vector<16x128xf32>
    %97 = tpu.concatenate %69, %96 in 0 : vector<16x128xf32>, vector<16x128xf32> -> vector<32x128xf32>
    %98 = arith.truncf %97 : vector<32x128xf32> to vector<32x128xbf16>
    %c0_33 = arith.constant 0 : index
    %c0_34 = arith.constant 0 : index
    %99 = vector.load %arg10[%c0_33, %c0_34] : memref<128x128xbf16, #tpu.memory_space<vmem>>, vector<128x128xbf16>
    %cst_35 = arith.constant dense<0.000000e+00> : vector<32x128xf32>
    %100 = tpu.matmul %98, %99, %cst_35 {dimension_numbers = #tpu.dot_dimension_numbers<[1], [0], [0], [1], [0, 0, 1, 1], [], []>} : vector<32x128xbf16>, vector<128x128xbf16>, vector<32x128xf32> -> vector<32x128xf32>
    %c0_36 = arith.constant 0 : index
    %c0_37 = arith.constant 0 : index
    %101 = vector.load %arg11[%c0_36, %c0_37] : memref<1x128xf32, #tpu.memory_space<vmem>>, vector<1x128xf32>
    %102 = vector.broadcast %101 : vector<1x128xf32> to vector<32x128xf32>
    %103 = arith.addf %100, %102 : vector<32x128xf32>
    %104 = arith.addf %2, %103 : vector<32x128xf32>
    %c0_38 = arith.constant 0 : index
    %c0_39 = arith.constant 0 : index
    %105 = vector.load %arg12[%c0_38, %c0_39] : memref<1x128xf32, #tpu.memory_space<vmem>>, vector<1x128xf32>
    %c0_40 = arith.constant 0 : index
    %c0_41 = arith.constant 0 : index
    %106 = vector.load %arg13[%c0_40, %c0_41] : memref<1x128xf32, #tpu.memory_space<vmem>>, vector<1x128xf32>
    %cst_42 = arith.constant dense<0.000000e+00> : vector<32xf32>
    %107 = vector.multi_reduction <add>, %104, %cst_42 [1] : vector<32x128xf32> to vector<32xf32>
    %108 = vector.shape_cast %107 : vector<32xf32> to vector<32x1xf32>
    %cst_43 = arith.constant 1.280000e+02 : f32
    %109 = vector.broadcast %cst_43 : f32 to vector<32x1xf32>
    %110 = arith.divf %108, %109 : vector<32x1xf32>
    %111 = vector.broadcast %110 : vector<32x1xf32> to vector<32x128xf32>
    %112 = arith.subf %104, %111 : vector<32x128xf32>
    %113 = arith.mulf %112, %112 : vector<32x128xf32>
    %cst_44 = arith.constant dense<0.000000e+00> : vector<32xf32>
    %114 = vector.multi_reduction <add>, %113, %cst_44 [1] : vector<32x128xf32> to vector<32xf32>
    %115 = vector.shape_cast %114 : vector<32xf32> to vector<32x1xf32>
    %cst_45 = arith.constant 1.280000e+02 : f32
    %116 = vector.broadcast %cst_45 : f32 to vector<32x1xf32>
    %117 = arith.divf %115, %116 : vector<32x1xf32>
    %118 = vector.broadcast %110 : vector<32x1xf32> to vector<32x128xf32>
    %119 = arith.subf %104, %118 : vector<32x128xf32>
    %cst_46 = arith.constant 9.99999997E-7 : f32
    %120 = vector.broadcast %cst_46 : f32 to vector<32x1xf32>
    %121 = arith.addf %117, %120 : vector<32x1xf32>
    %122 = math.rsqrt %121 : vector<32x1xf32>
    %123 = vector.broadcast %122 : vector<32x1xf32> to vector<32x128xf32>
    %124 = arith.mulf %119, %123 : vector<32x128xf32>
    %125 = vector.broadcast %105 : vector<1x128xf32> to vector<32x128xf32>
    %126 = arith.mulf %124, %125 : vector<32x128xf32>
    %127 = vector.broadcast %106 : vector<1x128xf32> to vector<32x128xf32>
    %128 = arith.addf %126, %127 : vector<32x128xf32>
    %129 = arith.truncf %128 : vector<32x128xf32> to vector<32x128xbf16>
    %c0_47 = arith.constant 0 : index
    %c0_48 = arith.constant 0 : index
    %130 = vector.load %arg14[%c0_47, %c0_48] : memref<128x256xbf16, #tpu.memory_space<vmem>>, vector<128x256xbf16>
    %cst_49 = arith.constant dense<0.000000e+00> : vector<32x256xf32>
    %131 = tpu.matmul %129, %130, %cst_49 {dimension_numbers = #tpu.dot_dimension_numbers<[1], [0], [0], [1], [0, 0, 1, 1], [], []>} : vector<32x128xbf16>, vector<128x256xbf16>, vector<32x256xf32> -> vector<32x256xf32>
    %c0_50 = arith.constant 0 : index
    %c0_51 = arith.constant 0 : index
    %132 = vector.load %arg15[%c0_50, %c0_51] : memref<1x256xf32, #tpu.memory_space<vmem>>, vector<1x256xf32>
    %133 = vector.broadcast %132 : vector<1x256xf32> to vector<32x256xf32>
    %134 = arith.addf %131, %133 : vector<32x256xf32>
    %135 = arith.mulf %134, %134 : vector<32x256xf32>
    %136 = arith.mulf %134, %135 : vector<32x256xf32>
    %cst_52 = arith.constant 4.471500e-02 : f32
    %137 = vector.broadcast %cst_52 : f32 to vector<32x256xf32>
    %138 = arith.mulf %137, %136 : vector<32x256xf32>
    %139 = arith.addf %134, %138 : vector<32x256xf32>
    %cst_53 = arith.constant 0.797884583 : f32
    %140 = vector.broadcast %cst_53 : f32 to vector<32x256xf32>
    %141 = arith.mulf %140, %139 : vector<32x256xf32>
    %142 = math.tanh %141 : vector<32x256xf32>
    %cst_54 = arith.constant 1.000000e+00 : f32
    %143 = vector.broadcast %cst_54 : f32 to vector<32x256xf32>
    %144 = arith.addf %143, %142 : vector<32x256xf32>
    %cst_55 = arith.constant 5.000000e-01 : f32
    %145 = vector.broadcast %cst_55 : f32 to vector<32x256xf32>
    %146 = arith.mulf %145, %144 : vector<32x256xf32>
    %147 = arith.mulf %134, %146 : vector<32x256xf32>
    %148 = arith.truncf %147 : vector<32x256xf32> to vector<32x256xbf16>
    %c0_56 = arith.constant 0 : index
    %c0_57 = arith.constant 0 : index
    %149 = vector.load %arg16[%c0_56, %c0_57] : memref<256x128xbf16, #tpu.memory_space<vmem>>, vector<256x128xbf16>
    %cst_58 = arith.constant dense<0.000000e+00> : vector<32x128xf32>
    %150 = tpu.matmul %148, %149, %cst_58 {dimension_numbers = #tpu.dot_dimension_numbers<[1], [0], [0], [1], [0, 0, 1, 1], [], []>} : vector<32x256xbf16>, vector<256x128xbf16>, vector<32x128xf32> -> vector<32x128xf32>
    %c0_59 = arith.constant 0 : index
    %c0_60 = arith.constant 0 : index
    %151 = vector.load %arg17[%c0_59, %c0_60] : memref<1x128xf32, #tpu.memory_space<vmem>>, vector<1x128xf32>
    %152 = vector.broadcast %151 : vector<1x128xf32> to vector<32x128xf32>
    %153 = arith.addf %150, %152 : vector<32x128xf32>
    %154 = arith.addf %104, %153 : vector<32x128xf32>
    %155 = vector.shape_cast %154 : vector<32x128xf32> to vector<2x16x128xf32>
    %156 = arith.truncf %155 : vector<2x16x128xf32> to vector<2x16x128xbf16>
    %c0_61 = arith.constant 0 : index
    %c0_62 = arith.constant 0 : index
    %c0_63 = arith.constant 0 : index
    %157 = vector.load %arg18[%c0_61, %c0_62, %c0_63] : memref<2x16x128xbf16, #tpu.memory_space<vmem>>, vector<2x16x128xbf16>
    tpu.vector_store %arg18[%c0_61, %c0_62, %c0_63], %156 {strides = array<i32>} : memref<2x16x128xbf16, #tpu.memory_space<vmem>>, vector<2x16x128xbf16>,
    return
  }
  func.func @transform_0(%arg0: i32) -> (i32, i32, i32) {
    %c0_i32 = arith.constant 0 : i32
    %c0_i32_0 = arith.constant 0 : i32
    %c0_i32_1 = arith.constant 0 : i32
    return %arg0, %c0_i32, %c0_i32_0 : i32, i32, i32
  }
  func.func @transform_1(%arg0: i32) -> (i32, i32) {
    %c0_i32 = arith.constant 0 : i32
    %c0_i32_0 = arith.constant 0 : i32
    %c0_i32_1 = arith.constant 0 : i32
    return %c0_i32, %c0_i32_0 : i32, i32
  }
  func.func @transform_2(%arg0: i32) -> (i32, i32) {
    %c0_i32 = arith.constant 0 : i32
    %c0_i32_0 = arith.constant 0 : i32
    %c0_i32_1 = arith.constant 0 : i32
    return %c0_i32, %c0_i32_0 : i32, i32
  }
  func.func @transform_3(%arg0: i32) -> (i32, i32) {
    %c0_i32 = arith.constant 0 : i32
    %c0_i32_0 = arith.constant 0 : i32
    %c0_i32_1 = arith.constant 0 : i32
    return %c0_i32, %c0_i32_0 : i32, i32
  }
  func.func @transform_4(%arg0: i32) -> (i32, i32) {
    %c0_i32 = arith.constant 0 : i32
    %c0_i32_0 = arith.constant 0 : i32
    %c0_i32_1 = arith.constant 0 : i32
    return %c0_i32, %c0_i32_0 : i32, i32
  }
  func.func @transform_5(%arg0: i32) -> (i32, i32) {
    %c0_i32 = arith.constant 0 : i32
    %c0_i32_0 = arith.constant 0 : i32
    %c0_i32_1 = arith.constant 0 : i32
    return %c0_i32, %c0_i32_0 : i32, i32
  }
  func.func @transform_6(%arg0: i32) -> (i32, i32) {
    %c0_i32 = arith.constant 0 : i32
    %c0_i32_0 = arith.constant 0 : i32
    %c0_i32_1 = arith.constant 0 : i32
    return %c0_i32, %c0_i32_0 : i32, i32
  }
  func.func @transform_7(%arg0: i32) -> (i32, i32) {
    %c0_i32 = arith.constant 0 : i32
    %c0_i32_0 = arith.constant 0 : i32
    %c0_i32_1 = arith.constant 0 : i32
    return %c0_i32, %c0_i32_0 : i32, i32
  }
  func.func @transform_8(%arg0: i32) -> (i32, i32) {
    %c0_i32 = arith.constant 0 : i32
    %c0_i32_0 = arith.constant 0 : i32
    %c0_i32_1 = arith.constant 0 : i32
    return %c0_i32, %c0_i32_0 : i32, i32
  }
  func.func @transform_9(%arg0: i32) -> (i32, i32) {
    %c0_i32 = arith.constant 0 : i32
    %c0_i32_0 = arith.constant 0 : i32
    %c0_i32_1 = arith.constant 0 : i32
    return %c0_i32, %c0_i32_0 : i32, i32
  }
  func.func @transform_10(%arg0: i32) -> (i32, i32) {
    %c0_i32 = arith.constant 0 : i32
    %c0_i32_0 = arith.constant 0 : i32
    %c0_i32_1 = arith.constant 0 : i32
    return %c0_i32, %c0_i32_0 : i32, i32
  }
  func.func @transform_11(%arg0: i32) -> (i32, i32) {
    %c0_i32 = arith.constant 0 : i32
    %c0_i32_0 = arith.constant 0 : i32
    %c0_i32_1 = arith.constant 0 : i32
    return %c0_i32, %c0_i32_0 : i32, i32
  }
  func.func @transform_12(%arg0: i32) -> (i32, i32) {
    %c0_i32 = arith.constant 0 : i32
    %c0_i32_0 = arith.constant 0 : i32
    %c0_i32_1 = arith.constant 0 : i32
    return %c0_i32, %c0_i32_0 : i32, i32
  }
  func.func @transform_13(%arg0: i32) -> (i32, i32) {
    %c0_i32 = arith.constant 0 : i32
    %c0_i32_0 = arith.constant 0 : i32
    %c0_i32_1 = arith.constant 0 : i32
    return %c0_i32, %c0_i32_0 : i32, i32
  }
  func.func @transform_14(%arg0: i32) -> (i32, i32) {
    %c0_i32 = arith.constant 0 : i32
    %c0_i32_0 = arith.constant 0 : i32
    %c0_i32_1 = arith.constant 0 : i32
    return %c0_i32, %c0_i32_0 : i32, i32
  }
  func.func @transform_15(%arg0: i32) -> (i32, i32) {
    %c0_i32 = arith.constant 0 : i32
    %c0_i32_0 = arith.constant 0 : i32
    %c0_i32_1 = arith.constant 0 : i32
    return %c0_i32, %c0_i32_0 : i32, i32
  }
  func.func @transform_16(%arg0: i32) -> (i32, i32) {
    %c0_i32 = arith.constant 0 : i32
    %c0_i32_0 = arith.constant 0 : i32
    %c0_i32_1 = arith.constant 0 : i32
    return %c0_i32, %c0_i32_0 : i32, i32
  }
  func.func @transform_17(%arg0: i32) -> (i32, i32, i32) {
    %c0_i32 = arith.constant 0 : i32
    %c0_i32_0 = arith.constant 0 : i32
    %c0_i32_1 = arith.constant 0 : i32
    return %arg0, %c0_i32, %c0_i32_0 : i32, i32, i32
  }
}

module attributes {stable_mosaic.version = 11 : i64} {
  func.func @encoder_layer_kernel(%arg0: i32, %arg1: memref<2x16x128xbf16, #tpu.memory_space<vmem>>, %arg2: memref<1x128xf32, #tpu.memory_space<vmem>>, %arg3: memref<1x128xf32, #tpu.memory_space<vmem>>, %arg4: memref<128x128xbf16, #tpu.memory_space<vmem>>, %arg5: memref<1x128xf32, #tpu.memory_space<vmem>>, %arg6: memref<128x128xbf16, #tpu.memory_space<vmem>>, %arg7: memref<1x128xf32, #tpu.memory_space<vmem>>, %arg8: memref<128x128xbf16, #tpu.memory_space<vmem>>, %arg9: memref<1x128xf32, #tpu.memory_space<vmem>>, %arg10: memref<128x128xbf16, #tpu.memory_space<vmem>>, %arg11: memref<1x128xf32, #tpu.memory_space<vmem>>, %arg12: memref<1x128xf32, #tpu.memory_space<vmem>>, %arg13: memref<1x128xf32, #tpu.memory_space<vmem>>, %arg14: memref<128x256xbf16, #tpu.memory_space<vmem>>, %arg15: memref<1x256xf32, #tpu.memory_space<vmem>>, %arg16: memref<256x128xbf16, #tpu.memory_space<vmem>>, %arg17: memref<1x128xf32, #tpu.memory_space<vmem>>, %arg18: memref<1x128xf32, #tpu.memory_space<vmem>>, %arg19: memref<1x128xf32, #tpu.memory_space<vmem>>, %arg20: memref<2x16x128xf32, #tpu.memory_space<vmem>>) attributes {dimension_semantics = [#tpu.dimension_semantics<parallel>], iteration_bounds = array<i64: 1>, scalar_prefetch = 0 : i64, scratch_operands = 0 : i64, tpu.core_type = #tpu.core_type<tc>, window_params = [{transform_indices = @transform_0, window_bounds = array<i64: 2, 16, 128>}, {pipeline_mode = #tpu.pipeline_mode<synchronous>, transform_indices = @transform_1, window_bounds = array<i64: 1, 128>}, {pipeline_mode = #tpu.pipeline_mode<synchronous>, transform_indices = @transform_2, window_bounds = array<i64: 1, 128>}, {pipeline_mode = #tpu.pipeline_mode<synchronous>, transform_indices = @transform_3, window_bounds = array<i64: 128, 128>}, {pipeline_mode = #tpu.pipeline_mode<synchronous>, transform_indices = @transform_4, window_bounds = array<i64: 1, 128>}, {pipeline_mode = #tpu.pipeline_mode<synchronous>, transform_indices = @transform_5, window_bounds = array<i64: 128, 128>}, {pipeline_mode = #tpu.pipeline_mode<synchronous>, transform_indices = @transform_6, window_bounds = array<i64: 1, 128>}, {pipeline_mode = #tpu.pipeline_mode<synchronous>, transform_indices = @transform_7, window_bounds = array<i64: 128, 128>}, {pipeline_mode = #tpu.pipeline_mode<synchronous>, transform_indices = @transform_8, window_bounds = array<i64: 1, 128>}, {pipeline_mode = #tpu.pipeline_mode<synchronous>, transform_indices = @transform_9, window_bounds = array<i64: 128, 128>}, {pipeline_mode = #tpu.pipeline_mode<synchronous>, transform_indices = @transform_10, window_bounds = array<i64: 1, 128>}, {pipeline_mode = #tpu.pipeline_mode<synchronous>, transform_indices = @transform_11, window_bounds = array<i64: 1, 128>}, {pipeline_mode = #tpu.pipeline_mode<synchronous>, transform_indices = @transform_12, window_bounds = array<i64: 1, 128>}, {pipeline_mode = #tpu.pipeline_mode<synchronous>, transform_indices = @transform_13, window_bounds = array<i64: 128, 256>}, {pipeline_mode = #tpu.pipeline_mode<synchronous>, transform_indices = @transform_14, window_bounds = array<i64: 1, 256>}, {pipeline_mode = #tpu.pipeline_mode<synchronous>, transform_indices = @transform_15, window_bounds = array<i64: 256, 128>}, {pipeline_mode = #tpu.pipeline_mode<synchronous>, transform_indices = @transform_16, window_bounds = array<i64: 1, 128>}, {pipeline_mode = #tpu.pipeline_mode<synchronous>, transform_indices = @transform_17, window_bounds = array<i64: 1, 128>}, {pipeline_mode = #tpu.pipeline_mode<synchronous>, transform_indices = @transform_18, window_bounds = array<i64: 1, 128>}, {transform_indices = @transform_19, window_bounds = array<i64: 2, 16, 128>}]} {
    %c0 = arith.constant 0 : index
    %c0_0 = arith.constant 0 : index
    %c0_1 = arith.constant 0 : index
    %0 = vector.load %arg1[%c0, %c0_0, %c0_1] : memref<2x16x128xbf16, #tpu.memory_space<vmem>>, vector<2x16x128xbf16>
    %1 = vector.shape_cast %0 : vector<2x16x128xbf16> to vector<32x128xbf16>
    %2 = arith.extf %1 : vector<32x128xbf16> to vector<32x128xf32>
    %c0_2 = arith.constant 0 : index
    %c0_3 = arith.constant 0 : index
    %3 = vector.load %arg2[%c0_2, %c0_3] : memref<1x128xf32, #tpu.memory_space<vmem>>, vector<1x128xf32>
    %c0_4 = arith.constant 0 : index
    %c0_5 = arith.constant 0 : index
    %4 = vector.load %arg3[%c0_4, %c0_5] : memref<1x128xf32, #tpu.memory_space<vmem>>, vector<1x128xf32>
    %cst = arith.constant dense<0.000000e+00> : vector<32xf32>
    %5 = vector.multi_reduction <add>, %2, %cst [1] : vector<32x128xf32> to vector<32xf32>
    %6 = vector.shape_cast %5 : vector<32xf32> to vector<32x1xf32>
    %cst_6 = arith.constant 1.280000e+02 : f32
    %7 = vector.broadcast %cst_6 : f32 to vector<32x1xf32>
    %8 = arith.divf %6, %7 : vector<32x1xf32>
    %9 = vector.broadcast %8 : vector<32x1xf32> to vector<32x128xf32>
    %10 = arith.subf %2, %9 : vector<32x128xf32>
    %11 = arith.mulf %10, %10 : vector<32x128xf32>
    %cst_7 = arith.constant dense<0.000000e+00> : vector<32xf32>
    %12 = vector.multi_reduction <add>, %11, %cst_7 [1] : vector<32x128xf32> to vector<32xf32>
    %13 = vector.shape_cast %12 : vector<32xf32> to vector<32x1xf32>
    %cst_8 = arith.constant 1.280000e+02 : f32
    %14 = vector.broadcast %cst_8 : f32 to vector<32x1xf32>
    %15 = arith.divf %13, %14 : vector<32x1xf32>
    %16 = vector.broadcast %8 : vector<32x1xf32> to vector<32x128xf32>
    %17 = arith.subf %2, %16 : vector<32x128xf32>
    %cst_9 = arith.constant 9.99999997E-7 : f32
    %18 = vector.broadcast %cst_9 : f32 to vector<32x1xf32>
    %19 = arith.addf %15, %18 : vector<32x1xf32>
    %20 = math.rsqrt %19 : vector<32x1xf32>
    %21 = vector.broadcast %20 : vector<32x1xf32> to vector<32x128xf32>
    %22 = arith.mulf %17, %21 : vector<32x128xf32>
    %23 = vector.broadcast %3 : vector<1x128xf32> to vector<32x128xf32>
    %24 = arith.mulf %22, %23 : vector<32x128xf32>
    %25 = vector.broadcast %4 : vector<1x128xf32> to vector<32x128xf32>
    %26 = arith.addf %24, %25 : vector<32x128xf32>
    %27 = arith.truncf %26 : vector<32x128xf32> to vector<32x128xbf16>
    %c0_10 = arith.constant 0 : index
    %c0_11 = arith.constant 0 : index
    %28 = vector.load %arg4[%c0_10, %c0_11] : memref<128x128xbf16, #tpu.memory_space<vmem>>, vector<128x128xbf16>
    %cst_12 = arith.constant dense<0.000000e+00> : vector<32x128xf32>
    %29 = tpu.matmul %27, %28, %cst_12 {dimension_numbers = #tpu.dot_dimension_numbers<[1], [0], [0], [1], [0, 0, 1, 1], [], []>} : vector<32x128xbf16>, vector<128x128xbf16>, vector<32x128xf32> -> vector<32x128xf32>
    %c0_13 = arith.constant 0 : index
    %c0_14 = arith.constant 0 : index
    %30 = vector.load %arg5[%c0_13, %c0_14] : memref<1x128xf32, #tpu.memory_space<vmem>>, vector<1x128xf32>
    %31 = vector.broadcast %30 : vector<1x128xf32> to vector<32x128xf32>
    %32 = arith.addf %29, %31 : vector<32x128xf32>
    %c0_15 = arith.constant 0 : index
    %c0_16 = arith.constant 0 : index
    %33 = vector.load %arg6[%c0_15, %c0_16] : memref<128x128xbf16, #tpu.memory_space<vmem>>, vector<128x128xbf16>
    %cst_17 = arith.constant dense<0.000000e+00> : vector<32x128xf32>
    %34 = tpu.matmul %27, %33, %cst_17 {dimension_numbers = #tpu.dot_dimension_numbers<[1], [0], [0], [1], [0, 0, 1, 1], [], []>} : vector<32x128xbf16>, vector<128x128xbf16>, vector<32x128xf32> -> vector<32x128xf32>
    %c0_18 = arith.constant 0 : index
    %c0_19 = arith.constant 0 : index
    %35 = vector.load %arg7[%c0_18, %c0_19] : memref<1x128xf32, #tpu.memory_space<vmem>>, vector<1x128xf32>
    %36 = vector.broadcast %35 : vector<1x128xf32> to vector<32x128xf32>
    %37 = arith.addf %34, %36 : vector<32x128xf32>
    %c0_20 = arith.constant 0 : index
    %c0_21 = arith.constant 0 : index
    %38 = vector.load %arg8[%c0_20, %c0_21] : memref<128x128xbf16, #tpu.memory_space<vmem>>, vector<128x128xbf16>
    %cst_22 = arith.constant dense<0.000000e+00> : vector<32x128xf32>
    %39 = tpu.matmul %27, %38, %cst_22 {dimension_numbers = #tpu.dot_dimension_numbers<[1], [0], [0], [1], [0, 0, 1, 1], [], []>} : vector<32x128xbf16>, vector<128x128xbf16>, vector<32x128xf32> -> vector<32x128xf32>
    %c0_23 = arith.constant 0 : index
    %c0_24 = arith.constant 0 : index
    %40 = vector.load %arg9[%c0_23, %c0_24] : memref<1x128xf32, #tpu.memory_space<vmem>>, vector<1x128xf32>
    %41 = vector.broadcast %40 : vector<1x128xf32> to vector<32x128xf32>
    %42 = arith.addf %39, %41 : vector<32x128xf32>
    %43 = vector.extract_strided_slice %32 {offsets = [0, 0], sizes = [16, 128], strides = [1, 1]} : vector<32x128xf32> to vector<16x128xf32>
    %44 = vector.shape_cast %43 : vector<16x128xf32> to vector<16x4x32xf32>
    %45 = tpu.transpose %44, [1, 0, 2] : vector<16x4x32xf32> -> vector<4x16x32xf32>
    %46 = arith.truncf %45 : vector<4x16x32xf32> to vector<4x16x32xbf16>
    %47 = vector.extract_strided_slice %37 {offsets = [0, 0], sizes = [16, 128], strides = [1, 1]} : vector<32x128xf32> to vector<16x128xf32>
    %48 = vector.shape_cast %47 : vector<16x128xf32> to vector<16x4x32xf32>
    %49 = tpu.transpose %48, [1, 0, 2] : vector<16x4x32xf32> -> vector<4x16x32xf32>
    %50 = arith.truncf %49 : vector<4x16x32xf32> to vector<4x16x32xbf16>
    %51 = vector.extract_strided_slice %42 {offsets = [0, 0], sizes = [16, 128], strides = [1, 1]} : vector<32x128xf32> to vector<16x128xf32>
    %52 = vector.shape_cast %51 : vector<16x128xf32> to vector<16x4x32xf32>
    %53 = tpu.transpose %52, [1, 0, 2] : vector<16x4x32xf32> -> vector<4x16x32xf32>
    %54 = arith.truncf %53 : vector<4x16x32xf32> to vector<4x16x32xbf16>
    "tpu.trace_start"() <{level = 10 : i32, message = "hnd,hmd->hnm"}> : () -> ()
    %cst_25 = arith.constant dense<0.000000e+00> : vector<4x16x16xf32>
    %55 = tpu.matmul %46, %50, %cst_25 {dimension_numbers = #tpu.dot_dimension_numbers<[2], [2], [1], [1], [0, 0, 0, 1, 1, 1], [0], [0]>} : vector<4x16x32xbf16>, vector<4x16x32xbf16>, vector<4x16x16xf32> -> vector<4x16x16xf32>
    "tpu.trace_stop"() : () -> ()
    %cst_26 = arith.constant dense<0xFF800000> : vector<4x16xf32>
    %56 = vector.multi_reduction <maximumf>, %55, %cst_26 [2] : vector<4x16x16xf32> to vector<4x16xf32>
    %57 = vector.shape_cast %56 : vector<4x16xf32> to vector<4x16x1xf32>
    %58 = vector.broadcast %57 : vector<4x16x1xf32> to vector<4x16x16xf32>
    %59 = arith.subf %55, %58 : vector<4x16x16xf32>
    %60 = math.exp %59 : vector<4x16x16xf32>
    %cst_27 = arith.constant dense<0.000000e+00> : vector<4x16xf32>
    %61 = vector.multi_reduction <add>, %60, %cst_27 [2] : vector<4x16x16xf32> to vector<4x16xf32>
    %62 = vector.shape_cast %61 : vector<4x16xf32> to vector<4x16x1xf32>
    %63 = tpu.reciprocal %62 {approx = true} : vector<4x16x1xf32> -> vector<4x16x1xf32>
    %64 = vector.broadcast %63 : vector<4x16x1xf32> to vector<4x16x16xf32>
    %65 = arith.mulf %60, %64 : vector<4x16x16xf32>
    %66 = arith.truncf %65 : vector<4x16x16xf32> to vector<4x16x16xbf16>
    "tpu.trace_start"() <{level = 10 : i32, message = "hnm,hmd->hnd"}> : () -> ()
    %cst_28 = arith.constant dense<0.000000e+00> : vector<4x16x32xf32>
    %67 = tpu.matmul %66, %54, %cst_28 {dimension_numbers = #tpu.dot_dimension_numbers<[2], [1], [1], [2], [0, 0, 0, 1, 1, 2], [0], [0]>} : vector<4x16x16xbf16>, vector<4x16x32xbf16>, vector<4x16x32xf32> -> vector<4x16x32xf32>
    "tpu.trace_stop"() : () -> ()
    %68 = tpu.transpose %67, [1, 0, 2] : vector<4x16x32xf32> -> vector<16x4x32xf32>
    %69 = vector.shape_cast %68 : vector<16x4x32xf32> to vector<16x128xf32>
    %70 = vector.extract_strided_slice %32 {offsets = [16, 0], sizes = [16, 128], strides = [1, 1]} : vector<32x128xf32> to vector<16x128xf32>
    %71 = vector.shape_cast %70 : vector<16x128xf32> to vector<16x4x32xf32>
    %72 = tpu.transpose %71, [1, 0, 2] : vector<16x4x32xf32> -> vector<4x16x32xf32>
    %73 = arith.truncf %72 : vector<4x16x32xf32> to vector<4x16x32xbf16>
    %74 = vector.extract_strided_slice %37 {offsets = [16, 0], sizes = [16, 128], strides = [1, 1]} : vector<32x128xf32> to vector<16x128xf32>
    %75 = vector.shape_cast %74 : vector<16x128xf32> to vector<16x4x32xf32>
    %76 = tpu.transpose %75, [1, 0, 2] : vector<16x4x32xf32> -> vector<4x16x32xf32>
    %77 = arith.truncf %76 : vector<4x16x32xf32> to vector<4x16x32xbf16>
    %78 = vector.extract_strided_slice %42 {offsets = [16, 0], sizes = [16, 128], strides = [1, 1]} : vector<32x128xf32> to vector<16x128xf32>
    %79 = vector.shape_cast %78 : vector<16x128xf32> to vector<16x4x32xf32>
    %80 = tpu.transpose %79, [1, 0, 2] : vector<16x4x32xf32> -> vector<4x16x32xf32>
    %81 = arith.truncf %80 : vector<4x16x32xf32> to vector<4x16x32xbf16>
    "tpu.trace_start"() <{level = 10 : i32, message = "hnd,hmd->hnm"}> : () -> ()
    %cst_29 = arith.constant dense<0.000000e+00> : vector<4x16x16xf32>
    %82 = tpu.matmul %73, %77, %cst_29 {dimension_numbers = #tpu.dot_dimension_numbers<[2], [2], [1], [1], [0, 0, 0, 1, 1, 1], [0], [0]>} : vector<4x16x32xbf16>, vector<4x16x32xbf16>, vector<4x16x16xf32> -> vector<4x16x16xf32>
    "tpu.trace_stop"() : () -> ()
    %cst_30 = arith.constant dense<0xFF800000> : vector<4x16xf32>
    %83 = vector.multi_reduction <maximumf>, %82, %cst_30 [2] : vector<4x16x16xf32> to vector<4x16xf32>
    %84 = vector.shape_cast %83 : vector<4x16xf32> to vector<4x16x1xf32>
    %85 = vector.broadcast %84 : vector<4x16x1xf32> to vector<4x16x16xf32>
    %86 = arith.subf %82, %85 : vector<4x16x16xf32>
    %87 = math.exp %86 : vector<4x16x16xf32>
    %cst_31 = arith.constant dense<0.000000e+00> : vector<4x16xf32>
    %88 = vector.multi_reduction <add>, %87, %cst_31 [2] : vector<4x16x16xf32> to vector<4x16xf32>
    %89 = vector.shape_cast %88 : vector<4x16xf32> to vector<4x16x1xf32>
    %90 = tpu.reciprocal %89 {approx = true} : vector<4x16x1xf32> -> vector<4x16x1xf32>
    %91 = vector.broadcast %90 : vector<4x16x1xf32> to vector<4x16x16xf32>
    %92 = arith.mulf %87, %91 : vector<4x16x16xf32>
    %93 = arith.truncf %92 : vector<4x16x16xf32> to vector<4x16x16xbf16>
    "tpu.trace_start"() <{level = 10 : i32, message = "hnm,hmd->hnd"}> : () -> ()
    %cst_32 = arith.constant dense<0.000000e+00> : vector<4x16x32xf32>
    %94 = tpu.matmul %93, %81, %cst_32 {dimension_numbers = #tpu.dot_dimension_numbers<[2], [1], [1], [2], [0, 0, 0, 1, 1, 2], [0], [0]>} : vector<4x16x16xbf16>, vector<4x16x32xbf16>, vector<4x16x32xf32> -> vector<4x16x32xf32>
    "tpu.trace_stop"() : () -> ()
    %95 = tpu.transpose %94, [1, 0, 2] : vector<4x16x32xf32> -> vector<16x4x32xf32>
    %96 = vector.shape_cast %95 : vector<16x4x32xf32> to vector<16x128xf32>
    %97 = tpu.concatenate %69, %96 in 0 : vector<16x128xf32>, vector<16x128xf32> -> vector<32x128xf32>
    %98 = arith.truncf %97 : vector<32x128xf32> to vector<32x128xbf16>
    %c0_33 = arith.constant 0 : index
    %c0_34 = arith.constant 0 : index
    %99 = vector.load %arg10[%c0_33, %c0_34] : memref<128x128xbf16, #tpu.memory_space<vmem>>, vector<128x128xbf16>
    %cst_35 = arith.constant dense<0.000000e+00> : vector<32x128xf32>
    %100 = tpu.matmul %98, %99, %cst_35 {dimension_numbers = #tpu.dot_dimension_numbers<[1], [0], [0], [1], [0, 0, 1, 1], [], []>} : vector<32x128xbf16>, vector<128x128xbf16>, vector<32x128xf32> -> vector<32x128xf32>
    %c0_36 = arith.constant 0 : index
    %c0_37 = arith.constant 0 : index
    %101 = vector.load %arg11[%c0_36, %c0_37] : memref<1x128xf32, #tpu.memory_space<vmem>>, vector<1x128xf32>
    %102 = vector.broadcast %101 : vector<1x128xf32> to vector<32x128xf32>
    %103 = arith.addf %100, %102 : vector<32x128xf32>
    %104 = arith.addf %2, %103 : vector<32x128xf32>
    %c0_38 = arith.constant 0 : index
    %c0_39 = arith.constant 0 : index
    %105 = vector.load %arg12[%c0_38, %c0_39] : memref<1x128xf32, #tpu.memory_space<vmem>>, vector<1x128xf32>
    %c0_40 = arith.constant 0 : index
    %c0_41 = arith.constant 0 : index
    %106 = vector.load %arg13[%c0_40, %c0_41] : memref<1x128xf32, #tpu.memory_space<vmem>>, vector<1x128xf32>
    %cst_42 = arith.constant dense<0.000000e+00> : vector<32xf32>
    %107 = vector.multi_reduction <add>, %104, %cst_42 [1] : vector<32x128xf32> to vector<32xf32>
    %108 = vector.shape_cast %107 : vector<32xf32> to vector<32x1xf32>
    %cst_43 = arith.constant 1.280000e+02 : f32
    %109 = vector.broadcast %cst_43 : f32 to vector<32x1xf32>
    %110 = arith.divf %108, %109 : vector<32x1xf32>
    %111 = vector.broadcast %110 : vector<32x1xf32> to vector<32x128xf32>
    %112 = arith.subf %104, %111 : vector<32x128xf32>
    %113 = arith.mulf %112, %112 : vector<32x128xf32>
    %cst_44 = arith.constant dense<0.000000e+00> : vector<32xf32>
    %114 = vector.multi_reduction <add>, %113, %cst_44 [1] : vector<32x128xf32> to vector<32xf32>
    %115 = vector.shape_cast %114 : vector<32xf32> to vector<32x1xf32>
    %cst_45 = arith.constant 1.280000e+02 : f32
    %116 = vector.broadcast %cst_45 : f32 to vector<32x1xf32>
    %117 = arith.divf %115, %116 : vector<32x1xf32>
    %118 = vector.broadcast %110 : vector<32x1xf32> to vector<32x128xf32>
    %119 = arith.subf %104, %118 : vector<32x128xf32>
    %cst_46 = arith.constant 9.99999997E-7 : f32
    %120 = vector.broadcast %cst_46 : f32 to vector<32x1xf32>
    %121 = arith.addf %117, %120 : vector<32x1xf32>
    %122 = math.rsqrt %121 : vector<32x1xf32>
    %123 = vector.broadcast %122 : vector<32x1xf32> to vector<32x128xf32>
    %124 = arith.mulf %119, %123 : vector<32x128xf32>
    %125 = vector.broadcast %105 : vector<1x128xf32> to vector<32x128xf32>
    %126 = arith.mulf %124, %125 : vector<32x128xf32>
    %127 = vector.broadcast %106 : vector<1x128xf32> to vector<32x128xf32>
    %128 = arith.addf %126, %127 : vector<32x128xf32>
    %129 = arith.truncf %128 : vector<32x128xf32> to vector<32x128xbf16>
    %c0_47 = arith.constant 0 : index
    %c0_48 = arith.constant 0 : index
    %130 = vector.load %arg14[%c0_47, %c0_48] : memref<128x256xbf16, #tpu.memory_space<vmem>>, vector<128x256xbf16>
    %cst_49 = arith.constant dense<0.000000e+00> : vector<32x256xf32>
    %131 = tpu.matmul %129, %130, %cst_49 {dimension_numbers = #tpu.dot_dimension_numbers<[1], [0], [0], [1], [0, 0, 1, 1], [], []>} : vector<32x128xbf16>, vector<128x256xbf16>, vector<32x256xf32> -> vector<32x256xf32>
    %c0_50 = arith.constant 0 : index
    %c0_51 = arith.constant 0 : index
    %132 = vector.load %arg15[%c0_50, %c0_51] : memref<1x256xf32, #tpu.memory_space<vmem>>, vector<1x256xf32>
    %133 = vector.broadcast %132 : vector<1x256xf32> to vector<32x256xf32>
    %134 = arith.addf %131, %133 : vector<32x256xf32>
    %135 = arith.mulf %134, %134 : vector<32x256xf32>
    %136 = arith.mulf %134, %135 : vector<32x256xf32>
    %cst_52 = arith.constant 4.471500e-02 : f32
    %137 = vector.broadcast %cst_52 : f32 to vector<32x256xf32>
    %138 = arith.mulf %137, %136 : vector<32x256xf32>
    %139 = arith.addf %134, %138 : vector<32x256xf32>
    %cst_53 = arith.constant 0.797884583 : f32
    %140 = vector.broadcast %cst_53 : f32 to vector<32x256xf32>
    %141 = arith.mulf %140, %139 : vector<32x256xf32>
    %142 = math.tanh %141 : vector<32x256xf32>
    %cst_54 = arith.constant 1.000000e+00 : f32
    %143 = vector.broadcast %cst_54 : f32 to vector<32x256xf32>
    %144 = arith.addf %143, %142 : vector<32x256xf32>
    %cst_55 = arith.constant 5.000000e-01 : f32
    %145 = vector.broadcast %cst_55 : f32 to vector<32x256xf32>
    %146 = arith.mulf %145, %144 : vector<32x256xf32>
    %147 = arith.mulf %134, %146 : vector<32x256xf32>
    %148 = arith.truncf %147 : vector<32x256xf32> to vector<32x256xbf16>
    %c0_56 = arith.constant 0 : index
    %c0_57 = arith.constant 0 : index
    %149 = vector.load %arg16[%c0_56, %c0_57] : memref<256x128xbf16, #tpu.memory_space<vmem>>, vector<256x128xbf16>
    %cst_58 = arith.constant dense<0.000000e+00> : vector<32x128xf32>
    %150 = tpu.matmul %148, %149, %cst_58 {dimension_numbers = #tpu.dot_dimension_numbers<[1], [0], [0], [1], [0, 0, 1, 1], [], []>} : vector<32x256xbf16>, vector<256x128xbf16>, vector<32x128xf32> -> vector<32x128xf32>
    %c0_59 = arith.constant 0 : index
    %c0_60 = arith.constant 0 : index
    %151 = vector.load %arg17[%c0_59, %c0_60] : memref<1x128xf32, #tpu.memory_space<vmem>>, vector<1x128xf32>
    %152 = vector.broadcast %151 : vector<1x128xf32> to vector<32x128xf32>
    %153 = arith.addf %150, %152 : vector<32x128xf32>
    %154 = arith.addf %104, %153 : vector<32x128xf32>
    %c0_61 = arith.constant 0 : index
    %c0_62 = arith.constant 0 : index
    %155 = vector.load %arg18[%c0_61, %c0_62] : memref<1x128xf32, #tpu.memory_space<vmem>>, vector<1x128xf32>
    %c0_63 = arith.constant 0 : index
    %c0_64 = arith.constant 0 : index
    %156 = vector.load %arg19[%c0_63, %c0_64] : memref<1x128xf32, #tpu.memory_space<vmem>>, vector<1x128xf32>
    %cst_65 = arith.constant dense<0.000000e+00> : vector<32xf32>
    %157 = vector.multi_reduction <add>, %154, %cst_65 [1] : vector<32x128xf32> to vector<32xf32>
    %158 = vector.shape_cast %157 : vector<32xf32> to vector<32x1xf32>
    %cst_66 = arith.constant 1.280000e+02 : f32
    %159 = vector.broadcast %cst_66 : f32 to vector<32x1xf32>
    %160 = arith.divf %158, %159 : vector<32x1xf32>
    %161 = vector.broadcast %160 : vector<32x1xf32> to vector<32x128xf32>
    %162 = arith.subf %154, %161 : vector<32x128xf32>
    %163 = arith.mulf %162, %162 : vector<32x128xf32>
    %cst_67 = arith.constant dense<0.000000e+00> : vector<32xf32>
    %164 = vector.multi_reduction <add>, %163, %cst_67 [1] : vector<32x128xf32> to vector<32xf32>
    %165 = vector.shape_cast %164 : vector<32xf32> to vector<32x1xf32>
    %cst_68 = arith.constant 1.280000e+02 : f32
    %166 = vector.broadcast %cst_68 : f32 to vector<32x1xf32>
    %167 = arith.divf %165, %166 : vector<32x1xf32>
    %168 = vector.broadcast %160 : vector<32x1xf32> to vector<32x128xf32>
    %169 = arith.subf %154, %168 : vector<32x128xf32>
    %cst_69 = arith.constant 9.99999997E-7 : f32
    %170 = vector.broadcast %cst_69 : f32 to vector<32x1xf32>
    %171 = arith.addf %167, %170 : vector<32x1xf32>
    %172 = math.rsqrt %171 : vector<32x1xf32>
    %173 = vector.broadcast %172 : vector<32x1xf32> to vector<32x128xf32>
    %174 = arith.mulf %169, %173 : vector<32x128xf32>
    %175 = vector.broadcast %155 : vector<1x128xf32> to vector<32x128xf32>
    %176 = arith.mulf %174, %175 : vector<32x128xf32>
    %177 = vector.broadcast %156 : vector<1x128xf32> to vector<32x128xf32>
    %178 = arith.addf %176, %177 : vector<32x128xf32>
    %179 = vector.shape_cast %178 : vector<32x128xf32> to vector<2x16x128xf32>
    %c0_70 = arith.constant 0 : index
    %c0_71 = arith.constant 0 : index
    %c0_72 = arith.constant 0 : index
    %180 = vector.load %arg20[%c0_70, %c0_71, %c0_72] : memref<2x16x128xf32, #tpu.memory_space<vmem>>, vector<2x16x128xf32>
    tpu.vector_store %arg20[%c0_70, %c0_71, %c0_72], %179 {strides = array<i32>} : memref<2x16x128xf32, #tpu.memory_space<vmem>>, vector<2x16x128xf32>,
    return
  }
  func.func @transform_0(%arg0: i32) -> (i32, i32, i32) {
    %c0_i32 = arith.constant 0 : i32
    %c0_i32_0 = arith.constant 0 : i32
    %c0_i32_1 = arith.constant 0 : i32
    return %arg0, %c0_i32, %c0_i32_0 : i32, i32, i32
  }
  func.func @transform_1(%arg0: i32) -> (i32, i32) {
    %c0_i32 = arith.constant 0 : i32
    %c0_i32_0 = arith.constant 0 : i32
    %c0_i32_1 = arith.constant 0 : i32
    return %c0_i32, %c0_i32_0 : i32, i32
  }
  func.func @transform_2(%arg0: i32) -> (i32, i32) {
    %c0_i32 = arith.constant 0 : i32
    %c0_i32_0 = arith.constant 0 : i32
    %c0_i32_1 = arith.constant 0 : i32
    return %c0_i32, %c0_i32_0 : i32, i32
  }
  func.func @transform_3(%arg0: i32) -> (i32, i32) {
    %c0_i32 = arith.constant 0 : i32
    %c0_i32_0 = arith.constant 0 : i32
    %c0_i32_1 = arith.constant 0 : i32
    return %c0_i32, %c0_i32_0 : i32, i32
  }
  func.func @transform_4(%arg0: i32) -> (i32, i32) {
    %c0_i32 = arith.constant 0 : i32
    %c0_i32_0 = arith.constant 0 : i32
    %c0_i32_1 = arith.constant 0 : i32
    return %c0_i32, %c0_i32_0 : i32, i32
  }
  func.func @transform_5(%arg0: i32) -> (i32, i32) {
    %c0_i32 = arith.constant 0 : i32
    %c0_i32_0 = arith.constant 0 : i32
    %c0_i32_1 = arith.constant 0 : i32
    return %c0_i32, %c0_i32_0 : i32, i32
  }
  func.func @transform_6(%arg0: i32) -> (i32, i32) {
    %c0_i32 = arith.constant 0 : i32
    %c0_i32_0 = arith.constant 0 : i32
    %c0_i32_1 = arith.constant 0 : i32
    return %c0_i32, %c0_i32_0 : i32, i32
  }
  func.func @transform_7(%arg0: i32) -> (i32, i32) {
    %c0_i32 = arith.constant 0 : i32
    %c0_i32_0 = arith.constant 0 : i32
    %c0_i32_1 = arith.constant 0 : i32
    return %c0_i32, %c0_i32_0 : i32, i32
  }
  func.func @transform_8(%arg0: i32) -> (i32, i32) {
    %c0_i32 = arith.constant 0 : i32
    %c0_i32_0 = arith.constant 0 : i32
    %c0_i32_1 = arith.constant 0 : i32
    return %c0_i32, %c0_i32_0 : i32, i32
  }
  func.func @transform_9(%arg0: i32) -> (i32, i32) {
    %c0_i32 = arith.constant 0 : i32
    %c0_i32_0 = arith.constant 0 : i32
    %c0_i32_1 = arith.constant 0 : i32
    return %c0_i32, %c0_i32_0 : i32, i32
  }
  func.func @transform_10(%arg0: i32) -> (i32, i32) {
    %c0_i32 = arith.constant 0 : i32
    %c0_i32_0 = arith.constant 0 : i32
    %c0_i32_1 = arith.constant 0 : i32
    return %c0_i32, %c0_i32_0 : i32, i32
  }
  func.func @transform_11(%arg0: i32) -> (i32, i32) {
    %c0_i32 = arith.constant 0 : i32
    %c0_i32_0 = arith.constant 0 : i32
    %c0_i32_1 = arith.constant 0 : i32
    return %c0_i32, %c0_i32_0 : i32, i32
  }
  func.func @transform_12(%arg0: i32) -> (i32, i32) {
    %c0_i32 = arith.constant 0 : i32
    %c0_i32_0 = arith.constant 0 : i32
    %c0_i32_1 = arith.constant 0 : i32
    return %c0_i32, %c0_i32_0 : i32, i32
  }
  func.func @transform_13(%arg0: i32) -> (i32, i32) {
    %c0_i32 = arith.constant 0 : i32
    %c0_i32_0 = arith.constant 0 : i32
    %c0_i32_1 = arith.constant 0 : i32
    return %c0_i32, %c0_i32_0 : i32, i32
  }
  func.func @transform_14(%arg0: i32) -> (i32, i32) {
    %c0_i32 = arith.constant 0 : i32
    %c0_i32_0 = arith.constant 0 : i32
    %c0_i32_1 = arith.constant 0 : i32
    return %c0_i32, %c0_i32_0 : i32, i32
  }
  func.func @transform_15(%arg0: i32) -> (i32, i32) {
    %c0_i32 = arith.constant 0 : i32
    %c0_i32_0 = arith.constant 0 : i32
    %c0_i32_1 = arith.constant 0 : i32
    return %c0_i32, %c0_i32_0 : i32, i32
  }
  func.func @transform_16(%arg0: i32) -> (i32, i32) {
    %c0_i32 = arith.constant 0 : i32
    %c0_i32_0 = arith.constant 0 : i32
    %c0_i32_1 = arith.constant 0 : i32
    return %c0_i32, %c0_i32_0 : i32, i32
  }
  func.func @transform_17(%arg0: i32) -> (i32, i32) {
    %c0_i32 = arith.constant 0 : i32
    %c0_i32_0 = arith.constant 0 : i32
    %c0_i32_1 = arith.constant 0 : i32
    return %c0_i32, %c0_i32_0 : i32, i32
  }
  func.func @transform_18(%arg0: i32) -> (i32, i32) {
    %c0_i32 = arith.constant 0 : i32
    %c0_i32_0 = arith.constant 0 : i32
    %c0_i32_1 = arith.constant 0 : i32
    return %c0_i32, %c0_i32_0 : i32, i32
  }
  func.func @transform_19(%arg0: i32) -> (i32, i32, i32) {
    %c0_i32 = arith.constant 0 : i32
    %c0_i32_0 = arith.constant 0 : i32
    %c0_i32_1 = arith.constant 0 : i32
    return %arg0, %c0_i32, %c0_i32_0 : i32, i32, i32
  }
}

</mosaic_0001>

<bundles_post_ra>
// kernel: tpu_custom_call.1
= control target key start
LH: loop header
LB: loop body
LE: loop exit
PB: predicated region body
PF: predicated region fallthrough
CT: control target
= control target key end

     0   :  { %6 = vsyncpa [#allocation3], 0  ;;  %s124_s0 = inlined_call_operand.hbm [shape: f32[8,128], index: 0, kind: input, shape index: {}]   ;;  %s125_s1 = inlined_call_operand.hbm [shape: f32[8,128], index: 1, kind: output, shape index: {}]  }
   0x1   :  { %7 = vsyncpa [#allocation4], 0  ;;  %s88_s6 = smov [#allocation2]   ;;  %s40_s10 = scalar_lea.hbm %s124_s0, 128 }
   0x2   :  { %s14_s7 = sshll.u32 %s88_s6, 4  ;;  %p41_p0 = scmp.ne.s32.totalorder %s124_s0, %s40_s10  ;;  %s15_s7 = int_to_ptr.vmem [resolvable:$true] %s14_s7 }
   0x3   :  { %p44_p1 = scmp.lt.u32.totalorder %s40_s10, %s124_s0 }
   0x5   :  { %p46_p2 = pnand %p44_p1, %p41_p0 }
   0x7   :  { %49 = shalt.err (!%p46_p2)
}
   0x8   :  { %s50_s15 = scalar_lea.vmem %s15_s7, 128  ;;  %p55_p4 = scmp.lt.s32.totalorder %s15_s7, %s15_s7 }
   0x9   :  { %p51_p3 = scmp.ne.s32.totalorder %s15_s7, %s50_s15  ;;  %p56_p5 = scmp.lt.s32.totalorder %s50_s15, %s50_s15 }
   0xb   :  { %p57_p6 = por %p56_p5, %p55_p4 }
   0xd   :  { %p58_p7 = pnand %p57_p6, %p51_p3 }
   0xf   :  { %61 = shalt.err (!%p58_p7)
}
  0x10   :  { %17 = dma.hbm_to_vmem [thread:$0]  %s124_s0, 128, %s15_s7, [#allocation3]  }
  0x11   :  { %84 = dma.done.wait [#allocation3], 128  }
  0x12   :  { %85 = vsyncadd [#allocation3], 4294967168  ;;  %s89_s18 = smov [#allocation5]   ;;  %v21_v0 = vld [vmem:[#allocation2] sm:$0xff] }
  0x13   :  { %s29_s19 = sshll.u32 %s89_s18, 4  ;;  %22 = vst [vmem:[#allocation5] sm:$0xff] %v21_v0  ;;  %s30_s19 = int_to_ptr.vmem [resolvable:$true] %s29_s19 }
  0x14   :  { %s62_s20 = scalar_lea.vmem %s30_s19, 128  ;;  %p67_p9 = scmp.lt.s32.totalorder %s30_s19, %s30_s19 }
  0x15   :  { %p63_p8 = scmp.ne.s32.totalorder %s30_s19, %s62_s20  ;;  %p68_p10 = scmp.lt.s32.totalorder %s62_s20, %s62_s20 }
  0x17   :  { %p69_p11 = por %p68_p10, %p67_p9 }
  0x19   :  { %p70_p12 = pnand %p69_p11, %p63_p8 }
  0x1b   :  { %73 = shalt.err (!%p70_p12)
}
  0x1c   :  { %s74_s23 = scalar_lea.hbm %s125_s1, 128 }
  0x1d   :  { %p75_p13 = scmp.ne.s32.totalorder %s125_s1, %s74_s23  ;;  %p78_p0 = scmp.lt.u32.totalorder %s74_s23, %s125_s1 }
  0x1f   :  { %p80_p1 = pnand %p78_p0, %p75_p13 }
  0x21   :  { %83 = shalt.err (!%p80_p1)
}
  0x22   :  { %32 = dma.vmem_to_hbm [thread:$0]  %s30_s19, 128, %s125_s1, [#allocation4]  }
  0x23   :  { %86 = dma.done.wait [#allocation4], 128  }
  0x24   :  { %87 = vsyncadd [#allocation4], 4294967168 }
  0x25   :  { %36 = vsyncpa [#allocation3], 1 }
  0x26   :  { %37 = vsyncpa [#allocation4], 1 }

// kernel: _lambda_.3
= control target key start
LH: loop header
LB: loop body
LE: loop exit
PB: predicated region body
PF: predicated region fallthrough
CT: control target
= control target key end

     0   :  { %s523_s15 = smov 0   ;;  %s589_s0 = inlined_call_operand.vmem [shape: bf16[2,16,192], index: 0, kind: input, shape index: {}]   ;;  %s590_s1 = inlined_call_operand.vmem [shape: bf16[192,128], index: 1, kind: input, shape index: {}]   ;;  %s591_s2 = inlined_call_operand.vmem [shape: f32[1,128], index: 2, kind: input, shape index: {}]   ;;  %s592_s3 = inlined_call_operand.vmem [shape: f32[16,128], index: 3, kind: input, shape index: {}]   ;;  %s593_s4 = inlined_call_operand.vmem [shape: bf16[2,16,128], index: 4, kind: output, shape index: {}]  }
   0x1 LB: > { %s427_s16 = sadd.s32 4294967295, %s495_s15   ;;  %p431_p0 = scmp.ge.s32.totalorder %s495_s15, 1  ;;  %s495_s15 = sphi %s523_s15, %s14_s15  }
   0x2   : > { %p162_p1 = scmp.lt.s32.totalorder %s495_s15, 3 }
   0x4   : > { %p163_p2 = pnand %p431_p0, %p162_p1 }
   0x5   : > { %v474_v0 = vld [vmem:[%s590_s1] sm:$0xff] (!%p163_p2)   ;;  %v497_v1 = vmov (!%p163_p2), 0   ;;  %p188_p3 = scmp.lt.s32.totalorder (!%p163_p2), %s427_s16, 1  ;;  %v475_v2 = vld [vmem:[%s590_s1 + $0x8] sm:$0xff] (!%p163_p2)   ;;  %v476_v3 = vld [vmem:[%s590_s1 + $0x10] sm:$0xff] (!%p163_p2)   ;;  %vm313_vm0 = vcmask (!%p163_p2), 523264  }
   0x6   : > { %166 = sbr.rel (%p163_p2) target bundleno = 275 (0x113), region = 36  ;;  %317 = vmatprep.subr.bf16.mxu0 (!%p163_p2), %v497_v1  ;;  %v477_v4 = vld [vmem:[%s590_s1 + $0x18] sm:$0xff] (!%p163_p2)   ;;  %v478_v6 = vld [vmem:[%s590_s1 + $0x20] sm:$0xff] (!%p163_p2)   ;;  %v479_v7 = vld [vmem:[%s590_s1 + $0x28] sm:$0xff] (!%p163_p2)  }
   0x7   : > { %318 = vmatpush1.bf16.msra.mxu0 (!%p163_p2), %v474_v0  ;;  %v480_v8 = vld [vmem:[%s590_s1 + $0x30] sm:$0xff] (!%p163_p2)   ;;  %v481_v9 = vld [vmem:[%s590_s1 + $0x38] sm:$0xff] (!%p163_p2)   ;;  %v482_v10 = vld [vmem:[%s590_s1 + $0x40] sm:$0xff] (!%p163_p2)  }
   0x8   : > { %319 = vmatprep.subr.bf16.mxu0 (!%p163_p2), %v497_v1  ;;  %v483_v11 = vld [vmem:[%s590_s1 + $0x48] sm:$0xff] (!%p163_p2)   ;;  %v484_v12 = vld [vmem:[%s590_s1 + $0x50] sm:$0xff] (!%p163_p2)   ;;  %v485_v13 = vld [vmem:[%s590_s1 + $0x58] sm:$0xff] (!%p163_p2)  }
   0x9   : > { %v436_v15 = vld [vmem:[%s591_s2] ss:$0 sm:$0xff] (!%p163_p2)  ;;  %v359_v21 = vld [vmem:[%s592_s3 + $0x8] sm:$0xff] (!%p163_p2) }
   0xa   : > { %v358_v19 = vld [vmem:[%s592_s3] sm:$0xff] (!%p163_p2) }
   0xb   : > { %320 = vmatpush1.bf16.msra.mxu0 (!%p163_p2), %v475_v2 }
   0xc   : > { %321 = vmatprep.subr.bf16.mxu0 (!%p163_p2), %v497_v1 }
   0xd   : > { %s595_s16 = smov (!%p188_p3, %s427_s16), 1 }
   0xe   : > { %s456_s23 = sshll.u32 %s595_s16, 4  ;;  %s457_s27 = sshll.u32 %s595_s16, 3 }
   0xf   : > { %322 = vmatpush1.bf16.msra.mxu0 %v476_v3  ;;  %s192_s28 = scalar_lea.vmem %s589_s0, %s456_s23  ;;  %s197_s30 = scalar_lea.vmem %s593_s4, %s457_s27 }
  0x10   : > { %323 = vmatprep.subr.bf16.mxu0 %v497_v1  ;;  %v488_v5 = vld [vmem:[%s192_s28 + $0x4] ss:$8 sps:$4 sm:$0xff]   ;;  %v486_v14 = vld [vmem:[%s192_s28] ss:$8 sps:$4 sm:$0xff]  }
  0x11   : > { %451 = vmatprep.mubr.msk.bf16.mxu0 %vm313_vm0, %v488_v5 }
  0x13   : > { %324 = vmatpush1.bf16.msra.mxu0 %v477_v4 }
  0x14   : > { %325 = vmatprep.subr.bf16.mxu0 %v497_v1 }
  0x17   : > { %326 = vmatpush1.bf16.msra.mxu0 %v478_v6 }
  0x18   : > { %327 = vmatprep.subr.bf16.mxu0 %v497_v1 }
  0x1b   : > { %328 = vmatpush1.bf16.msra.mxu0 %v479_v7 }
  0x1c   : > { %329 = vmatprep.subr.bf16.mxu0 %v497_v1 }
  0x1f   : > { %330 = vmatpush1.bf16.msra.mxu0 %v480_v8 }
  0x20   : > { %331 = vmatprep.subr.bf16.mxu0 %v497_v1 }
  0x23   : > { %332 = vmatpush1.bf16.msra.mxu0 %v481_v9 }
  0x24   : > { %333 = vmatprep.subr.bf16.mxu0 %v497_v1 }
  0x27   : > { %334 = vmatpush1.bf16.msra.mxu0 %v482_v10 }
  0x28   : > { %335 = vmatprep.subr.bf16.mxu0 %v497_v1 }
  0x2b   : > { %336 = vmatpush1.bf16.msra.mxu0 %v483_v11 }
  0x2c   : > { %337 = vmatprep.subr.bf16.mxu0 %v497_v1 }
  0x2f   : > { %338 = vmatpush1.bf16.msra.mxu0 %v484_v12 }
  0x30   : > { %339 = vmatprep.subr.bf16.mxu0 %v497_v1 }
  0x33   : > { %340 = vmatpush1.bf16.msra.mxu0 %v485_v13 }
  0x36   : > { %350 = vmatmul.mubr.bf16.vlgmr.msra.gmra.mrb[0].mxu0 %v486_v14 }
 0x109   : > { %v351_v16 = vpop.f32.mrb[0].mxu0 }
 0x10a   : > { %v352_v17 = vadd.f32 %v436_v15, %v351_v16  ;;  %v353_v18 = vpop.f32.mrb[1].mxu0 }
 0x10b   : > { %v354_v20 = vpop.f32.mrb[2].mxu0 }
 0x10c   : > { %v355_v22 = vadd.f32 %v436_v15, %v354_v20  ;;  %v356_v23 = vpop.f32.mrb[3].mxu0  ;;  %v360_v24 = vadd.f32 %v358_v19, %v352_v17 }
 0x10e   : > { %v361_v25 = vadd.f32 %v359_v21, %v355_v22 }
 0x110   : > { %v463_v26 = vpack.c.bf16 %v361_v25, %v360_v24 }
 0x112   : > { %464 = vst [vmem:[%s197_s30] sm:$0xff] %v463_v26  }
 0x113 PF: > { %s14_s15 = sadd.s32 1, %s495_s15  }
 0x114   : > { %p11_p4 = scmp.ge.s32.totalorder %s14_s15, 4  }
 0x116   :  { %13 = sbr.rel (!%p11_p4) target bundleno = 1 (0x1), region = 66 }

// kernel: _lambda_.4
= control target key start
LH: loop header
LB: loop body
LE: loop exit
PB: predicated region body
PF: predicated region fallthrough
CT: control target
= control target key end

     0   :  { %vm5068_vm0 = vmmov 0   ;;  %vm1382_vm1 = vcmask 261120   ;;  %vm1571_vm2 = vcmask 130048   ;;  %vm2138_vm3 = vcmask 523264   ;;  %s6285_s0 = inlined_call_operand.vmem [shape: bf16[2,16,128], index: 0, kind: input, shape index: {}]   ;;  %s6286_s3 = inlined_call_operand.vmem [shape: bf16[128,128], index: 3, kind: input, shape index: {}]   ;;  %s6287_s5 = inlined_call_operand.vmem [shape: bf16[128,128], index: 5, kind: input, shape index: {}]   ;;  %s6288_s7 = inlined_call_operand.vmem [shape: bf16[128,128], index: 7, kind: input, shape index: {}]   ;;  %s6289_s1 = inlined_call_operand.vmem [shape: f32[1,128], index: 1, kind: input, shape index: {}]   ;;  %s6290_s2 = inlined_call_operand.vmem [shape: f32[1,128], index: 2, kind: input, shape index: {}]   ;;  %s6291_s4 = inlined_call_operand.vmem [shape: f32[1,128], index: 4, kind: input, shape index: {}]   ;;  %s6292_s6 = inlined_call_operand.vmem [shape: f32[1,128], index: 6, kind: input, shape index: {}]   ;;  %s6293_s8 = inlined_call_operand.vmem [shape: f32[1,128], index: 8, kind: input, shape index: {}]   ;;  %s6294_s9 = inlined_call_operand.vmem [shape: bf16[128,128], index: 9, kind: input, shape index: {}]   ;;  %s6295_s10 = inlined_call_operand.vmem [shape: f32[1,128], index: 10, kind: input, shape index: {}]   ;;  %s6296_s13 = inlined_call_operand.vmem [shape: bf16[128,256], index: 13, kind: input, shape index: {}]   ;;  %s6297_s11 = inlined_call_operand.vmem [shape: f32[1,128], index: 11, kind: input, shape index: {}]   ;;  %s6298_s12 = inlined_call_operand.vmem [shape: f32[1,128], index: 12, kind: input, shape index: {}]   ;;  %s6299_s15 = inlined_call_operand.vmem [shape: bf16[256,128], index: 15, kind: input, shape index: {}]   ;;  %s6300_s14 = inlined_call_operand.vmem [shape: f32[1,256], index: 14, kind: input, shape index: {}]   ;;  %s6301_s16 = inlined_call_operand.vmem [shape: f32[1,128], index: 16, kind: input, shape index: {}]   ;;  %s6302_s17 = inlined_call_operand.vmem [shape: bf16[2,16,128], index: 17, kind: output, shape index: {}]  }
   0x1   :  { %6305 = sst [smem:[#allocation2_spill]] %s6285_s0  ;;  %v4897_v7 = vld [vmem:[%s6287_s5] sm:$0xff]   ;;  %v4899_v25 = vld [vmem:[%s6287_s5 + $0x8] sm:$0xff]   ;;  %v4901_v27 = vld [vmem:[%s6287_s5 + $0x10] sm:$0xff]   ;;  %vm2141_vm4 = vcmask 785408  }
   0x2   :  { %6306 = sst [smem:[#allocation3_spill]] %s6286_s3  ;;  %s6307_s26 = sld [smem:[#allocation2_spill]]  ;;  %4702 = vmatprep.subr.bf16.mxu1 %v4897_v7  ;;  %v4903_v29 = vld [vmem:[%s6287_s5 + $0x18] sm:$0xff]   ;;  %v4905_v31 = vld [vmem:[%s6287_s5 + $0x20] sm:$0xff]   ;;  %v4907_v33 = vld [vmem:[%s6287_s5 + $0x28] sm:$0xff]  }
   0x3   :  { %s6308_s30 = sld [smem:[#allocation3_spill]]  ;;  %4703 = vmatpush3.bf16.msra.mxu1 %v4897_v7  ;;  %v4909_v35 = vld [vmem:[%s6287_s5 + $0x30] sm:$0xff]   ;;  %v4911_v37 = vld [vmem:[%s6287_s5 + $0x38] sm:$0xff]   ;;  %v4912_v38 = vld [vmem:[%s6288_s7] sm:$0xff]  }
   0x4   :  { %4704 = vmatprep.subr.bf16.mxu1 %v4899_v25  ;;  %v4433_v53 = vld [vmem:[%s6289_s1] ss:$0 sm:$0xff] }
   0x5   :  { %v4434_v58 = vld [vmem:[%s6290_s2] ss:$0 sm:$0xff] }
   0x7   :  { %4705 = vmatpush3.bf16.msra.mxu1 %v4899_v25 }
   0x8   :  { %v4563_v0 = vld [vmem:[%s6307_s26] sm:$0xff]   ;;  %v4580_v1 = vld [vmem:[%s6307_s26 + $0x8] sm:$0xff]   ;;  %4706 = vmatprep.subr.bf16.mxu1 %v4901_v27 }
   0x9   :  { %v5168_v2 = vunpack.c.l.bf16 %v4563_v0  ;;  %v5170_v3 = vunpack.c.l.bf16 %v4580_v1  ;;  %v5174_v4 = vunpack.c.h.bf16 %v4563_v0  ;;  %v5176_v5 = vunpack.c.h.bf16 %v4580_v1  ;;  %v4896_v6 = vld [vmem:[%s6308_s30] sm:$0xff]   ;;  %v4898_v24 = vld [vmem:[%s6308_s30 + $0x8] sm:$0xff]   ;;  %v4900_v26 = vld [vmem:[%s6308_s30 + $0x10] sm:$0xff]  }
   0xa   :  { %4682 = vmatprep.subr.bf16.mxu0 %v4896_v6  ;;  %v4902_v28 = vld [vmem:[%s6308_s30 + $0x18] sm:$0xff]   ;;  %v4904_v30 = vld [vmem:[%s6308_s30 + $0x20] sm:$0xff]   ;;  %v4906_v32 = vld [vmem:[%s6308_s30 + $0x28] sm:$0xff]  }
   0xb   :  { %67 = vadd.xlane.f32.xlu0 %v5168_v2  ;;  %71 = vadd.xlane.f32.xlu1 %v5170_v3  ;;  %v4908_v34 = vld [vmem:[%s6308_s30 + $0x30] sm:$0xff]   ;;  %v4910_v36 = vld [vmem:[%s6308_s30 + $0x38] sm:$0xff]  }
   0xc   :  { %4683 = vmatpush3.bf16.msra.mxu0 %v4896_v6  ;;  %4707 = vmatpush3.bf16.msra.mxu1 %v4901_v27 }
   0xd   :  { %4684 = vmatprep.subr.bf16.mxu0 %v4898_v24  ;;  %4708 = vmatprep.subr.bf16.mxu1 %v4903_v29 }
   0xf   :  { %69 = vadd.xlane.f32.xlu0 %v5174_v4  ;;  %73 = vadd.xlane.f32.xlu1 %v5176_v5 }
  0x10   :  { %4685 = vmatpush3.bf16.msra.mxu0 %v4898_v24  ;;  %4709 = vmatpush3.bf16.msra.mxu1 %v4903_v29 }
  0x11   :  { %4686 = vmatprep.subr.bf16.mxu0 %v4900_v26  ;;  %4710 = vmatprep.subr.bf16.mxu1 %v4905_v31 }
  0x14   :  { %4687 = vmatpush3.bf16.msra.mxu0 %v4900_v26  ;;  %4711 = vmatpush3.bf16.msra.mxu1 %v4905_v31 }
  0x15   :  { %4688 = vmatprep.subr.bf16.mxu0 %v4902_v28  ;;  %4712 = vmatprep.subr.bf16.mxu1 %v4907_v33 }
  0x18   :  { %4689 = vmatpush3.bf16.msra.mxu0 %v4902_v28  ;;  %4713 = vmatpush3.bf16.msra.mxu1 %v4907_v33 }
  0x19   :  { %4690 = vmatprep.subr.bf16.mxu0 %v4904_v30  ;;  %4714 = vmatprep.subr.bf16.mxu1 %v4909_v35 }
  0x1c   :  { %4691 = vmatpush3.bf16.msra.mxu0 %v4904_v30  ;;  %4715 = vmatpush3.bf16.msra.mxu1 %v4909_v35 }
  0x1d   :  { %4692 = vmatprep.subr.bf16.mxu0 %v4906_v32  ;;  %4716 = vmatprep.subr.bf16.mxu1 %v4911_v37 }
  0x20   :  { %4693 = vmatpush3.bf16.msra.mxu0 %v4906_v32  ;;  %4717 = vmatpush3.bf16.msra.mxu1 %v4911_v37  ;;  %v4453_v37 = vld [vmem:[%s6293_s8] ss:$0 sm:$0xff] }
  0x21   :  { %4694 = vmatprep.subr.bf16.mxu0 %v4908_v34 }
  0x24   :  { %4695 = vmatpush3.bf16.msra.mxu0 %v4908_v34 }
  0x25   :  { %4696 = vmatprep.subr.bf16.mxu0 %v4910_v36 }
  0x28   :  { %4697 = vmatpush3.bf16.msra.mxu0 %v4910_v36  ;;  %v5067_v36 = vmov 0.0  }
  0x29   :  { %4722 = vmatprep.subr.bf16.mxu0 %v4912_v38  ;;  %4742 = vmatprep.subr.bf16.mxu1 %v5067_v36 }
  0x98   :  { %v68_v8 = vpop.xlane.xlu0 %67  ;;  %v72_v9 = vpop.xlane.xlu1 %71 }
  0x99   :  { %v76_v10 = vmul.f32 0.0078125, %v68_v8  ;;  %v78_v11 = vmul.f32 0.0078125, %v72_v9 }
  0x9b   :  { %v5187_v12 = vsub.f32 %v5168_v2, %v76_v10  ;;  %v5190_v13 = vsub.f32 %v5170_v3, %v78_v11  ;;  %v4913_v11 = vld [vmem:[%s6288_s7 + $0x8] sm:$0xff]  }
  0x9c   :  { %v70_v14 = vpop.xlane.xlu0 %69  ;;  %v74_v15 = vpop.xlane.xlu1 %73 }
  0x9d   :  { %v77_v16 = vmul.f32 0.0078125, %v70_v14  ;;  %v84_v17 = vmul.f32 %v5187_v12, %v5187_v12  ;;  %v79_v18 = vmul.f32 0.0078125, %v74_v15  ;;  %v86_v21 = vmul.f32 %v5190_v13, %v5190_v13  ;;  %v4916_v14 = vld [vmem:[%s6288_s7 + $0x20] sm:$0xff]   ;;  %v4917_v15 = vld [vmem:[%s6288_s7 + $0x28] sm:$0xff]  }
  0x9f   :  { %v5195_v19 = vsub.f32 %v5174_v4, %v77_v16  ;;  %88 = vadd.xlane.f32.xlu0 %v84_v17  ;;  %v5198_v20 = vsub.f32 %v5176_v5, %v79_v18  ;;  %v4918_v16 = vld [vmem:[%s6288_s7 + $0x30] sm:$0xff]   ;;  %v4919_v17 = vld [vmem:[%s6288_s7 + $0x38] sm:$0xff]   ;;  %v4435_v18 = vld [vmem:[%s6291_s4] ss:$0 sm:$0xff]  ;;  %s5064_s4 = smov 64  }
  0xa1   :  { %v85_v22 = vmul.f32 %v5195_v19, %v5195_v19  ;;  %v87_v23 = vmul.f32 %v5198_v20, %v5198_v20 }
  0xa3   :  { %92 = vadd.xlane.f32.xlu0 %v86_v21  ;;  %90 = vadd.xlane.f32.xlu1 %v85_v22 }
  0xa7   :  { %94 = vadd.xlane.f32.xlu1 %v87_v23 }
 0x12c   :  { %v89_v39 = vpop.xlane.xlu0 %88 }
 0x12d   :  { %v96_v40 = vmul.f32 0.0078125, %v89_v39 }
 0x12f   :  { %v100_v41 = vadd.f32 1e-06, %v96_v40 }
 0x130   :  { %v91_v42 = vpop.xlane.xlu1 %90  ;;  %v93_v43 = vpop.xlane.xlu0 %92 }
 0x131   :  { %4968 = vrsqrt.f32 %v100_v41  ;;  %v97_v44 = vmul.f32 0.0078125, %v91_v42  ;;  %v98_v45 = vmul.f32 0.0078125, %v93_v43 }
 0x133   :  { %v101_v46 = vadd.f32 1e-06, %v97_v44  ;;  %v102_v47 = vadd.f32 1e-06, %v98_v45 }
 0x134   :  { %v95_v48 = vpop.xlane.xlu1 %94 }
 0x135   :  { %4970 = vrsqrt.f32 %v101_v46  ;;  %v99_v49 = vmul.f32 0.0078125, %v95_v48  ;;  %v5069_v46 = vmov 1983009808   ;;  %v519_v48 = vlaneseq }
 0x136   :  { %4972 = vrsqrt.f32 %v102_v47  ;;  %v517_v47 = vunpack.c.l.s4 %v5069_v46 }
 0x137   :  { %v103_v50 = vadd.f32 1e-06, %v99_v49  ;;  %v5070_v49 = vmov 1934713408  }
 0x139   :  { %4974 = vrsqrt.f32 %v103_v50  ;;  %v549_v50 = vunpack.c.l.s4 %v5070_v49 }
 0x13b   :  { %v4969_v51 = vpop.eup %4968 }
 0x13c   :  { %v108_v52 = vmul.f32 %v4969_v51, %v5187_v12  ;;  %v4914_v12 = vld [vmem:[%s6288_s7 + $0x10] sm:$0xff]   ;;  %v518_v51 = vunpack.c.0.s8 %v517_v47 }
 0x13e   :  { %v118_v57 = vmul.f32 %v4433_v53, %v108_v52  ;;  %v5357_v52 = vshrl.u32 %v519_v48, 7 }
 0x13f   :  { %v4971_v54 = vpop.eup %4970 }
 0x140   :  { %v4973_v55 = vpop.eup %4972  ;;  %v109_v56 = vmul.f32 %v4971_v54, %v5195_v19  ;;  %v128_v62 = vadd.f32 %v4434_v58, %v118_v57  ;;  %v4444_v19 = vld [vmem:[%s6292_s6] ss:$0 sm:$0xff]  ;;  %s5065_s6 = smov 96  }
 0x141   :  { %v110_v59 = vmul.f32 %v4973_v55, %v5190_v13  ;;  %v4915_v13 = vld [vmem:[%s6288_s7 + $0x18] sm:$0xff]   ;;  %s5066_s7 = smov 32   ;;  %v550_v55 = vunpack.c.0.s8 %v549_v50 }
 0x142   :  { %v119_v60 = vmul.f32 %v4433_v53, %v109_v56  ;;  %v5360_v56 = vsub.s32 %v518_v51, %v5357_v52 }
 0x143   :  { %v4975_v61 = vpop.eup %4974  ;;  %v120_v1 = vmul.f32 %v4433_v53, %v110_v59 }
 0x144   :  { %v129_v63 = vadd.f32 %v4434_v58, %v119_v60  ;;  %v111_v0 = vmul.f32 %v4975_v61, %v5198_v20 }
 0x145   :  { %v130_v8 = vadd.f32 %v4434_v58, %v120_v1 }
 0x146   :  { %v132_v6 = vpack.c.bf16 %v129_v63, %v128_v62  ;;  %v121_v7 = vmul.f32 %v4433_v53, %v111_v0  ;;  %v5365_v63 = vsub.s32 %v550_v55, %v5357_v52 }
 0x148   :  { %4698 = vmatprep.mubr.bf16.mxu0 %v132_v6  ;;  %4718 = vmatprep.mubr.bf16.mxu1 %v132_v6  ;;  %v131_v9 = vadd.f32 %v4434_v58, %v121_v7 }
 0x14a   :  { %v133_v10 = vpack.c.bf16 %v131_v9, %v130_v8 }
 0x14c   :  { %4699 = vmatmul.mubr.bf16.vlgmr.msra.gmra.mrb[0].mxu0 %v133_v10  ;;  %4719 = vmatmul.mubr.bf16.vlgmr.msra.gmra.mrb[0].mxu1 %v133_v10 }
 0x14d   :  { %4723 = vmatpush3.bf16.msra.mxu0 %v4912_v38  ;;  %4738 = vmatprep.mubr.bf16.mxu0 %v132_v6 }
 0x14e   :  { %4724 = vmatprep.subr.bf16.mxu0 %v4913_v11  ;;  %4744 = vmatprep.mubr.msk.bf16.mxu1 %vm5068_vm0, %v5067_v36 }
 0x151   :  { %4725 = vmatpush3.bf16.msra.mxu0 %v4913_v11 }
 0x152   :  { %4726 = vmatprep.subr.bf16.mxu0 %v4914_v12 }
 0x155   :  { %4727 = vmatpush3.bf16.msra.mxu0 %v4914_v12 }
 0x156   :  { %4728 = vmatprep.subr.bf16.mxu0 %v4915_v13 }
 0x159   :  { %4729 = vmatpush3.bf16.msra.mxu0 %v4915_v13 }
 0x15a   :  { %4730 = vmatprep.subr.bf16.mxu0 %v4916_v14 }
 0x15d   :  { %4731 = vmatpush3.bf16.msra.mxu0 %v4916_v14 }
 0x15e   :  { %4732 = vmatprep.subr.bf16.mxu0 %v4917_v15 }
 0x161   :  { %4733 = vmatpush3.bf16.msra.mxu0 %v4917_v15 }
 0x162   :  { %4734 = vmatprep.subr.bf16.mxu0 %v4918_v16 }
 0x165   :  { %4735 = vmatpush3.bf16.msra.mxu0 %v4918_v16 }
 0x166   :  { %4736 = vmatprep.subr.bf16.mxu0 %v4919_v17 }
 0x169   :  { %4737 = vmatpush3.bf16.msra.mxu0 %v4919_v17 }
 0x16a   :  { %4790 = vmatprep.subr.bf16.mxu0 %v5067_v36 }
 0x16c   :  { %4739 = vmatmul.mubr.bf16.vlgmr.msra.gmra.mrb[4].mxu0 %v133_v10 }
 0x16d   :  { %4792 = vmatprep.mubr.msk.bf16.mxu0 %vm5068_vm0, %v5067_v36 }
 0x21f   :  { %v4700_v20 = vpop.f32.mrb[0].mxu0  ;;  %v4720_v21 = vpop.f32.mrb[0].mxu1 }
 0x220   :  { %v5288_v22 = vadd.f32 %v4700_v20, %v4435_v18  ;;  %v5290_v23 = vadd.f32 %v4720_v21, %v4444_v19  ;;  %v239_v24 = vpop.f32.mrb[1].mxu0  ;;  %v359_v25 = vpop.f32.mrb[1].mxu1 }
 0x221   :  { %v5292_v26 = vadd.f32 %v4444_v19, %v359_v25  ;;  %v4701_v27 = vpop.f32.mrb[2].mxu0  ;;  %v4721_v28 = vpop.f32.mrb[2].mxu1  ;;  %v5308_v34 = vadd.f32 %v4435_v18, %v239_v24 }
 0x222   :  { %v5294_v29 = vadd.f32 %v4701_v27, %v4435_v18  ;;  %v5296_v30 = vadd.f32 %v4721_v28, %v4444_v19  ;;  %v242_v31 = vpop.f32.mrb[3].mxu0  ;;  %v362_v32 = vpop.f32.mrb[3].mxu1 }
 0x223   :  { %798 = vrot.lane.b32.xlu1 %v5292_v26, %s5064_s4  ;;  %792 = vrot.lane.b32.xlu0 %v5292_v26, %s5065_s6  ;;  %v5302_v33 = vadd.f32 %v4444_v19, %v362_v32  ;;  %v5318_v35 = vadd.f32 %v4435_v18, %v242_v31 }
 0x227   :  { %794 = vrot.lane.b32.xlu1 %v5302_v33, %s5065_s6  ;;  %804 = vrot.lane.b32.xlu0 %v5292_v26, %s5066_s7 }
 0x22b   :  { %800 = vrot.lane.b32.xlu1 %v5302_v33, %s5064_s4  ;;  %496 = vrot.lane.b32.xlu0 %v5308_v34, %s5065_s6 }
 0x22f   :  { %806 = vrot.lane.b32.xlu1 %v5302_v33, %s5066_s7  ;;  %502 = vrot.lane.b32.xlu0 %v5308_v34, %s5064_s4 }
 0x233   :  { %498 = vrot.lane.b32.xlu1 %v5318_v35, %s5065_s6  ;;  %508 = vrot.lane.b32.xlu0 %v5308_v34, %s5066_s7 }
 0x237   :  { %504 = vrot.lane.b32.xlu1 %v5318_v35, %s5064_s4 }
 0x23b   :  { %510 = vrot.lane.b32.xlu1 %v5318_v35, %s5066_s7 }
 0x23f   :  { %v4740_v38 = vpop.f32.mrb[4].mxu0 }
 0x240   :  { %v5333_v39 = vadd.f32 %v4740_v38, %v4453_v37  ;;  %v479_v40 = vpop.f32.mrb[5].mxu0 }
 0x241   :  { %v5335_v41 = vadd.f32 %v4453_v37, %v479_v40  ;;  %v4741_v42 = vpop.f32.mrb[6].mxu0 }
 0x242   :  { %v5337_v43 = vadd.f32 %v4741_v42, %v4453_v37  ;;  %v482_v44 = vpop.f32.mrb[7].mxu0 }
 0x243   :  { %1094 = vrot.lane.b32.xlu1 %v5335_v41, %s5064_s4  ;;  %1088 = vrot.lane.b32.xlu0 %v5335_v41, %s5065_s6  ;;  %v5343_v45 = vadd.f32 %v4453_v37, %v482_v44 }
 0x247   :  { %1090 = vrot.lane.b32.xlu1 %v5343_v45, %s5065_s6  ;;  %1100 = vrot.lane.b32.xlu0 %v5335_v41, %s5066_s7 }
 0x24b   :  { %1096 = vrot.lane.b32.xlu1 %v5343_v45, %s5064_s4 }
 0x24f   :  { %1102 = vrot.lane.b32.xlu1 %v5343_v45, %s5066_s7 }
 0x295   :  { %v799_v53 = vpop.permute.xlu1 %798  ;;  %v793_v54 = vpop.permute.xlu0 %792 }
 0x296   :  { %v810_v57 = vcombine.low %v5292_v26, %v799_v53  ;;  %v811_v58 = vcombine.high %v5292_v26, %v799_v53 }
 0x298   :  { %v818_v0 = vrot.slane %v810_v57, %v5360_v56  ;;  %v825_v1 = vrot.slane %v811_v58, %v5360_v56 }
 0x299   :  { %v795_v59 = vpop.permute.xlu1 %794  ;;  %v805_v60 = vpop.permute.xlu0 %804 }
 0x29a   :  { %v826_v61 = vcombine.low %v793_v54, %v805_v60  ;;  %v827_v62 = vcombine.high %v793_v54, %v805_v60 }
 0x29c   :  { %v834_v6 = vrot.slane %v826_v61, %v5360_v56  ;;  %v841_v7 = vrot.slane %v827_v62, %v5360_v56 }
 0x29d   :  { %v801_v8 = vpop.permute.xlu1 %800  ;;  %v497_v9 = vpop.permute.xlu0 %496 }
 0x29e   :  { %v842_v10 = vcombine.low %v818_v0, %v834_v6  ;;  %v843_v11 = vcombine.high %v818_v0, %v834_v6  ;;  %v858_v12 = vcombine.low %v825_v1, %v841_v7  ;;  %v859_v13 = vcombine.high %v825_v1, %v841_v7 }
 0x29f   :  { %v878_v14 = vcombine.low %v5302_v33, %v801_v8  ;;  %v879_v15 = vcombine.high %v5302_v33, %v801_v8 }
 0x2a0   :  { %v850_v16 = vrot.slane %v842_v10, %v5365_v63  ;;  %v857_v17 = vrot.slane %v843_v11, %v5365_v63  ;;  %v866_v18 = vrot.slane %v858_v12, %v5365_v63  ;;  %v873_v19 = vrot.slane %v859_v13, %v5365_v63 }
 0x2a1   :  { %v807_v20 = vpop.permute.xlu1 %806  ;;  %v503_v21 = vpop.permute.xlu0 %502  ;;  %v886_v27 = vrot.slane %v878_v14, %v5360_v56  ;;  %v893_v33 = vrot.slane %v879_v15, %v5360_v56 }
 0x2a2   :  { %v946_v24 = vcombine.low %v850_v16, %v857_v17  ;;  %v4466_v25 = vcombine.high %v850_v16, %v857_v17  ;;  %v962_v26 = vcombine.low %v866_v18, %v873_v19  ;;  %v894_v28 = vcombine.low %v795_v59, %v807_v20 }
 0x2a3   :  { %v895_v31 = vcombine.high %v795_v59, %v807_v20  ;;  %v4467_v32 = vcombine.high %v866_v18, %v873_v19  ;;  %v514_v37 = vcombine.low %v5308_v34, %v503_v21  ;;  %v515_v38 = vcombine.high %v5308_v34, %v503_v21 }
 0x2a4   :  { %v5382_v40 = vrot.slane %v946_v24, %v5360_v56  ;;  %v5385_v42 = vrot.slane %v4466_v25, %v5360_v56  ;;  %v902_v44 = vrot.slane %v894_v28, %v5360_v56  ;;  %v5390_v49 = vrot.slane %v962_v26, %v5360_v56 }
 0x2a5   :  { %v909_v46 = vrot.slane %v895_v31, %v5360_v56  ;;  %v499_v47 = vpop.permute.xlu1 %498  ;;  %v509_v48 = vpop.permute.xlu0 %508  ;;  %v522_v57 = vrot.slane %v514_v37, %v5360_v56  ;;  %v529_v58 = vrot.slane %v515_v38, %v5360_v56  ;;  %v5397_v61 = vrot.slane %v4467_v32, %v5360_v56 }
 0x2a6   :  { %v530_v50 = vcombine.low %v497_v9, %v509_v48  ;;  %v531_v51 = vcombine.high %v497_v9, %v509_v48  ;;  %v910_v53 = vcombine.low %v886_v27, %v902_v44  ;;  %v911_v54 = vcombine.high %v886_v27, %v902_v44 }
 0x2a7   :  { %v926_v34 = vcombine.low %v893_v33, %v909_v46  ;;  %v927_v55 = vcombine.high %v893_v33, %v909_v46  ;;  %v978_v6 = vcombine.low %v5382_v40, %v5385_v42  ;;  %v994_v19 = vcombine.low %v5390_v49, %v5397_v61 }
 0x2a8   :  { %v538_v59 = vrot.slane %v530_v50, %v5360_v56  ;;  %v545_v60 = vrot.slane %v531_v51, %v5360_v56  ;;  %v918_v62 = vrot.slane %v910_v53, %v5365_v63  ;;  %v925_v0 = vrot.slane %v911_v54, %v5365_v63 }
 0x2a9   :  { %v505_v1 = vpop.permute.xlu1 %504  ;;  %v934_v11 = vrot.slane %v926_v34, %v5365_v63  ;;  %v941_v12 = vrot.slane %v927_v55, %v5365_v63  ;;  %v5410_v18 = vrot.slane %v978_v6, %v5365_v63 }
 0x2aa   :  { %v546_v7 = vcombine.low %v522_v57, %v538_v59  ;;  %v547_v8 = vcombine.high %v522_v57, %v538_v59  ;;  %v562_v9 = vcombine.low %v529_v58, %v545_v60  ;;  %v563_v10 = vcombine.high %v529_v58, %v545_v60 }
 0x2ab   :  { %v1014_v20 = vcombine.low %v918_v62, %v925_v0  ;;  %v4468_v21 = vcombine.high %v918_v62, %v925_v0  ;;  %v582_v26 = vcombine.low %v5318_v35, %v505_v1  ;;  %v583_v27 = vcombine.high %v5318_v35, %v505_v1 }
 0x2ac   :  { %v554_v13 = vrot.slane %v546_v7, %v5365_v63  ;;  %v561_v14 = vrot.slane %v547_v8, %v5365_v63  ;;  %v570_v15 = vrot.slane %v562_v9, %v5365_v63  ;;  %v577_v16 = vrot.slane %v563_v10, %v5365_v63 }
 0x2ad   :  { %v511_v17 = vpop.permute.xlu1 %510  ;;  %v1030_v32 = vcombine.low %v934_v11, %v941_v12  ;;  %v4469_v33 = vcombine.high %v934_v11, %v941_v12  ;;  %v590_v44 = vrot.slane %v582_v26, %v5360_v56  ;;  %v597_v46 = vrot.slane %v583_v27, %v5360_v56 }
 0x2ae   :  { %v650_v24 = vcombine.low %v554_v13, %v561_v14  ;;  %v4462_v25 = vcombine.high %v554_v13, %v561_v14  ;;  %v598_v28 = vcombine.low %v499_v47, %v511_v17  ;;  %v599_v31 = vcombine.high %v499_v47, %v511_v17 }
 0x2af   :  { %v666_v37 = vcombine.low %v570_v15, %v577_v16  ;;  %v4463_v38 = vcombine.high %v570_v15, %v577_v16  ;;  %v5421_v51 = vrot.slane %v1014_v20, %v5360_v56  ;;  %v5424_v53 = vrot.slane %v4468_v21, %v5360_v56 }
 0x2b0   :  { %v606_v48 = vrot.slane %v598_v28, %v5360_v56  ;;  %v613_v50 = vrot.slane %v599_v31, %v5360_v56  ;;  %v5427_v35 = vrot.slane %v650_v24, %v5360_v56  ;;  %v5430_v47 = vrot.slane %v4462_v25, %v5360_v56 }
 0x2b1   :  { %v5433_v58 = vrot.slane %v1030_v32, %v5360_v56  ;;  %v5436_v59 = vrot.slane %v4469_v33, %v5360_v56  ;;  %v5439_v60 = vrot.slane %v666_v37, %v5360_v56  ;;  %v5442_v62 = vrot.slane %v4463_v38, %v5360_v56 }
 0x2b2   :  { %v614_v54 = vcombine.low %v590_v44, %v606_v48  ;;  %v615_v34 = vcombine.high %v590_v44, %v606_v48  ;;  %v630_v55 = vcombine.low %v597_v46, %v613_v50  ;;  %v631_v57 = vcombine.high %v597_v46, %v613_v50 }
 0x2b3   :  { %v682_v10 = vcombine.low %v5427_v35, %v5430_v47  ;;  %v5452_v12 = vrot.slane %v994_v19, %v5365_v63  ;;  %v1046_v13 = vcombine.low %v5421_v51, %v5424_v53  ;;  %v698_v20 = vcombine.low %v5439_v60, %v5442_v62 }
 0x2b4   :  { %v622_v0 = vrot.slane %v614_v54, %v5365_v63  ;;  %v629_v1 = vrot.slane %v615_v34, %v5365_v63  ;;  %v638_v6 = vrot.slane %v630_v55, %v5365_v63  ;;  %v645_v7 = vrot.slane %v631_v57, %v5365_v63 }
 0x2b5   :  { %v1095_v8 = vpop.permute.xlu1 %1094  ;;  %v1089_v9 = vpop.permute.xlu0 %1088  ;;  %v1054_v24 = vrot.slane %v1046_v13, %v5365_v63  ;;  %v1062_v25 = vcombine.low %v5433_v58, %v5436_v59  ;;  %v1010_v48 = vcombine.low %v5410_v18, %v5452_v12  ;;  %v5486_v57 = vrot.slane %v682_v10, %v5365_v63 }
 0x2b6   :  { %v1106_v11 = vcombine.low %v5335_v41, %v1095_v8  ;;  %v718_v14 = vcombine.low %v622_v0, %v629_v1  ;;  %v4464_v15 = vcombine.high %v622_v0, %v629_v1  ;;  %v734_v16 = vcombine.low %v638_v6, %v645_v7 }
 0x2b7   :  { %v4465_v17 = vcombine.high %v638_v6, %v645_v7  ;;  %v1107_v21 = vcombine.high %v5335_v41, %v1095_v8  ;;  %v1070_v41 = vrot.slane %v1062_v25, %v5365_v63  ;;  %v5489_v0 = vrot.slane %v698_v20, %v5365_v63 }
 0x2b8   :  { %v5463_v19 = vrot.slane %v718_v14, %v5360_v56  ;;  %v5466_v26 = vrot.slane %v4464_v15, %v5360_v56  ;;  %v5469_v27 = vrot.slane %v734_v16, %v5360_v56  ;;  %v1114_v46 = vrot.slane %v1106_v11, %v5360_v56 }
 0x2b9   :  { %v5472_v28 = vrot.slane %v4465_v17, %v5360_v56  ;;  %v1091_v31 = vpop.permute.xlu1 %1090  ;;  %v1101_v32 = vpop.permute.xlu0 %1100  ;;  %v1121_v50 = vrot.slane %v1107_v21, %v5360_v56  ;;  %v1078_v54 = vcombine.low %v1054_v24, %v1070_v41 }
 0x2ba   :  { %v1122_v33 = vcombine.low %v1089_v9, %v1101_v32  ;;  %v1123_v37 = vcombine.high %v1089_v9, %v1101_v32  ;;  %v750_v38 = vcombine.low %v5463_v19, %v5466_v26  ;;  %v751_v32 = vcombine.high %v5463_v19, %v5466_v26 }
 0x2bb   :  { %v766_v44 = vcombine.low %v5469_v27, %v5472_v28  ;;  %v1082_v8 = vpack.c.bf16 %v1078_v54, %v1010_v48 }
 0x2bc   :  { %v1130_v34 = vrot.slane %v1122_v33, %v5360_v56  ;;  %v1137_v55 = vrot.slane %v1123_v37, %v5360_v56  ;;  %v5492_v1 = vrot.slane %v750_v38, %v5365_v63  ;;  %v1011_v38 = vcombine.high %v5410_v18, %v5452_v12 }
 0x2bd   :  { %v5495_v6 = vrot.slane %v766_v44, %v5365_v63  ;;  %v1097_v7 = vpop.permute.xlu1 %1096  ;;  %v1387_v17 = vsel %vm1382_vm1, %v1082_v8, 0 }
 0x2be   :  { %v1138_v9 = vcombine.low %v1114_v46, %v1130_v34  ;;  %v1139_v11 = vcombine.high %v1114_v46, %v1130_v34  ;;  %v1154_v13 = vcombine.low %v1121_v50, %v1137_v55  ;;  %v1155_v14 = vcombine.high %v1121_v50, %v1137_v55  ;;  %4743 = vmatpush3.bf16.xpose.msra.mxu1 %v1387_v17 }
 0x2bf   :  { %v1174_v15 = vcombine.low %v5343_v45, %v1097_v7  ;;  %v1175_v10 = vcombine.high %v5343_v45, %v1097_v7  ;;  %v782_v16 = vcombine.low %v5492_v1, %v5495_v6  ;;  %v714_v45 = vcombine.low %v5486_v57, %v5489_v0  ;;  %4748 = vmatprep.subr.bf16.mxu1 %v5067_v36 }
 0x2c0   :  { %v1146_v20 = vrot.slane %v1138_v9, %v5365_v63  ;;  %v1153_v21 = vrot.slane %v1139_v11, %v5365_v63  ;;  %v1162_v25 = vrot.slane %v1154_v13, %v5365_v63  ;;  %v1169_v33 = vrot.slane %v1155_v14, %v5365_v63 }
 0x2c1   :  { %v1103_v37 = vpop.permute.xlu1 %1102  ;;  %v1182_v34 = vrot.slane %v1174_v15, %v5360_v56  ;;  %v1189_v55 = vrot.slane %v1175_v10, %v5360_v56  ;;  %v1079_v7 = vcombine.high %v1054_v24, %v1070_v41  ;;  %v786_v13 = vpack.c.bf16 %v782_v16, %v714_v45 }
 0x2c2   :  { %v1242_v44 = vcombine.low %v1146_v20, %v1153_v21  ;;  %v4470_v46 = vcombine.high %v1146_v20, %v1153_v21  ;;  %v1190_v48 = vcombine.low %v1091_v31, %v1103_v37  ;;  %v1191_v50 = vcombine.high %v1091_v31, %v1103_v37 }
 0x2c3   :  { %v1258_v54 = vcombine.low %v1162_v25, %v1169_v33  ;;  %v4471_v8 = vcombine.high %v1162_v25, %v1169_v33  ;;  %v1083_v31 = vpack.c.bf16 %v1079_v7, %v1011_v38  ;;  %v715_v14 = vcombine.high %v5486_v57, %v5489_v0 }
 0x2c4   :  { %v1198_v9 = vrot.slane %v1190_v48, %v5360_v56  ;;  %v1205_v11 = vrot.slane %v1191_v50, %v5360_v56  ;;  %v5518_v18 = vrot.slane %v1242_v44, %v5360_v56  ;;  %v5521_v12 = vrot.slane %v4470_v46, %v5360_v56 }
 0x2c5   :  { %v1265_v41 = vrot.slane %v1258_v54, %v5360_v56  ;;  %v1434_v20 = vsel %vm1382_vm1, %v1083_v31, 0  ;;  %v979_v16 = vcombine.high %v5382_v40, %v5385_v42  ;;  %v995_v21 = vcombine.high %v5390_v49, %v5397_v61  ;;  %4745 = vmatmul.mubr.msk.bf16.vlgmr.msra.gmra.mrb[4].mxu1 %vm1382_vm1, %v786_v13 }
 0x2c6   :  { %v1206_v15 = vcombine.low %v1182_v34, %v1198_v9  ;;  %v1207_v17 = vcombine.high %v1182_v34, %v1198_v9  ;;  %v1222_v10 = vcombine.low %v1189_v55, %v1205_v11  ;;  %v1223_v24 = vcombine.high %v1189_v55, %v1205_v11  ;;  %4749 = vmatpush3.bf16.xpose.msra.mxu1 %v1434_v20 }
 0x2c7   :  { %v1273_v37 = vrot.slane %v4471_v8, %v5360_v56  ;;  %4750 = vmatprep.mubr.msk.bf16.mxu1 %vm5068_vm0, %v5067_v36  ;;  %v783_v40 = vcombine.high %v5492_v1, %v5495_v6  ;;  %v1047_v42 = vcombine.high %v5421_v51, %v5424_v53  ;;  %4754 = vmatprep.subr.bf16.mxu1 %v5067_v36 }
 0x2c8   :  { %v1214_v25 = vrot.slane %v1206_v15, %v5365_v63  ;;  %v1221_v33 = vrot.slane %v1207_v17, %v5365_v63  ;;  %v1230_v57 = vrot.slane %v1222_v10, %v5365_v63  ;;  %v1237_v0 = vrot.slane %v1223_v24, %v5365_v63 }
 0x2c9   :  { %v993_v44 = vrot.slane %v979_v16, %v5365_v63  ;;  %v1009_v46 = vrot.slane %v995_v21, %v5365_v63  ;;  %v1061_v48 = vrot.slane %v1047_v42, %v5365_v63  ;;  %v1063_v50 = vcombine.high %v5433_v58, %v5436_v59 }
 0x2ca   :  { %v1310_v49 = vcombine.low %v1214_v25, %v1221_v33  ;;  %v4472_v61 = vcombine.high %v1214_v25, %v1221_v33  ;;  %v1326_v45 = vcombine.low %v1230_v57, %v1237_v0  ;;  %v4473_v38 = vcombine.high %v1230_v57, %v1237_v0 }
 0x2cb   :  { %v683_v54 = vcombine.high %v5427_v35, %v5430_v47  ;;  %v767_v34 = vcombine.high %v5469_v27, %v5472_v28  ;;  %v1077_v55 = vrot.slane %v1063_v50, %v5365_v63  ;;  %v787_v7 = vpack.c.bf16 %v783_v40, %v715_v14 }
 0x2cc   :  { %v1317_v1 = vrot.slane %v1310_v49, %v5360_v56  ;;  %v1325_v6 = vrot.slane %v4472_v61, %v5360_v56  ;;  %v1333_v51 = vrot.slane %v1326_v45, %v5360_v56  ;;  %v1341_v53 = vrot.slane %v4473_v38, %v5360_v56 }
 0x2cd   :  { %v1274_v58 = vcombine.low %v5518_v18, %v5521_v12  ;;  %v1290_v59 = vcombine.low %v1265_v41, %v1273_v37  ;;  %v699_v9 = vcombine.high %v5439_v60, %v5442_v62  ;;  %v1012_v11 = vcombine.low %v993_v44, %v1009_v46  ;;  %4751 = vmatmul.mubr.msk.bf16.vlgmr.msra.gmra.mrb[8].mxu1 %vm1382_vm1, %v787_v7 }
 0x2ce   :  { %v1342_v8 = vcombine.low %v1317_v1, %v1325_v6  ;;  %v1080_v13 = vcombine.low %v1061_v48, %v1077_v55  ;;  %v1358_v31 = vcombine.low %v1333_v51, %v1341_v53  ;;  %v765_v35 = vrot.slane %v751_v32, %v5365_v63  ;;  %4756 = vmatprep.mubr.msk.bf16.mxu1 %vm5068_vm0, %v5067_v36 }
 0x2cf   :  { %v1282_v47 = vrot.slane %v1274_v58, %v5365_v63  ;;  %v1298_v27 = vrot.slane %v1290_v59, %v5365_v63  ;;  %v781_v14 = vrot.slane %v767_v34, %v5365_v63  ;;  %v1275_v62 = vcombine.high %v5518_v18, %v5521_v12 }
 0x2d0   :  { %v1350_v28 = vrot.slane %v1342_v8, %v5365_v63  ;;  %v1084_v15 = vpack.c.bf16 %v1080_v13, %v1012_v11  ;;  %v1366_v60 = vrot.slane %v1358_v31, %v5365_v63  ;;  %v697_v19 = vrot.slane %v683_v54, %v5365_v63 }
 0x2d1   :  { %v1307_v26 = vcombine.high %v1282_v47, %v1298_v27  ;;  %v1291_v32 = vcombine.high %v1265_v41, %v1273_v37  ;;  %v1343_v17 = vcombine.high %v1317_v1, %v1325_v6  ;;  %v713_v10 = vrot.slane %v699_v9, %v5365_v63 }
 0x2d2   :  { %v1481_v24 = vsel %vm1382_vm1, %v1084_v15, 0  ;;  %v1081_v20 = vcombine.high %v1061_v48, %v1077_v55  ;;  %v1375_v16 = vcombine.high %v1350_v28, %v1366_v60  ;;  %v1289_v21 = vrot.slane %v1275_v62, %v5365_v63 }
 0x2d3   :  { %4755 = vmatpush3.bf16.xpose.msra.mxu1 %v1481_v24  ;;  %v1305_v25 = vrot.slane %v1291_v32, %v5365_v63  ;;  %v1357_v33 = vrot.slane %v1343_v17, %v5365_v63  ;;  %v1359_v57 = vcombine.high %v1333_v51, %v1341_v53  ;;  %v784_v18 = vcombine.low %v765_v35, %v781_v14 }
 0x2d4   :  { %4760 = vmatprep.subr.bf16.mxu1 %v5067_v36  ;;  %v1013_v12 = vcombine.high %v993_v44, %v1009_v46  ;;  %v5583_v41 = vpack.c.bf16 %v1375_v16, %v1307_v26  ;;  %v716_v42 = vcombine.low %v697_v19, %v713_v10  ;;  %v785_v44 = vcombine.high %v765_v35, %v781_v14 }
 0x2d5   :  { %v1308_v0 = vcombine.low %v1289_v21, %v1305_v25  ;;  %v1373_v37 = vrot.slane %v1359_v57, %v5365_v63  ;;  %v1309_v40 = vcombine.high %v1289_v21, %v1305_v25  ;;  %v1374_v46 = vcombine.low %v1350_v28, %v1366_v60 }
 0x2d6   :  { %v1085_v49 = vpack.c.bf16 %v1081_v20, %v1013_v12  ;;  %v788_v38 = vpack.c.bf16 %v784_v18, %v716_v42  ;;  %v717_v6 = vcombine.high %v697_v19, %v713_v10  ;;  %v1306_v51 = vcombine.low %v1282_v47, %v1298_v27 }
 0x2d7   :  { %v1376_v61 = vcombine.low %v1357_v33, %v1373_v37  ;;  %v1377_v45 = vcombine.high %v1357_v33, %v1373_v37 }
 0x2d8   :  { %v1528_v1 = vsel %vm1382_vm1, %v1085_v49, 0  ;;  %v789_v53 = vpack.c.bf16 %v785_v44, %v717_v6  ;;  %v1378_v54 = vpack.c.bf16 %v1374_v46, %v1306_v51 }
 0x2d9   :  { %v5586_v48 = vpack.c.bf16 %v1376_v61, %v1308_v0  ;;  %v5588_v50 = vpack.c.bf16 %v1377_v45, %v1309_v40 }
 0x2da   :  { %4757 = vmatmul.mubr.msk.bf16.vlgmr.msra.gmra.mrb[12].mxu1 %vm1382_vm1, %v788_v38 }
 0x2db   :  { %4761 = vmatpush3.bf16.xpose.msra.mxu1 %v1528_v1  ;;  %4762 = vmatprep.mubr.msk.bf16.mxu1 %vm5068_vm0, %v5067_v36 }
 0x2dc   :  { %4766 = vmatprep.subr.bf16.mxu1 %v5067_v36 }
 0x2e2   :  { %4763 = vmatmul.mubr.msk.bf16.vlgmr.msra.gmra.mrb[16].mxu1 %vm1382_vm1, %v789_v53 }
 0x2e3   :  { %4767 = vmatpush3.bf16.msra.mxu1 %v1378_v54  ;;  %4768 = vmatprep.mubr.msk.bf16.mxu1 %vm5068_vm0, %v5067_v36 }
 0x2e4   :  { %4772 = vmatprep.subr.bf16.mxu1 %v5067_v36 }
 0x398   :  { %v1423_v34 = vpop.f32.mrb[4].mxu1 }
 0x399   :  { %v4746_v55 = vpop.f32.mrb[5].mxu1  ;;  %v1572_v7 = vsel %vm1571_vm2, %v1423_v34, -inf }
 0x39a   :  { %1573 = vmax.xlane.f32.xlu0 %v1572_v7  ;;  %v1426_v58 = vpop.f32.mrb[6].mxu1 }
 0x39b   :  { %v4747_v59 = vpop.f32.mrb[7].mxu1  ;;  %v1575_v8 = vsel %vm1571_vm2, %v1426_v58, -inf }
 0x39c   :  { %1576 = vmax.xlane.f32.xlu1 %v1575_v8 }
 0x3a0   :  { %v1470_v9 = vpop.f32.mrb[8].mxu1 }
 0x3a1   :  { %v4752_v11 = vpop.f32.mrb[9].mxu1  ;;  %v1578_v13 = vsel %vm1571_vm2, %v1470_v9, -inf }
 0x3a2   :  { %1579 = vmax.xlane.f32.xlu0 %v1578_v13  ;;  %v1473_v31 = vpop.f32.mrb[10].mxu1 }
 0x3a3   :  { %v4753_v35 = vpop.f32.mrb[11].mxu1  ;;  %v1581_v47 = vsel %vm1571_vm2, %v1473_v31, -inf }
 0x3a6   :  { %1582 = vmax.xlane.f32.xlu0 %v1581_v47 }
 0x3ad   :  { %v1517_v27 = vpop.f32.mrb[12].mxu1  ;;  %2444 = vrot.lane.b32.xlu1 %v5296_v30, %s5065_s6 }
 0x3ae   :  { %v4758_v28 = vpop.f32.mrb[13].mxu1  ;;  %v1584_v14 = vsel %vm1571_vm2, %v1517_v27, -inf }
 0x3af   :  { %1585 = vmax.xlane.f32.xlu0 %v1584_v14  ;;  %v1520_v15 = vpop.f32.mrb[14].mxu1 }
 0x3b0   :  { %v4759_v60 = vpop.f32.mrb[15].mxu1  ;;  %v1587_v17 = vsel %vm1571_vm2, %v1520_v15, -inf }
 0x3b1   :  { %2448 = vrot.lane.b32.xlu1 %v5290_v23, %s5064_s4 }
 0x3b5   :  { %v5608_v62 = vpop.f32.mrb[16].mxu1 }
 0x3b6   :  { %v4764_v19 = vpop.f32.mrb[17].mxu1  ;;  %v1590_v10 = vsel %vm1571_vm2, %v5608_v62, -inf }
 0x3b7   :  { %v5610_v26 = vpop.f32.mrb[18].mxu1 }
 0x3b8   :  { %v4765_v32 = vpop.f32.mrb[19].mxu1  ;;  %v1593_v24 = vsel %vm1571_vm2, %v5610_v26, -inf }
 0x3c5   :  { %2442 = vrot.lane.b32.xlu0 %v5290_v23, %s5065_s6 }
 0x3d5   :  { %1588 = vmax.xlane.f32.xlu1 %v1587_v17 }
 0x3e4   :  { %1591 = vmax.xlane.f32.xlu0 %v1590_v10 }
 0x3e6   :  { %2450 = vrot.lane.b32.xlu1 %v5296_v30, %s5064_s4 }
 0x3fa   :  { %2454 = vrot.lane.b32.xlu0 %v5290_v23, %s5066_s7 }
 0x3fe   :  { %2146 = vrot.lane.b32.xlu0 %v5288_v22, %s5065_s6 }
 0x402   :  { %2152 = vrot.lane.b32.xlu0 %v5288_v22, %s5064_s4 }
 0x40a   :  { %1594 = vmax.xlane.f32.xlu1 %v1593_v24 }
 0x41b   :  { %2456 = vrot.lane.b32.xlu1 %v5296_v30, %s5066_s7 }
 0x41f   :  { %2148 = vrot.lane.b32.xlu1 %v5294_v29, %s5065_s6 }
 0x423   :  { %2154 = vrot.lane.b32.xlu1 %v5294_v29, %s5064_s4 }
 0x427   :  { %v1574_v20 = vpop.xlane.xlu0 %1573 }
 0x428   :  { %v1596_v16 = vsub.f32 %v1423_v34, %v1574_v20 }
 0x429   :  { %v1577_v25 = vpop.xlane.xlu1 %1576 }
 0x42a   :  { %v1604_v21 = vmul.f32 1.442695, %v1596_v16  ;;  %v1597_v18 = vsub.f32 %v1426_v58, %v1577_v25 }
 0x42c   :  { %4976 = vpow2.f32 %v1604_v21  ;;  %v1606_v37 = vmul.f32 1.442695, %v1597_v18 }
 0x42d   :  { %v5653_v7 = vpop.permute.xlu1 %2444 }
 0x42f   :  { %v1580_v33 = vpop.xlane.xlu0 %1579 }
 0x430   :  { %v1598_v57 = vsub.f32 %v1470_v9, %v1580_v33 }
 0x431   :  { %v2449_v58 = vpop.permute.xlu1 %2448 }
 0x432   :  { %v1608_v12 = vmul.f32 1.442695, %v1598_v57  ;;  %v2460_v47 = vcombine.low %v5290_v23, %v2449_v58 }
 0x433   :  { %v1583_v0 = vpop.xlane.xlu0 %1582 }
 0x434   :  { %4978 = vpow2.f32 %v1608_v12  ;;  %v1599_v40 = vsub.f32 %v1473_v31, %v1583_v0  ;;  %v2468_v32 = vrot.slane %v2460_v47, %v5360_v56 }
 0x435   :  { %4980 = vpow2.f32 %v1606_v37 }
 0x436   :  { %v5633_v42 = vpop.eup %4976  ;;  %v1610_v61 = vmul.f32 1.442695, %v1599_v40 }
 0x437   :  { %v1620_v49 = vsel %vm1571_vm2, %v5633_v42, 0.0 }
 0x438   :  { %1621 = vadd.xlane.f32.xlu0 %v1620_v49  ;;  %4982 = vpow2.f32 %v1610_v61 }
 0x43c   :  { %v1586_v45 = vpop.xlane.xlu0 %1585 }
 0x43d   :  { %v1600_v38 = vsub.f32 %v1517_v27, %v1586_v45  ;;  %v2461_v27 = vcombine.high %v5290_v23, %v2449_v58 }
 0x43e   :  { %v5637_v44 = vpop.eup %4978 }
 0x43f   :  { %v1612_v1 = vmul.f32 1.442695, %v1600_v38  ;;  %v1626_v46 = vsel %vm1571_vm2, %v5637_v44, 0.0  ;;  %v5641_v6 = vpop.eup %4980  ;;  %v2475_v17 = vrot.slane %v2461_v27, %v5360_v56 }
 0x440   :  { %1627 = vadd.xlane.f32.xlu0 %v1626_v46  ;;  %v1623_v51 = vsel %vm1571_vm2, %v5641_v6, 0.0  ;;  %v2443_v11 = vpop.permute.xlu0 %2442 }
 0x441   :  { %4984 = vpow2.f32 %v1612_v1 }
 0x442   :  { %v5645_v53 = vpop.eup %4982 }
 0x443   :  { %v1629_v55 = vsel %vm1571_vm2, %v5645_v53, 0.0 }
 0x447   :  { %1624 = vadd.xlane.f32.xlu1 %v1623_v51 }
 0x44b   :  { %v5647_v54 = vpop.eup %4984  ;;  %1630 = vadd.xlane.f32.xlu1 %v1629_v55 }
 0x44c   :  { %v1632_v34 = vsel %vm1571_vm2, %v5647_v54, 0.0 }
 0x44d   :  { %1633 = vadd.xlane.f32.xlu0 %v1632_v34 }
 0x462   :  { %v1589_v59 = vpop.xlane.xlu1 %1588 }
 0x463   :  { %v1601_v8 = vsub.f32 %v1520_v15, %v1589_v59 }
 0x465   :  { %v1614_v9 = vmul.f32 1.442695, %v1601_v8 }
 0x466   :  { %v2451_v47 = vpop.permute.xlu1 %2450 }
 0x467   :  { %4986 = vpow2.f32 %v1614_v9 }
 0x471   :  { %v1592_v13 = vpop.xlane.xlu0 %1591  ;;  %v5656_v35 = vpop.eup %4986 }
 0x472   :  { %v1602_v31 = vsub.f32 %v5608_v62, %v1592_v13  ;;  %v1635_v14 = vsel %vm1571_vm2, %v5656_v35, 0.0 }
 0x473   :  { %1636 = vadd.xlane.f32.xlu0 %v1635_v14  ;;  %v2528_v14 = vcombine.low %v5296_v30, %v2451_v47 }
 0x474   :  { %v1616_v28 = vmul.f32 1.442695, %v1602_v31 }
 0x475   :  { %v2455_v60 = vpop.permute.xlu0 %2454 }
 0x476   :  { %4988 = vpow2.f32 %v1616_v28  ;;  %v2476_v15 = vcombine.low %v2443_v11, %v2455_v60  ;;  %v2477_v19 = vcombine.high %v2443_v11, %v2455_v60  ;;  %v2529_v60 = vcombine.high %v5296_v30, %v2451_v47 }
 0x478   :  { %v2484_v62 = vrot.slane %v2476_v15, %v5360_v56  ;;  %v2491_v10 = vrot.slane %v2477_v19, %v5360_v56 }
 0x47a   :  { %v2492_v24 = vcombine.low %v2468_v32, %v2484_v62  ;;  %v2493_v20 = vcombine.high %v2468_v32, %v2484_v62  ;;  %v2508_v23 = vcombine.low %v2475_v17, %v2491_v10  ;;  %v2509_v16 = vcombine.high %v2475_v17, %v2491_v10 }
 0x47b   :  { %v2536_v62 = vrot.slane %v2528_v14, %v5360_v56  ;;  %v2543_v10 = vrot.slane %v2529_v60, %v5360_v56 }
 0x47c   :  { %v2500_v21 = vrot.slane %v2492_v24, %v5365_v63  ;;  %v2507_v25 = vrot.slane %v2493_v20, %v5365_v63  ;;  %v2516_v33 = vrot.slane %v2508_v23, %v5365_v63  ;;  %v2523_v57 = vrot.slane %v2509_v16, %v5365_v63 }
 0x47e   :  { %v2596_v18 = vcombine.low %v2500_v21, %v2507_v25  ;;  %v4490_v12 = vcombine.high %v2500_v21, %v2507_v25  ;;  %v2612_v0 = vcombine.low %v2516_v33, %v2523_v57  ;;  %v4491_v37 = vcombine.high %v2516_v33, %v2523_v57 }
 0x480   :  { %v5670_v40 = vpop.eup %4988  ;;  %v2603_v49 = vrot.slane %v2596_v18, %v5360_v56  ;;  %v2611_v61 = vrot.slane %v4490_v12, %v5360_v56  ;;  %v2619_v45 = vrot.slane %v2612_v0, %v5360_v56  ;;  %v2627_v38 = vrot.slane %v4491_v37, %v5360_v56 }
 0x481   :  { %v1638_v1 = vsel %vm1571_vm2, %v5670_v40, 0.0 }
 0x482   :  { %1639 = vadd.xlane.f32.xlu0 %v1638_v1  ;;  %v2628_v46 = vcombine.low %v2603_v49, %v2611_v61  ;;  %v2644_v51 = vcombine.low %v2619_v45, %v2627_v38  ;;  %v2629_v34 = vcombine.high %v2603_v49, %v2611_v61  ;;  %v2645_v55 = vcombine.high %v2619_v45, %v2627_v38 }
 0x484   :  { %v2636_v58 = vrot.slane %v2628_v46, %v5365_v63  ;;  %v2652_v59 = vrot.slane %v2644_v51, %v5365_v63  ;;  %v2643_v8 = vrot.slane %v2629_v34, %v5365_v63  ;;  %v2659_v9 = vrot.slane %v2645_v55, %v5365_v63 }
 0x486   :  { %v2661_v11 = vcombine.high %v2636_v58, %v2652_v59  ;;  %v2662_v13 = vcombine.low %v2643_v8, %v2659_v9  ;;  %v2663_v31 = vcombine.high %v2643_v8, %v2659_v9 }
 0x497   :  { %v1595_v27 = vpop.xlane.xlu1 %1594 }
 0x498   :  { %2158 = vrot.lane.b32.xlu0 %v5288_v22, %s5066_s7  ;;  %v1603_v28 = vsub.f32 %v5610_v26, %v1595_v27 }
 0x49a   :  { %v1618_v15 = vmul.f32 1.442695, %v1603_v28  ;;  %v2660_v28 = vcombine.low %v2636_v58, %v2652_v59  ;;  %v2147_v58 = vpop.permute.xlu0 %2146 }
 0x49b   :  { %v2457_v19 = vpop.permute.xlu1 %2456 }
 0x49c   :  { %4990 = vpow2.f32 %v1618_v15  ;;  %v2544_v32 = vcombine.low %v5653_v7, %v2457_v19  ;;  %v2545_v17 = vcombine.high %v5653_v7, %v2457_v19 }
 0x49e   :  { %v2552_v24 = vrot.slane %v2544_v32, %v5360_v56  ;;  %v2559_v20 = vrot.slane %v2545_v17, %v5360_v56 }
 0x49f   :  { %v5719_v59 = vpop.permute.xlu1 %2148 }
 0x4a0   :  { %v2560_v26 = vcombine.low %v2536_v62, %v2552_v24  ;;  %v2561_v23 = vcombine.high %v2536_v62, %v2552_v24  ;;  %v2576_v16 = vcombine.low %v2543_v10, %v2559_v20  ;;  %v2577_v21 = vcombine.high %v2543_v10, %v2559_v20  ;;  %v2153_v20 = vpop.permute.xlu0 %2152 }
 0x4a2   :  { %v2568_v30 = vrot.slane %v2560_v26, %v5365_v63  ;;  %v2575_v25 = vrot.slane %v2561_v23, %v5365_v63  ;;  %v2584_v33 = vrot.slane %v2576_v16, %v5365_v63  ;;  %v2591_v7 = vrot.slane %v2577_v21, %v5365_v63 }
 0x4a3   :  { %v5721_v26 = vpop.permute.xlu1 %2154 }
 0x4a4   :  { %v2664_v57 = vcombine.low %v2568_v30, %v2575_v25  ;;  %v4492_v18 = vcombine.high %v2568_v30, %v2575_v25  ;;  %v2680_v12 = vcombine.low %v2584_v33, %v2591_v7  ;;  %v4493_v0 = vcombine.high %v2584_v33, %v2591_v7 }
 0x4a6   :  { %v5697_v37 = vpop.eup %4990  ;;  %v2671_v49 = vrot.slane %v2664_v57, %v5360_v56  ;;  %v2679_v61 = vrot.slane %v4492_v18, %v5360_v56  ;;  %v2687_v45 = vrot.slane %v2680_v12, %v5360_v56  ;;  %v2695_v38 = vrot.slane %v4493_v0, %v5360_v56 }
 0x4a7   :  { %v1641_v1 = vsel %vm1571_vm2, %v5697_v37, 0.0 }
 0x4a8   :  { %1642 = vadd.xlane.f32.xlu1 %v1641_v1  ;;  %v2696_v46 = vcombine.low %v2671_v49, %v2679_v61  ;;  %v2712_v51 = vcombine.low %v2687_v45, %v2695_v38  ;;  %v2697_v34 = vcombine.high %v2671_v49, %v2679_v61  ;;  %v2713_v55 = vcombine.high %v2687_v45, %v2695_v38 }
 0x4aa   :  { %v2704_v8 = vrot.slane %v2696_v46, %v5365_v63  ;;  %v2720_v9 = vrot.slane %v2712_v51, %v5365_v63  ;;  %v2711_v47 = vrot.slane %v2697_v34, %v5365_v63  ;;  %v2727_v27 = vrot.slane %v2713_v55, %v5365_v63 }
 0x4ab   :  { %v2164_v46 = vcombine.low %v5288_v22, %v2153_v20 }
 0x4ac   :  { %v2728_v14 = vcombine.low %v2704_v8, %v2720_v9  ;;  %v2729_v60 = vcombine.high %v2704_v8, %v2720_v9  ;;  %v2730_v15 = vcombine.low %v2711_v47, %v2727_v27  ;;  %v2731_v19 = vcombine.high %v2711_v47, %v2727_v27 }
 0x4ad   :  { %v2172_v34 = vrot.slane %v2164_v46, %v5360_v56 }
 0x4ae   :  { %v2732_v32 = vpack.c.bf16 %v2728_v14, %v2660_v28  ;;  %v5709_v17 = vpack.c.bf16 %v2729_v60, %v2661_v11  ;;  %v5711_v62 = vpack.c.bf16 %v2730_v15, %v2662_v13  ;;  %v5713_v10 = vpack.c.bf16 %v2731_v19, %v2663_v31 }
 0x4af   :  { %v2232_v15 = vcombine.low %v5294_v29, %v5721_v26  ;;  %v2233_v19 = vcombine.high %v5294_v29, %v5721_v26 }
 0x4b0   :  { %v3036_v24 = vsel %vm1382_vm1, %v2732_v32, 0 }
 0x4b1   :  { %4791 = vmatpush3.bf16.xpose.msra.mxu0 %v3036_v24 }
 0x4b2   :  { %4802 = vmatprep.subr.bf16.mxu0 %v5067_v36 }
 0x4b9   :  { %2160 = vrot.lane.b32.xlu1 %v5294_v29, %s5066_s7 }
 0x4c5   :  { %v1622_v11 = vpop.xlane.xlu0 %1621 }
 0x4c6   :  { %4992 = vrcp.f32 %v1622_v11 }
 0x4cd   :  { %v1628_v31 = vpop.xlane.xlu0 %1627 }
 0x4d0   :  { %v4993_v16 = vpop.eup %4992 }
 0x4d1   :  { %v1652_v30 = vmul.f32 %v4993_v16, %v5633_v42  ;;  %v2247_v16 = vrot.slane %v2233_v19, %v5360_v56 }
 0x4d4   :  { %v1625_v13 = vpop.xlane.xlu1 %1624 }
 0x4d5   :  { %4994 = vrcp.f32 %v1625_v13 }
 0x4d8   :  { %v1631_v23 = vpop.xlane.xlu1 %1630 }
 0x4d9   :  { %4996 = vrcp.f32 %v1631_v23  ;;  %v2240_v23 = vrot.slane %v2232_v15, %v5360_v56 }
 0x4da   :  { %4998 = vrcp.f32 %v1628_v31 }
 0x4df   :  { %v4995_v21 = vpop.eup %4994 }
 0x4e0   :  { %v1653_v25 = vmul.f32 %v4995_v21, %v5641_v6 }
 0x4e2   :  { %v1660_v33 = vpack.c.bf16 %v1653_v25, %v1652_v30 }
 0x4e3   :  { %v4997_v7 = vpop.eup %4996 }
 0x4e4   :  { %4769 = vmatmul.mubr.msk.bf16.vlgmr.msra.gmra.mrb[20].mxu1 %vm1571_vm2, %v1660_v33  ;;  %v4999_v57 = vpop.eup %4998  ;;  %v1655_v18 = vmul.f32 %v4997_v7, %v5645_v53 }
 0x4e5   :  { %4773 = vmatpush3.bf16.msra.mxu1 %v5583_v41  ;;  %4774 = vmatprep.mubr.msk.bf16.mxu1 %vm5068_vm0, %v5067_v36  ;;  %v1654_v12 = vmul.f32 %v4999_v57, %v5637_v44  ;;  %v1634_v41 = vpop.xlane.xlu0 %1633 }
 0x4e6   :  { %4778 = vmatprep.subr.bf16.mxu1 %v5067_v36  ;;  %5000 = vrcp.f32 %v1634_v41 }
 0x4e7   :  { %v1661_v0 = vpack.c.bf16 %v1655_v18, %v1654_v12 }
 0x4ec   :  { %4775 = vmatmul.mubr.msk.bf16.vlgmr.msra.gmra.mrb[24].mxu1 %vm1571_vm2, %v1661_v0 }
 0x4ed   :  { %4779 = vmatpush3.bf16.msra.mxu1 %v5586_v48  ;;  %4780 = vmatprep.mubr.msk.bf16.mxu1 %vm5068_vm0, %v5067_v36 }
 0x4ee   :  { %4784 = vmatprep.subr.bf16.mxu1 %v5067_v36 }
 0x4f0   :  { %v5001_v6 = vpop.eup %5000 }
 0x4f1   :  { %v1656_v49 = vmul.f32 %v5001_v6, %v5647_v54  ;;  %v2165_v54 = vcombine.high %v5288_v22, %v2153_v20 }
 0x500   :  { %v1637_v42 = vpop.xlane.xlu0 %1636 }
 0x501   :  { %5002 = vrcp.f32 %v1637_v42 }
 0x50b   :  { %v5003_v53 = vpop.eup %5002 }
 0x50c   :  { %v1657_v44 = vmul.f32 %v5003_v53, %v5656_v35 }
 0x50e   :  { %v1662_v61 = vpack.c.bf16 %v1657_v44, %v1656_v49 }
 0x50f   :  { %v1640_v48 = vpop.xlane.xlu0 %1639 }
 0x510   :  { %4781 = vmatmul.mubr.msk.bf16.vlgmr.msra.gmra.mrb[28].mxu1 %vm1571_vm2, %v1662_v61  ;;  %5004 = vrcp.f32 %v1640_v48 }
 0x511   :  { %4785 = vmatpush3.bf16.msra.mxu1 %v5588_v50  ;;  %4786 = vmatprep.mubr.msk.bf16.mxu1 %vm5068_vm0, %v5067_v36  ;;  %v2179_v50 = vrot.slane %v2165_v54, %v5360_v56 }
 0x512   :  { %4796 = vmatprep.subr.bf16.mxu1 %v5067_v36 }
 0x513   :  { %v2159_v45 = vpop.permute.xlu0 %2158 }
 0x514   :  { %v2180_v38 = vcombine.low %v2147_v58, %v2159_v45  ;;  %v2181_v1 = vcombine.high %v2147_v58, %v2159_v45 }
 0x516   :  { %v2188_v35 = vrot.slane %v2180_v38, %v5360_v56  ;;  %v2195_v51 = vrot.slane %v2181_v1, %v5360_v56 }
 0x518   :  { %v2196_v55 = vcombine.low %v2172_v34, %v2188_v35  ;;  %v2197_v8 = vcombine.high %v2172_v34, %v2188_v35  ;;  %v2212_v9 = vcombine.low %v2179_v50, %v2195_v51  ;;  %v2213_v47 = vcombine.high %v2179_v50, %v2195_v51 }
 0x51a   :  { %v2204_v27 = vrot.slane %v2196_v55, %v5365_v63  ;;  %v2211_v28 = vrot.slane %v2197_v8, %v5365_v63  ;;  %v2220_v14 = vrot.slane %v2212_v9, %v5365_v63  ;;  %v2227_v22 = vrot.slane %v2213_v47, %v5365_v63  ;;  %v5005_v7 = vpop.eup %5004 }
 0x51b   :  { %v1658_v49 = vmul.f32 %v5005_v7, %v5670_v40  ;;  %v3083_v40 = vsel %vm1382_vm1, %v5709_v17, 0 }
 0x51c   :  { %v2300_v32 = vcombine.low %v2204_v27, %v2211_v28  ;;  %v4486_v24 = vcombine.high %v2204_v27, %v2211_v28  ;;  %v2316_v58 = vcombine.low %v2220_v14, %v2227_v22  ;;  %v4487_v20 = vcombine.high %v2220_v14, %v2227_v22 }
 0x51e   :  { %v2307_v25 = vrot.slane %v2300_v32, %v5360_v56  ;;  %v2315_v29 = vrot.slane %v4486_v24, %v5360_v56  ;;  %v2323_v26 = vrot.slane %v2316_v58, %v5360_v56  ;;  %v2331_v33 = vrot.slane %v4487_v20, %v5360_v56 }
 0x520   :  { %v2332_v44 = vcombine.low %v2307_v25, %v2315_v29  ;;  %v2348_v61 = vcombine.low %v2323_v26, %v2331_v33  ;;  %v2333_v22 = vcombine.high %v2307_v25, %v2315_v29  ;;  %v2349_v17 = vcombine.high %v2323_v26, %v2331_v33 }
 0x522   :  { %v2356_v55 = vrot.slane %v2348_v61, %v5365_v63 }
 0x535   :  { %v1643_v60 = vpop.xlane.xlu1 %1642 }
 0x536   :  { %5006 = vrcp.f32 %v1643_v60 }
 0x539   :  { %v2161_v11 = vpop.permute.xlu1 %2160 }
 0x53a   :  { %v2248_v13 = vcombine.low %v5719_v59, %v2161_v11  ;;  %v2249_v31 = vcombine.high %v5719_v59, %v2161_v11 }
 0x53c   :  { %v2256_v21 = vrot.slane %v2248_v13, %v5360_v56  ;;  %v2263_v30 = vrot.slane %v2249_v31, %v5360_v56  ;;  %v2347_v13 = vrot.slane %v2333_v22, %v5365_v63  ;;  %v2363_v31 = vrot.slane %v2349_v17, %v5365_v63 }
 0x53e   :  { %v2264_v57 = vcombine.low %v2240_v23, %v2256_v21  ;;  %v2265_v18 = vcombine.high %v2240_v23, %v2256_v21  ;;  %v2280_v59 = vcombine.low %v2247_v16, %v2263_v30  ;;  %v2281_v12 = vcombine.high %v2247_v16, %v2263_v30 }
 0x53f   :  { %v3130_v23 = vsel %vm1382_vm1, %v5711_v62, 0  ;;  %v3177_v16 = vsel %vm1382_vm1, %v5713_v10, 0  ;;  %v2366_v25 = vcombine.low %v2347_v13, %v2363_v31  ;;  %v2367_v29 = vcombine.high %v2347_v13, %v2363_v31 }
 0x540   :  { %v5007_v0 = vpop.eup %5006  ;;  %v2272_v41 = vrot.slane %v2264_v57, %v5365_v63  ;;  %v2279_v42 = vrot.slane %v2265_v18, %v5365_v63  ;;  %v2288_v6 = vrot.slane %v2280_v59, %v5365_v63  ;;  %v2295_v53 = vrot.slane %v2281_v12, %v5365_v63 }
 0x541   :  { %v1659_v48 = vmul.f32 %v5007_v0, %v5697_v37  ;;  %v2340_v37 = vrot.slane %v2332_v44, %v5365_v63 }
 0x542   :  { %v2368_v45 = vcombine.low %v2272_v41, %v2279_v42  ;;  %v4488_v38 = vcombine.high %v2272_v41, %v2279_v42  ;;  %v2384_v1 = vcombine.low %v2288_v6, %v2295_v53  ;;  %v4489_v46 = vcombine.high %v2288_v6, %v2295_v53 }
 0x543   :  { %v1663_v54 = vpack.c.bf16 %v1659_v48, %v1658_v49  ;;  %v2364_v60 = vcombine.low %v2340_v37, %v2356_v55  ;;  %v2365_v19 = vcombine.high %v2340_v37, %v2356_v55 }
 0x544   :  { %v2375_v35 = vrot.slane %v2368_v45, %v5360_v56  ;;  %v2383_v51 = vrot.slane %v4488_v38, %v5360_v56  ;;  %v2391_v34 = vrot.slane %v2384_v1, %v5360_v56  ;;  %v2399_v50 = vrot.slane %v4489_v46, %v5360_v56 }
 0x545   :  { %4787 = vmatmul.mubr.msk.bf16.vlgmr.msra.gmra.mrb[32].mxu1 %vm1571_vm2, %v1663_v54 }
 0x546   :  { %v2400_v8 = vcombine.low %v2375_v35, %v2383_v51  ;;  %v2416_v9 = vcombine.low %v2391_v34, %v2399_v50  ;;  %4797 = vmatpush3.bf16.xpose.msra.mxu1 %v3083_v40  ;;  %4798 = vmatprep.mubr.msk.bf16.mxu1 %vm5068_vm0, %v5067_v36  ;;  %v2401_v47 = vcombine.high %v2375_v35, %v2383_v51 }
 0x547   :  { %4808 = vmatprep.subr.bf16.mxu1 %v5067_v36  ;;  %v2417_v28 = vcombine.high %v2391_v34, %v2399_v50 }
 0x548   :  { %v2408_v27 = vrot.slane %v2400_v8, %v5365_v63  ;;  %v2424_v14 = vrot.slane %v2416_v9, %v5365_v63  ;;  %v2415_v24 = vrot.slane %v2401_v47, %v5365_v63 }
 0x549   :  { %v2431_v58 = vrot.slane %v2417_v28, %v5365_v63 }
 0x54a   :  { %v2432_v15 = vcombine.low %v2408_v27, %v2424_v14  ;;  %v2433_v32 = vcombine.high %v2408_v27, %v2424_v14 }
 0x54b   :  { %v2434_v21 = vcombine.low %v2415_v24, %v2431_v58  ;;  %v2435_v30 = vcombine.high %v2415_v24, %v2431_v58 }
 0x54c   :  { %v2436_v20 = vpack.c.bf16 %v2432_v15, %v2364_v60  ;;  %v2437_v11 = vpack.c.bf16 %v2433_v32, %v2365_v19 }
 0x54d   :  { %v2438_v62 = vpack.c.bf16 %v2434_v21, %v2366_v25  ;;  %v2439_v26 = vpack.c.bf16 %v2435_v30, %v2367_v29 }
 0x54e   :  { %4793 = vmatmul.mubr.msk.bf16.vlgmr.msra.gmra.mrb[8].mxu0 %vm1382_vm1, %v2436_v20  ;;  %4799 = vmatmul.mubr.msk.bf16.vlgmr.msra.gmra.mrb[36].mxu1 %vm1382_vm1, %v2437_v11 }
 0x54f   :  { %4803 = vmatpush3.bf16.xpose.msra.mxu0 %v3130_v23  ;;  %4809 = vmatpush3.bf16.xpose.msra.mxu1 %v3177_v16 }
 0x550   :  { %4804 = vmatprep.mubr.msk.bf16.mxu0 %vm5068_vm0, %v5067_v36  ;;  %4810 = vmatprep.mubr.msk.bf16.mxu1 %vm5068_vm0, %v5067_v36 }
 0x551   :  { %4814 = vmatprep.subr.bf16.mxu0 %v5067_v36  ;;  %4820 = vmatprep.subr.bf16.mxu1 %v5067_v36 }
 0x556   :  { %4805 = vmatmul.mubr.msk.bf16.vlgmr.msra.gmra.mrb[12].mxu0 %vm1382_vm1, %v2438_v62  ;;  %4811 = vmatmul.mubr.msk.bf16.vlgmr.msra.gmra.mrb[40].mxu1 %vm1382_vm1, %v2439_v26 }
 0x557   :  { %4816 = vmatprep.mubr.msk.bf16.mxu0 %vm5068_vm0, %v5067_v36  ;;  %4822 = vmatprep.mubr.msk.bf16.mxu1 %vm5068_vm0, %v5067_v36 }
 0x5b7   :  { %v1701_v10 = vpop.f32.mrb[20].mxu1 }
 0x5b8   :  { %v4770_v33 = vpop.f32.mrb[21].mxu1 }
 0x5b9   :  { %v1704_v7 = vpop.f32.mrb[22].mxu1 }
 0x5ba   :  { %v4771_v57 = vpop.f32.mrb[23].mxu1 }
 0x5bf   :  { %v1745_v18 = vpop.f32.mrb[24].mxu1 }
 0x5c0   :  { %v4776_v59 = vpop.f32.mrb[25].mxu1 }
 0x5c1   :  { %v1748_v12 = vpop.f32.mrb[26].mxu1 }
 0x5c2   :  { %v4777_v0 = vpop.f32.mrb[27].mxu1 }
 0x5e3   :  { %v1789_v41 = vpop.f32.mrb[28].mxu1 }
 0x5e4   :  { %v1840_v42 = vcombine.low %v1701_v10, %v1789_v41  ;;  %v1841_v6 = vcombine.high %v1701_v10, %v1789_v41  ;;  %v4782_v53 = vpop.f32.mrb[29].mxu1 }
 0x5e5   :  { %v1792_v49 = vpop.f32.mrb[30].mxu1 }
 0x5e6   :  { %v1908_v44 = vcombine.low %v1704_v7, %v1792_v49  ;;  %v1909_v61 = vcombine.high %v1704_v7, %v1792_v49  ;;  %v4783_v48 = vpop.f32.mrb[31].mxu1  ;;  %v1848_v54 = vrot.slane %v1840_v42, %v5360_v56  ;;  %v1855_v35 = vrot.slane %v1841_v6, %v5360_v56 }
 0x5e8   :  { %v1916_v28 = vrot.slane %v1908_v44, %v5360_v56  ;;  %v1923_v14 = vrot.slane %v1909_v61, %v5360_v56 }
 0x618   :  { %v1833_v45 = vpop.f32.mrb[32].mxu1 }
 0x619   :  { %v1856_v38 = vcombine.low %v1745_v18, %v1833_v45  ;;  %v1857_v1 = vcombine.high %v1745_v18, %v1833_v45  ;;  %v4788_v46 = vpop.f32.mrb[33].mxu1 }
 0x61a   :  { %v1836_v51 = vpop.f32.mrb[34].mxu1 }
 0x61b   :  { %v1864_v34 = vrot.slane %v1856_v38, %v5360_v56  ;;  %v1871_v50 = vrot.slane %v1857_v1, %v5360_v56  ;;  %v1924_v40 = vcombine.low %v1748_v12, %v1836_v51  ;;  %v1925_v37 = vcombine.high %v1748_v12, %v1836_v51  ;;  %v4789_v55 = vpop.f32.mrb[35].mxu1 }
 0x61d   :  { %v1872_v8 = vcombine.low %v1848_v54, %v1864_v34  ;;  %v1873_v9 = vcombine.high %v1848_v54, %v1864_v34  ;;  %v1888_v47 = vcombine.low %v1855_v35, %v1871_v50  ;;  %v1889_v27 = vcombine.high %v1855_v35, %v1871_v50 }
 0x61e   :  { %v1932_v22 = vrot.slane %v1924_v40, %v5360_v56  ;;  %v1939_v17 = vrot.slane %v1925_v37, %v5360_v56 }
 0x61f   :  { %v1880_v60 = vrot.slane %v1872_v8, %v5365_v63  ;;  %v1887_v15 = vrot.slane %v1873_v9, %v5365_v63  ;;  %v1896_v19 = vrot.slane %v1888_v47, %v5365_v63  ;;  %v1903_v32 = vrot.slane %v1889_v27, %v5365_v63 }
 0x620   :  { %v1940_v24 = vcombine.low %v1916_v28, %v1932_v22  ;;  %v1941_v58 = vcombine.high %v1916_v28, %v1932_v22  ;;  %v1956_v20 = vcombine.low %v1923_v14, %v1939_v17  ;;  %v1957_v11 = vcombine.high %v1923_v14, %v1939_v17 }
 0x621   :  { %v1976_v13 = vcombine.low %v1880_v60, %v1887_v15  ;;  %v4482_v31 = vcombine.high %v1880_v60, %v1887_v15  ;;  %v1992_v23 = vcombine.low %v1896_v19, %v1903_v32  ;;  %v4483_v16 = vcombine.high %v1896_v19, %v1903_v32  ;;  %v5822_v21 = vpop.f32.mrb[8].mxu0  ;;  %v5824_v30 = vpop.f32.mrb[36].mxu1 }
 0x622   :  { %v1948_v25 = vrot.slane %v1940_v24, %v5365_v63  ;;  %v1955_v29 = vrot.slane %v1941_v58, %v5365_v63  ;;  %v1964_v62 = vrot.slane %v1956_v20, %v5365_v63  ;;  %v1971_v26 = vrot.slane %v1957_v11, %v5365_v63  ;;  %v4794_v10 = vpop.f32.mrb[9].mxu0  ;;  %v4800_v33 = vpop.f32.mrb[37].mxu1 }
 0x623   :  { %v1983_v7 = vrot.slane %v1976_v13, %v5360_v56  ;;  %v1991_v57 = vrot.slane %v4482_v31, %v5360_v56  ;;  %v1999_v18 = vrot.slane %v1992_v23, %v5360_v56  ;;  %v2007_v59 = vrot.slane %v4483_v16, %v5360_v56  ;;  %v5834_v12 = vpop.f32.mrb[38].mxu1  ;;  %v5836_v0 = vpop.f32.mrb[10].mxu0 }
 0x624   :  { %v2044_v41 = vcombine.low %v1948_v25, %v1955_v29  ;;  %v4484_v42 = vcombine.high %v1948_v25, %v1955_v29  ;;  %v2060_v6 = vcombine.low %v1964_v62, %v1971_v26  ;;  %v4485_v53 = vcombine.high %v1964_v62, %v1971_v26  ;;  %v4795_v49 = vpop.f32.mrb[11].mxu0  ;;  %v4801_v44 = vpop.f32.mrb[39].mxu1 }
 0x625   :  { %v3220_v61 = vsel %vm1571_vm2, %v5822_v21, -inf  ;;  %v3223_v48 = vsel %vm1571_vm2, %v5836_v0, -inf  ;;  %v3226_v45 = vsel %vm1571_vm2, %v5824_v30, -inf  ;;  %v2009_v35 = vcombine.high %v1983_v7, %v1991_v57 }
 0x626   :  { %v2051_v38 = vrot.slane %v2044_v41, %v5360_v56  ;;  %v2059_v1 = vrot.slane %v4484_v42, %v5360_v56  ;;  %v2067_v46 = vrot.slane %v2060_v6, %v5360_v56  ;;  %v2075_v54 = vrot.slane %v4485_v53, %v5360_v56  ;;  %3221 = vmax.xlane.f32.xlu0 %v3220_v61 }
 0x627   :  { %3224 = vmax.xlane.f32.xlu1 %v3223_v48  ;;  %v2025_v51 = vcombine.high %v1999_v18, %v2007_v59  ;;  %v2008_v34 = vcombine.low %v1983_v7, %v1991_v57  ;;  %v2024_v50 = vcombine.low %v1999_v18, %v2007_v59  ;;  %v2023_v27 = vrot.slane %v2009_v35, %v5365_v63 }
 0x628   :  { %v2077_v40 = vcombine.high %v2051_v38, %v2059_v1  ;;  %v2093_v37 = vcombine.high %v2067_v46, %v2075_v54  ;;  %v2076_v55 = vcombine.low %v2051_v38, %v2059_v1  ;;  %v2092_v8 = vcombine.low %v2067_v46, %v2075_v54 }
 0x629   :  { %v3166_v9 = vpop.f32.mrb[12].mxu0  ;;  %v5848_v47 = vpop.f32.mrb[40].mxu1  ;;  %v2039_v28 = vrot.slane %v2025_v51, %v5365_v63  ;;  %v5853_v14 = vrot.slane %v2008_v34, %v5365_v63  ;;  %v5856_v22 = vrot.slane %v2024_v50, %v5365_v63  ;;  %v3229_v62 = vsel %vm1571_vm2, %v5834_v12, -inf }
 0x62a   :  { %3227 = vmax.xlane.f32.xlu0 %v3226_v45  ;;  %v4806_v17 = vpop.f32.mrb[13].mxu0  ;;  %v4812_v60 = vpop.f32.mrb[41].mxu1  ;;  %v2091_v15 = vrot.slane %v2077_v40, %v5365_v63  ;;  %v2107_v19 = vrot.slane %v2093_v37, %v5365_v63  ;;  %v5873_v26 = vrot.slane %v2076_v55, %v5365_v63  ;;  %v5876_v10 = vrot.slane %v2092_v8, %v5365_v63 }
 0x62b   :  { %v5860_v32 = vpop.f32.mrb[42].mxu1  ;;  %v5862_v24 = vpop.f32.mrb[14].mxu0  ;;  %v2042_v58 = vcombine.low %v2023_v27, %v2039_v28  ;;  %v2043_v20 = vcombine.high %v2023_v27, %v2039_v28  ;;  %v2040_v11 = vcombine.low %v5853_v14, %v5856_v22  ;;  %v2041_v13 = vcombine.high %v5853_v14, %v5856_v22  ;;  %v4920_v14 = vld [vmem:[%s6294_s9] sm:$0xff]   ;;  %v4921_v22 = vld [vmem:[%s6294_s9 + $0x8] sm:$0xff]  }
 0x62c   :  { %v4807_v31 = vpop.f32.mrb[15].mxu0  ;;  %v4813_v23 = vpop.f32.mrb[43].mxu1  ;;  %v3235_v16 = vsel %vm1571_vm2, %v5862_v24, -inf  ;;  %v2110_v25 = vcombine.low %v2091_v15, %v2107_v19  ;;  %v2111_v29 = vcombine.high %v2091_v15, %v2107_v19  ;;  %v2109_v57 = vcombine.high %v5873_v26, %v5876_v10 }
 0x62d   :  { %3236 = vmax.xlane.f32.xlu1 %v3235_v16  ;;  %v2108_v18 = vcombine.low %v5873_v26, %v5876_v10  ;;  %v3232_v59 = vsel %vm1571_vm2, %v3166_v9, -inf  ;;  %v3238_v42 = vsel %vm1571_vm2, %v5848_v47, -inf }
 0x62e   :  { %3230 = vmax.xlane.f32.xlu0 %v3229_v62  ;;  %v5878_v33 = vpack.i.bf16 %v2110_v25, %v2042_v58  ;;  %v5880_v7 = vpack.i.bf16 %v2111_v29, %v2043_v20  ;;  %v5887_v41 = vpack.i.bf16 %v2109_v57, %v2041_v13 }
 0x632   :  { %3233 = vmax.xlane.f32.xlu0 %v3232_v59 }
 0x636   :  { %3239 = vmax.xlane.f32.xlu0 %v3238_v42 }
 0x6b3   :  { %v3222_v6 = vpop.xlane.xlu0 %3221 }
 0x6b4   :  { %v3244_v53 = vsub.f32 %v5822_v21, %v3222_v6  ;;  %v3225_v49 = vpop.xlane.xlu1 %3224 }
 0x6b5   :  { %v3245_v44 = vsub.f32 %v5836_v0, %v3225_v49 }
 0x6b6   :  { %v3252_v61 = vmul.f32 1.442695, %v3244_v53 }
 0x6b7   :  { %v3254_v48 = vmul.f32 1.442695, %v3245_v44  ;;  %v3228_v21 = vpop.xlane.xlu0 %3227 }
 0x6b8   :  { %5008 = vpow2.f32 %v3252_v61  ;;  %v3246_v35 = vsub.f32 %v5824_v30, %v3228_v21  ;;  %v3241_v30 = vsel %vm1571_vm2, %v5860_v32, -inf }
 0x6b9   :  { %5010 = vpow2.f32 %v3254_v48 }
 0x6ba   :  { %v3256_v51 = vmul.f32 1.442695, %v3246_v35  ;;  %v3237_v20 = vpop.xlane.xlu1 %3236 }
 0x6bb   :  { %v3231_v0 = vpop.xlane.xlu0 %3230  ;;  %v3249_v13 = vsub.f32 %v5862_v24, %v3237_v20 }
 0x6bc   :  { %5012 = vpow2.f32 %v3256_v51  ;;  %v3247_v60 = vsub.f32 %v5834_v12, %v3231_v0 }
 0x6bd   :  { %v3262_v31 = vmul.f32 1.442695, %v3249_v13 }
 0x6be   :  { %v3258_v15 = vmul.f32 1.442695, %v3247_v60 }
 0x6bf   :  { %v3234_v54 = vpop.xlane.xlu0 %3233 }
 0x6c0   :  { %v3248_v34 = vsub.f32 %v3166_v9, %v3234_v54 }
 0x6c2   :  { %v5893_v45 = vpop.eup %5008  ;;  %v3260_v40 = vmul.f32 1.442695, %v3248_v34 }
 0x6c3   :  { %v5895_v38 = vpop.eup %5010  ;;  %v3268_v1 = vsel %vm1571_vm2, %v5893_v45, 0.0  ;;  %v3240_v50 = vpop.xlane.xlu0 %3239 }
 0x6c4   :  { %3269 = vadd.xlane.f32.xlu0 %v3268_v1  ;;  %v3271_v46 = vsel %vm1571_vm2, %v5895_v38, 0.0  ;;  %v3250_v37 = vsub.f32 %v5848_v47, %v3240_v50  ;;  %5014 = vpow2.f32 %v3260_v40 }
 0x6c5   :  { %3272 = vadd.xlane.f32.xlu1 %v3271_v46 }
 0x6c6   :  { %v3264_v55 = vmul.f32 1.442695, %v3250_v37  ;;  %v5911_v8 = vpop.eup %5012 }
 0x6c7   :  { %v3274_v27 = vsel %vm1571_vm2, %v5911_v8, 0.0 }
 0x6c8   :  { %5016 = vpow2.f32 %v3264_v55 }
 0x6c9   :  { %5018 = vpow2.f32 %v3258_v15 }
 0x6ca   :  { %5020 = vpow2.f32 %v3262_v31 }
 0x6ce   :  { %v5915_v28 = vpop.eup %5014 }
 0x6cf   :  { %v3280_v9 = vsel %vm1571_vm2, %v5915_v28, 0.0 }
 0x6d2   :  { %v5921_v17 = vpop.eup %5016 }
 0x6d3   :  { %v3286_v47 = vsel %vm1571_vm2, %v5921_v17, 0.0  ;;  %v5928_v19 = vpop.eup %5018 }
 0x6d4   :  { %v3277_v58 = vsel %vm1571_vm2, %v5928_v19, 0.0  ;;  %v5935_v23 = vpop.eup %5020 }
 0x6d5   :  { %v3283_v12 = vsel %vm1571_vm2, %v5935_v23, 0.0 }
 0x6d6   :  { %2740 = vrot.lane.b32.xlu1 %v5337_v43, %s5065_s6 }
 0x6da   :  { %2738 = vrot.lane.b32.xlu0 %v5333_v39, %s5065_s6  ;;  %2744 = vrot.lane.b32.xlu1 %v5333_v39, %s5064_s4 }
 0x6de   :  { %2750 = vrot.lane.b32.xlu0 %v5333_v39, %s5066_s7 }
 0x6fd   :  { %3275 = vadd.xlane.f32.xlu0 %v3274_v27 }
 0x6fe   :  { %3242 = vmax.xlane.f32.xlu1 %v3241_v30 }
 0x701   :  { %3281 = vadd.xlane.f32.xlu0 %v3280_v9 }
 0x705   :  { %3287 = vadd.xlane.f32.xlu0 %v3286_v47 }
 0x70f   :  { %2746 = vrot.lane.b32.xlu1 %v5337_v43, %s5064_s4 }
 0x733   :  { %3278 = vadd.xlane.f32.xlu1 %v3277_v58 }
 0x744   :  { %2752 = vrot.lane.b32.xlu1 %v5337_v43, %s5066_s7 }
 0x751   :  { %v3270_v6 = vpop.xlane.xlu0 %3269 }
 0x752   :  { %v3273_v16 = vpop.xlane.xlu1 %3272 }
 0x755   :  { %v2739_v53 = vpop.permute.xlu0 %2738 }
 0x756   :  { %v2741_v25 = vpop.permute.xlu1 %2740 }
 0x75a   :  { %v2745_v29 = vpop.permute.xlu1 %2744 }
 0x75b   :  { %v2756_v49 = vcombine.low %v5333_v39, %v2745_v29  ;;  %v2757_v44 = vcombine.high %v5333_v39, %v2745_v29 }
 0x75d   :  { %v2764_v61 = vrot.slane %v2756_v49, %v5360_v56  ;;  %v2771_v1 = vrot.slane %v2757_v44, %v5360_v56 }
 0x768   :  { %3284 = vadd.xlane.f32.xlu1 %v3283_v12 }
 0x779   :  { %4872 = vrot.lane.b32.xlu1 %v5878_v33, %s5064_s4  ;;  %v2751_v33 = vpop.permute.xlu0 %2750 }
 0x77d   :  { %4877 = vrot.lane.b32.xlu1 %v5880_v7, %s5065_s6  ;;  %v2772_v7 = vcombine.low %v2739_v53, %v2751_v33 }
 0x77f   :  { %v2780_v48 = vrot.slane %v2772_v7, %v5360_v56 }
 0x781   :  { %v2788_v21 = vcombine.low %v2764_v61, %v2780_v48  ;;  %v2789_v0 = vcombine.high %v2764_v61, %v2780_v48 }
 0x783   :  { %v2796_v34 = vrot.slane %v2788_v21, %v5365_v63 }
 0x78a   :  { %v3276_v13 = vpop.xlane.xlu0 %3275 }
 0x78b   :  { %v3243_v62 = vpop.xlane.xlu1 %3242 }
 0x78c   :  { %v3251_v24 = vsub.f32 %v5860_v32, %v3243_v62  ;;  %v2773_v32 = vcombine.high %v2739_v53, %v2751_v33 }
 0x78e   :  { %v3266_v57 = vmul.f32 1.442695, %v3251_v24  ;;  %v2787_v46 = vrot.slane %v2773_v32, %v5360_v56 }
 0x78f   :  { %v2747_v51 = vpop.permute.xlu1 %2746 }
 0x790   :  { %5022 = vpow2.f32 %v3266_v57  ;;  %v2804_v54 = vcombine.low %v2771_v1, %v2787_v46  ;;  %v2805_v35 = vcombine.high %v2771_v1, %v2787_v46  ;;  %v2824_v55 = vcombine.low %v5337_v43, %v2747_v51 }
 0x791   :  { %v2825_v27 = vcombine.high %v5337_v43, %v2747_v51  ;;  %5024 = vrcp.f32 %v3270_v6 }
 0x792   :  { %v2812_v39 = vrot.slane %v2804_v54, %v5365_v63  ;;  %v2819_v50 = vrot.slane %v2805_v35, %v5365_v63  ;;  %5026 = vrcp.f32 %v3273_v16  ;;  %v2832_v31 = vrot.slane %v2824_v55, %v5360_v56 }
 0x793   :  { %v2839_v12 = vrot.slane %v2825_v27, %v5360_v56 }
 0x794   :  { %v2908_v9 = vcombine.low %v2812_v39, %v2819_v50  ;;  %v4495_v47 = vcombine.high %v2812_v39, %v2819_v50 }
 0x796   :  { %v2915_v24 = vrot.slane %v2908_v9, %v5360_v56  ;;  %v2923_v57 = vrot.slane %v4495_v47, %v5360_v56 }
 0x798   :  { %v2940_v32 = vcombine.low %v2915_v24, %v2923_v57 }
 0x79a   :  { %v5944_v59 = vpop.eup %5022  ;;  %v2948_v39 = vrot.slane %v2940_v32, %v5365_v63 }
 0x79b   :  { %v3289_v42 = vsel %vm1571_vm2, %v5944_v59, 0.0  ;;  %v5025_v21 = vpop.eup %5024 }
 0x79c   :  { %3290 = vadd.xlane.f32.xlu0 %v3289_v42 }
 0x7b2   :  { %4867 = vrot.lane.b32.xlu0 %v5887_v41, %s5066_s7  ;;  %v2803_v41 = vrot.slane %v2789_v0, %v5365_v63 }
 0x7b4   :  { %v2892_v37 = vcombine.low %v2796_v34, %v2803_v41  ;;  %v4494_v30 = vcombine.high %v2796_v34, %v2803_v41  ;;  %v5027_v34 = vpop.eup %5026 }
 0x7b6   :  { %v2899_v20 = vrot.slane %v2892_v37, %v5360_v56  ;;  %v2907_v43 = vrot.slane %v4494_v30, %v5360_v56 }
 0x7b8   :  { %v2924_v44 = vcombine.low %v2899_v20, %v2907_v43  ;;  %v2925_v50 = vcombine.high %v2899_v20, %v2907_v43 }
 0x7ba   :  { %v2932_v41 = vrot.slane %v2924_v44, %v5365_v63 }
 0x7bc   :  { %v2956_v20 = vcombine.low %v2932_v41, %v2948_v39 }
 0x7c0   :  { %v3279_v40 = vpop.xlane.xlu1 %3278 }
 0x7c1   :  { %5028 = vrcp.f32 %v3279_v40  ;;  %v2941_v40 = vcombine.high %v2915_v24, %v2923_v57  ;;  %v3301_v24 = vmul.f32 %v5027_v34, %v5895_v38 }
 0x7c2   :  { %5030 = vrcp.f32 %v3276_v13 }
 0x7c4   :  { %v2753_v60 = vpop.permute.xlu1 %2752 }
 0x7c5   :  { %v2840_v15 = vcombine.low %v2741_v25, %v2753_v60  ;;  %v2841_v58 = vcombine.high %v2741_v25, %v2753_v60 }
 0x7c7   :  { %v2848_v29 = vrot.slane %v2840_v15, %v5360_v56  ;;  %v2855_v62 = vrot.slane %v2841_v58, %v5360_v56 }
 0x7c9   :  { %v2856_v25 = vcombine.low %v2832_v31, %v2848_v29  ;;  %v2857_v16 = vcombine.high %v2832_v31, %v2848_v29  ;;  %v2872_v42 = vcombine.low %v2839_v12, %v2855_v62  ;;  %v2873_v6 = vcombine.high %v2839_v12, %v2855_v62 }
 0x7ca   :  { %v2939_v31 = vrot.slane %v2925_v50, %v5365_v63  ;;  %v2955_v12 = vrot.slane %v2941_v40, %v5365_v63  ;;  %v2957_v62 = vcombine.high %v2932_v41, %v2948_v39 }
 0x7cb   :  { %v2864_v53 = vrot.slane %v2856_v25, %v5365_v63  ;;  %v2871_v33 = vrot.slane %v2857_v16, %v5365_v63  ;;  %v2880_v49 = vrot.slane %v2872_v42, %v5365_v63  ;;  %v2887_v7 = vrot.slane %v2873_v6, %v5365_v63  ;;  %v5029_v9 = vpop.eup %5028 }
 0x7cc   :  { %v5031_v13 = vpop.eup %5030  ;;  %v3303_v57 = vmul.f32 %v5029_v9, %v5928_v19 }
 0x7cd   :  { %v2960_v61 = vcombine.low %v2864_v53, %v2871_v33  ;;  %v4496_v48 = vcombine.high %v2864_v53, %v2871_v33  ;;  %v2976_v1 = vcombine.low %v2880_v49, %v2887_v7  ;;  %v4497_v46 = vcombine.high %v2880_v49, %v2887_v7 }
 0x7ce   :  { %v3300_v53 = vmul.f32 %v5025_v21, %v5893_v45  ;;  %v3302_v33 = vmul.f32 %v5031_v13, %v5911_v8  ;;  %v2958_v49 = vcombine.low %v2939_v31, %v2955_v12  ;;  %v2959_v7 = vcombine.high %v2939_v31, %v2955_v12  ;;  %v3282_v45 = vpop.xlane.xlu0 %3281 }
 0x7cf   :  { %v2967_v0 = vrot.slane %v2960_v61, %v5360_v56  ;;  %v2975_v54 = vrot.slane %v4496_v48, %v5360_v56  ;;  %v2983_v35 = vrot.slane %v2976_v1, %v5360_v56  ;;  %v2991_v51 = vrot.slane %v4497_v46, %v5360_v56 }
 0x7d0   :  { %v3308_v44 = vpack.c.bf16 %v3301_v24, %v3300_v53  ;;  %v3309_v32 = vpack.c.bf16 %v3303_v57, %v3302_v33  ;;  %5032 = vrcp.f32 %v3282_v45  ;;  %v4925_v24 = vld [vmem:[%s6294_s9 + $0x28] sm:$0xff]  }
 0x7d1   :  { %v2992_v37 = vcombine.low %v2967_v0, %v2975_v54  ;;  %v3008_v55 = vcombine.low %v2983_v35, %v2991_v51  ;;  %v2993_v27 = vcombine.high %v2967_v0, %v2975_v54  ;;  %v3009_v30 = vcombine.high %v2983_v35, %v2991_v51 }
 0x7d2   :  { %v3288_v0 = vpop.xlane.xlu0 %3287 }
 0x7d3   :  { %v3000_v47 = vrot.slane %v2992_v37, %v5365_v63  ;;  %v3016_v60 = vrot.slane %v3008_v55, %v5365_v63  ;;  %v3007_v15 = vrot.slane %v2993_v27, %v5365_v63  ;;  %v3023_v58 = vrot.slane %v3009_v30, %v5365_v63 }
 0x7d5   :  { %v3024_v29 = vcombine.low %v3000_v47, %v3016_v60  ;;  %v3025_v43 = vcombine.high %v3000_v47, %v3016_v60  ;;  %v3026_v42 = vcombine.low %v3007_v15, %v3023_v58  ;;  %v3027_v6 = vcombine.high %v3007_v15, %v3023_v58 }
 0x7d7   :  { %v3028_v25 = vpack.c.bf16 %v3024_v29, %v2956_v20  ;;  %v3029_v16 = vpack.c.bf16 %v3025_v43, %v2957_v62  ;;  %v3030_v38 = vpack.c.bf16 %v3026_v42, %v2958_v49  ;;  %v3031_v19 = vpack.c.bf16 %v3027_v6, %v2959_v7  ;;  %v4923_v20 = vld [vmem:[%s6294_s9 + $0x18] sm:$0xff]   ;;  %v4924_v43 = vld [vmem:[%s6294_s9 + $0x20] sm:$0xff]  }
 0x7d9   :  { %4815 = vmatpush3.bf16.msra.mxu0 %v3028_v25  ;;  %4821 = vmatpush3.bf16.msra.mxu1 %v3029_v16 }
 0x7da   :  { %4826 = vmatprep.subr.bf16.mxu0 %v5067_v36  ;;  %4832 = vmatprep.subr.bf16.mxu1 %v5067_v36  ;;  %v5033_v61 = vpop.eup %5032 }
 0x7db   :  { %v3304_v1 = vmul.f32 %v5033_v61, %v5915_v28 }
 0x7dc   :  { %4817 = vmatmul.mubr.msk.bf16.vlgmr.msra.gmra.mrb[16].mxu0 %vm1571_vm2, %v3308_v44  ;;  %4823 = vmatmul.mubr.msk.bf16.vlgmr.msra.gmra.mrb[44].mxu1 %vm1571_vm2, %v3309_v32 }
 0x7dd   :  { %4827 = vmatpush3.bf16.msra.mxu0 %v3030_v38  ;;  %4833 = vmatpush3.bf16.msra.mxu1 %v3031_v19 }
 0x7de   :  { %4828 = vmatprep.mubr.msk.bf16.mxu0 %vm5068_vm0, %v5067_v36  ;;  %4834 = vmatprep.mubr.msk.bf16.mxu1 %vm5068_vm0, %v5067_v36 }
 0x7df   :  { %4838 = vmatprep.subr.bf16.mxu0 %v4920_v14 }
 0x7f5   :  { %v3285_v8 = vpop.xlane.xlu1 %3284 }
 0x7f6   :  { %5034 = vrcp.f32 %v3285_v8 }
 0x7f7   :  { %5036 = vrcp.f32 %v3288_v0 }
 0x7f9   :  { %v4873_v54 = vpop.permute.xlu1 %4872 }
 0x7fa   :  { %v4875_v39 = vunpack.i.h.bf16 %v4873_v54  ;;  %v4874_v50 = vunpack.i.l.bf16 %v4873_v54 }
 0x7fd   :  { %v4878_v51 = vpop.permute.xlu1 %4877 }
 0x7fe   :  { %v4880_v40 = vunpack.i.h.bf16 %v4878_v51  ;;  %v4879_v28 = vunpack.i.l.bf16 %v4878_v51 }
 0x800   :  { %v5035_v48 = vpop.eup %5034 }
 0x801   :  { %v3305_v46 = vmul.f32 %v5035_v48, %v5935_v23  ;;  %v5037_v30 = vpop.eup %5036 }
 0x802   :  { %v3306_v26 = vmul.f32 %v5037_v30, %v5921_v17 }
 0x803   :  { %v3310_v21 = vpack.c.bf16 %v3305_v46, %v3304_v1 }
 0x805   :  { %4829 = vmatmul.mubr.msk.bf16.vlgmr.msra.gmra.mrb[20].mxu0 %vm1571_vm2, %v3310_v21 }
 0x806   :  { %4839 = vmatpush3.bf16.msra.mxu0 %v4920_v14 }
 0x807   :  { %4840 = vmatprep.subr.bf16.mxu0 %v4921_v22 }
 0x80a   :  { %4841 = vmatpush3.bf16.msra.mxu0 %v4921_v22 }
 0x829   :  { %v3291_v35 = vpop.xlane.xlu0 %3290 }
 0x82a   :  { %5038 = vrcp.f32 %v3291_v35 }
 0x82d   :  { %v4868_v36 = vpop.permute.xlu0 %4867 }
 0x82e   :  { %v4870_v34 = vunpack.i.h.bf16 %v4868_v36  ;;  %v4869_v41 = vunpack.i.l.bf16 %v4868_v36 }
 0x830   :  { %v2137_v23 = vsel %vm1382_vm1, %v2108_v18, %v4870_v34  ;;  %v2136_v37 = vsel %vm1382_vm1, %v2040_v11, %v4869_v41  ;;  %v4922_v11 = vld [vmem:[%s6294_s9 + $0x10] sm:$0xff]  }
 0x831   :  { %v2139_v55 = vsel %vm2138_vm3, %v2136_v37, %v4874_v50  ;;  %v2140_v27 = vsel %vm2138_vm3, %v2137_v23, %v4875_v39  ;;  %4842 = vmatprep.subr.bf16.mxu0 %v4922_v11 }
 0x832   :  { %v2142_v9 = vsel %vm2141_vm4, %v2139_v55, %v4879_v28  ;;  %v2143_v47 = vsel %vm2141_vm4, %v2140_v27, %v4880_v40  ;;  %4843 = vmatpush3.bf16.msra.mxu0 %v4922_v11 }
 0x833   :  { %v3790_v60 = vpack.c.bf16 %v2143_v47, %v2142_v9  ;;  %4844 = vmatprep.subr.bf16.mxu0 %v4923_v20 }
 0x834   :  { %v5039_v15 = vpop.eup %5038 }
 0x835   :  { %v3307_v10 = vmul.f32 %v5039_v15, %v5944_v59  ;;  %4854 = vmatprep.mubr.bf16.mxu0 %v3790_v60 }
 0x836   :  { %4845 = vmatpush3.bf16.msra.mxu0 %v4923_v20 }
 0x837   :  { %v3311_v18 = vpack.c.bf16 %v3307_v10, %v3306_v26  ;;  %4846 = vmatprep.subr.bf16.mxu0 %v4924_v43 }
 0x839   :  { %4835 = vmatmul.mubr.msk.bf16.vlgmr.msra.gmra.mrb[48].mxu1 %vm1571_vm2, %v3311_v18 }
 0x83a   :  { %4847 = vmatpush3.bf16.msra.mxu0 %v4924_v43 }
 0x83b   :  { %4848 = vmatprep.subr.bf16.mxu0 %v4925_v24 }
 0x83e   :  { %4849 = vmatpush3.bf16.msra.mxu0 %v4925_v24  ;;  %v4926_v24 = vld [vmem:[%s6294_s9 + $0x30] sm:$0xff]  }
 0x83f   :  { %4850 = vmatprep.subr.bf16.mxu0 %v4926_v24 }
 0x842   :  { %4851 = vmatpush3.bf16.msra.mxu0 %v4926_v24 }
 0x8af   :  { %v3349_v17 = vpop.f32.mrb[16].mxu0  ;;  %v3393_v59 = vpop.f32.mrb[44].mxu1 }
 0x8b0   :  { %v4818_v58 = vpop.f32.mrb[17].mxu0  ;;  %v4824_v13 = vpop.f32.mrb[45].mxu1 }
 0x8b1   :  { %v3352_v31 = vpop.f32.mrb[18].mxu0  ;;  %v3396_v12 = vpop.f32.mrb[46].mxu1 }
 0x8b2   :  { %v4819_v29 = vpop.f32.mrb[19].mxu0  ;;  %v4825_v62 = vpop.f32.mrb[47].mxu1 }
 0x8d8   :  { %v3437_v57 = vpop.f32.mrb[20].mxu0 }
 0x8d9   :  { %v3488_v25 = vcombine.low %v3349_v17, %v3437_v57  ;;  %v3489_v16 = vcombine.high %v3349_v17, %v3437_v57  ;;  %v4830_v42 = vpop.f32.mrb[21].mxu0 }
 0x8da   :  { %v3440_v6 = vpop.f32.mrb[22].mxu0 }
 0x8db   :  { %v3556_v53 = vcombine.low %v3352_v31, %v3440_v6  ;;  %v3557_v33 = vcombine.high %v3352_v31, %v3440_v6  ;;  %v4831_v49 = vpop.f32.mrb[23].mxu0  ;;  %v3496_v19 = vrot.slane %v3488_v25, %v5360_v56  ;;  %v3503_v45 = vrot.slane %v3489_v16, %v5360_v56 }
 0x8dd   :  { %v3564_v36 = vrot.slane %v3556_v53, %v5360_v56  ;;  %v3571_v34 = vrot.slane %v3557_v33, %v5360_v56 }
 0x90c   :  { %v3481_v7 = vpop.f32.mrb[48].mxu1 }
 0x90d   :  { %v3504_v44 = vcombine.low %v3393_v59, %v3481_v7  ;;  %v3505_v32 = vcombine.high %v3393_v59, %v3481_v7  ;;  %v4836_v38 = vpop.f32.mrb[49].mxu1 }
 0x90e   :  { %v3484_v8 = vpop.f32.mrb[50].mxu1 }
 0x90f   :  { %v3512_v61 = vrot.slane %v3504_v44, %v5360_v56  ;;  %v3519_v48 = vrot.slane %v3505_v32, %v5360_v56  ;;  %v3572_v1 = vcombine.low %v3396_v12, %v3484_v8  ;;  %v3573_v46 = vcombine.high %v3396_v12, %v3484_v8  ;;  %v4837_v21 = vpop.f32.mrb[51].mxu1 }
 0x910   :  { %v4927_v21 = vld [vmem:[%s6294_s9 + $0x38] sm:$0xff]  }
 0x911   :  { %v3520_v0 = vcombine.low %v3496_v19, %v3512_v61  ;;  %v3521_v54 = vcombine.high %v3496_v19, %v3512_v61  ;;  %v3536_v35 = vcombine.low %v3503_v45, %v3519_v48  ;;  %v3537_v51 = vcombine.high %v3503_v45, %v3519_v48  ;;  %4852 = vmatprep.subr.bf16.mxu0 %v4927_v21 }
 0x912   :  { %v3580_v41 = vrot.slane %v3572_v1, %v5360_v56  ;;  %v3587_v39 = vrot.slane %v3573_v46, %v5360_v56  ;;  %4853 = vmatpush3.bf16.msra.mxu0 %v4927_v21  ;;  %v4940_v21 = vld [vmem:[%s6296_s13 + $0x40] ss:$8 sps:$4 sm:$0xff]  }
 0x913   :  { %v3528_v50 = vrot.slane %v3520_v0, %v5365_v63  ;;  %v3535_v40 = vrot.slane %v3521_v54, %v5365_v63  ;;  %v3544_v28 = vrot.slane %v3536_v35, %v5365_v63  ;;  %v3551_v23 = vrot.slane %v3537_v51, %v5365_v63 }
 0x914   :  { %v3588_v37 = vcombine.low %v3564_v36, %v3580_v41  ;;  %v3589_v55 = vcombine.high %v3564_v36, %v3580_v41  ;;  %v3604_v27 = vcombine.low %v3571_v34, %v3587_v39  ;;  %v3605_v30 = vcombine.high %v3571_v34, %v3587_v39 }
 0x915   :  { %v3624_v9 = vcombine.low %v3528_v50, %v3535_v40  ;;  %v4506_v47 = vcombine.high %v3528_v50, %v3535_v40  ;;  %v3640_v60 = vcombine.low %v3544_v28, %v3551_v23  ;;  %v4507_v15 = vcombine.high %v3544_v28, %v3551_v23 }
 0x916   :  { %v3596_v26 = vrot.slane %v3588_v37, %v5365_v63  ;;  %v3603_v10 = vrot.slane %v3589_v55, %v5365_v63  ;;  %v3612_v18 = vrot.slane %v3604_v27, %v5365_v63  ;;  %v3619_v14 = vrot.slane %v3605_v30, %v5365_v63 }
 0x917   :  { %v3631_v22 = vrot.slane %v3624_v9, %v5360_v56  ;;  %v3639_v11 = vrot.slane %v4506_v47, %v5360_v56  ;;  %v3647_v17 = vrot.slane %v3640_v60, %v5360_v56  ;;  %v3655_v59 = vrot.slane %v4507_v15, %v5360_v56 }
 0x918   :  { %v3692_v58 = vcombine.low %v3596_v26, %v3603_v10  ;;  %v4508_v13 = vcombine.high %v3596_v26, %v3603_v10  ;;  %v3708_v31 = vcombine.low %v3612_v18, %v3619_v14  ;;  %v4509_v12 = vcombine.high %v3612_v18, %v3619_v14  ;;  %v4510_v18 = vld [vmem:[%s6295_s10] ss:$0 sm:$0xff] }
 0x919   :  { %v3657_v20 = vcombine.high %v3631_v22, %v3639_v11  ;;  %v3673_v29 = vcombine.high %v3647_v17, %v3655_v59  ;;  %v3656_v62 = vcombine.low %v3631_v22, %v3639_v11  ;;  %v3672_v43 = vcombine.low %v3647_v17, %v3655_v59 }
 0x91a   :  { %v3699_v57 = vrot.slane %v3692_v58, %v5360_v56  ;;  %v3707_v25 = vrot.slane %v4508_v13, %v5360_v56  ;;  %v3715_v16 = vrot.slane %v3708_v31, %v5360_v56  ;;  %v3723_v42 = vrot.slane %v4509_v12, %v5360_v56 }
 0x91b   :  { %v3671_v6 = vrot.slane %v3657_v20, %v5365_v63  ;;  %v3687_v53 = vrot.slane %v3673_v29, %v5365_v63  ;;  %v3664_v33 = vrot.slane %v3656_v62, %v5365_v63  ;;  %v3680_v49 = vrot.slane %v3672_v43, %v5365_v63  ;;  %v4933_v43 = vld [vmem:[%s6296_s13 + $0x14] ss:$8 sps:$4 sm:$0xff]  }
 0x91c   :  { %v3725_v7 = vcombine.high %v3699_v57, %v3707_v25  ;;  %v3741_v44 = vcombine.high %v3715_v16, %v3723_v42  ;;  %v3724_v32 = vcombine.low %v3699_v57, %v3707_v25  ;;  %v3740_v38 = vcombine.low %v3715_v16, %v3723_v42 }
 0x91d   :  { %v3690_v19 = vcombine.low %v3671_v6, %v3687_v53  ;;  %v3688_v45 = vcombine.low %v3664_v33, %v3680_v49  ;;  %v3689_v8 = vcombine.high %v3664_v33, %v3680_v49  ;;  %v3691_v61 = vcombine.high %v3671_v6, %v3687_v53 }
 0x91e   :  { %v3739_v56 = vrot.slane %v3725_v7, %v5365_v63  ;;  %v3755_v48 = vrot.slane %v3741_v44, %v5365_v63  ;;  %v3732_v1 = vrot.slane %v3724_v32, %v5365_v63  ;;  %v3748_v46 = vrot.slane %v3740_v38, %v5365_v63 }
 0x920   :  { %v3758_v0 = vcombine.low %v3739_v56, %v3755_v48  ;;  %v3757_v54 = vcombine.high %v3732_v1, %v3748_v46  ;;  %v3756_v35 = vcombine.low %v3732_v1, %v3748_v46  ;;  %v3759_v51 = vcombine.high %v3739_v56, %v3755_v48  ;;  %v4939_v56 = vld [vmem:[%s6296_s13 + $0x34] ss:$8 sps:$4 sm:$0xff]   ;;  %v4937_v48 = vld [vmem:[%s6296_s13 + $0x30] ss:$8 sps:$4 sm:$0xff]   ;;  %v4942_v1 = vld [vmem:[%s6296_s13 + $0x44] ss:$8 sps:$4 sm:$0xff]  }
 0x921   :  { %v5071_v46 = vmov 0  }
 0x922   :  { %v4886_v36 = vpack.i.bf16 %v3758_v0, %v3690_v19  ;;  %v4881_v34 = vpack.i.bf16 %v3757_v54, %v3689_v8  ;;  %v4891_v41 = vpack.i.bf16 %v3759_v51, %v3691_v61  ;;  %v4934_v8 = vld [vmem:[%s6296_s13 + $0x20] ss:$8 sps:$4 sm:$0xff]   ;;  %v4936_v61 = vld [vmem:[%s6296_s13 + $0x24] ss:$8 sps:$4 sm:$0xff]   ;;  %4124 = vmatprep.mubr.bf16.mxu1 %v5071_v46  ;;  %v4945_v0 = vld [vmem:[%s6296_s13 + $0x54] ss:$8 sps:$4 sm:$0xff]  }
 0x923   :  { %v4943_v54 = vld [vmem:[%s6296_s13 + $0x50] ss:$8 sps:$4 sm:$0xff]   ;;  %v4946_v51 = vld [vmem:[%s6296_s13 + $0x60] ss:$8 sps:$4 sm:$0xff]  }
 0x924   :  { %4887 = vrot.lane.b32.xlu0 %v4886_v36, %s5064_s4  ;;  %4882 = vrot.lane.b32.xlu1 %v4881_v34, %s5066_s7  ;;  %v4951_v36 = vld [vmem:[%s6296_s13 + $0x74] ss:$8 sps:$4 sm:$0xff]   ;;  %v4949_v34 = vld [vmem:[%s6296_s13 + $0x70] ss:$8 sps:$4 sm:$0xff]  }
 0x928   :  { %4892 = vrot.lane.b32.xlu1 %v4891_v41, %s5065_s6 }
 0x996   :  { %v4888_v63 = vpop.permute.xlu0 %4887  ;;  %v4883_v39 = vpop.permute.xlu1 %4882 }
 0x997   :  { %v4885_v50 = vunpack.i.h.bf16 %v4883_v39  ;;  %v4884_v40 = vunpack.i.l.bf16 %v4883_v39  ;;  %v4890_v28 = vunpack.i.h.bf16 %v4888_v63  ;;  %v4889_v23 = vunpack.i.l.bf16 %v4888_v63 }
 0x999   :  { %v3784_v37 = vsel %vm1382_vm1, %v3688_v45, %v4884_v40  ;;  %v3785_v55 = vsel %vm1382_vm1, %v3756_v35, %v4885_v50  ;;  %v4948_v35 = vld [vmem:[%s6296_s13 + $0x64] ss:$8 sps:$4 sm:$0xff]  }
 0x99a   :  { %v4893_v27 = vpop.permute.xlu1 %4892  ;;  %v3786_v47 = vsel %vm2138_vm3, %v3784_v37, %v4889_v23  ;;  %v3787_v60 = vsel %vm2138_vm3, %v3785_v55, %v4890_v28 }
 0x99b   :  { %v4895_v30 = vunpack.i.h.bf16 %v4893_v27  ;;  %v4894_v9 = vunpack.i.l.bf16 %v4893_v27 }
 0x99d   :  { %v3788_v15 = vsel %vm2141_vm4, %v3786_v47, %v4894_v9  ;;  %v3789_v26 = vsel %vm2141_vm4, %v3787_v60, %v4895_v30  ;;  %v4519_v60 = vld [vmem:[%s6297_s11] ss:$0 sm:$0xff] }
 0x99e   :  { %v3791_v10 = vpack.c.bf16 %v3789_v26, %v3788_v15 }
 0x9a0   :  { %4855 = vmatmul.mubr.bf16.vlgmr.msra.gmra.mrb[24].mxu0 %v3791_v10 }
 0xa73   :  { %v4856_v14 = vpop.f32.mrb[24].mxu0 }
 0xa74   :  { %v3897_v22 = vpop.f32.mrb[25].mxu0  ;;  %v3906_v58 = vadd.f32 %v4856_v14, %v4510_v18 }
 0xa75   :  { %v3898_v11 = vadd.f32 %v4510_v18, %v3897_v22  ;;  %v4857_v17 = vpop.f32.mrb[26].mxu0  ;;  %v4520_v22 = vld [vmem:[%s6298_s12] ss:$0 sm:$0xff] }
 0xa76   :  { %v3900_v59 = vpop.f32.mrb[27].mxu0  ;;  %v6092_v20 = vadd.f32 %v5170_v3, %v3906_v58  ;;  %v3909_v29 = vadd.f32 %v4857_v17, %v4510_v18  ;;  %v4931_v3 = vld [vmem:[%s6296_s13 + $0x10] ss:$8 sps:$4 sm:$0xff]  }
 0xa77   :  { %v6085_v13 = vadd.f32 %v5168_v2, %v3898_v11  ;;  %v3901_v31 = vadd.f32 %v4510_v18, %v3900_v59  ;;  %v4928_v2 = vld [vmem:[%s6296_s13] ss:$8 sps:$4 sm:$0xff]  }
 0xa78   :  { %v6097_v62 = vadd.f32 %v5176_v5, %v3909_v29 }
 0xa79   :  { %v6088_v12 = vadd.f32 %v5174_v4, %v3901_v31  ;;  %3918 = vadd.xlane.f32.xlu0 %v6085_v13  ;;  %v4930_v4 = vld [vmem:[%s6296_s13 + $0x4] ss:$8 sps:$4 sm:$0xff]  }
 0xa7a   :  { %4092 = vmatprep.subr.bf16.mxu1 %v4930_v4 }
 0xa7b   :  { %3920 = vadd.xlane.f32.xlu1 %v6088_v12  ;;  %4093 = vmatpush1.bf16.msra.mxu1 %v4928_v2 }
 0xa7c   :  { %4094 = vmatprep.subr.bf16.mxu1 %v4933_v43 }
 0xa7d   :  { %3922 = vadd.xlane.f32.xlu0 %v6092_v20 }
 0xa7f   :  { %4095 = vmatpush1.bf16.msra.mxu1 %v4931_v3 }
 0xa80   :  { %4096 = vmatprep.subr.bf16.mxu1 %v4936_v61  ;;  %v4967_v61 = vld [vmem:[%s6299_s15 + $0x38] sm:$0xff]  }
 0xa81   :  { %3924 = vadd.xlane.f32.xlu0 %v6097_v62 }
 0xa83   :  { %4097 = vmatpush1.bf16.msra.mxu1 %v4934_v8  ;;  %v4966_v8 = vld [vmem:[%s6299_s15 + $0x78] sm:$0xff]  }
 0xa84   :  { %4098 = vmatprep.subr.bf16.mxu1 %v4939_v56  ;;  %v4004_v56 = vsub.s32 0, %v5357_v52 }
 0xa87   :  { %4099 = vmatpush1.bf16.msra.mxu1 %v4937_v48  ;;  %v4000_v48 = vld [vmem:[%s6300_s14] sm:$0x3] }
 0xa88   :  { %4100 = vmatprep.subr.bf16.mxu1 %v4942_v1  ;;  %v4008_v1 = vsub.s32 1, %v5357_v52 }
 0xa8b   :  { %4101 = vmatpush1.bf16.msra.mxu1 %v4940_v21  ;;  %v4009_v21 = vrot.slane %v4000_v48, %v4008_v1 }
 0xa8c   :  { %4102 = vmatprep.subr.bf16.mxu1 %v4945_v0 }
 0xa8f   :  { %4103 = vmatpush1.bf16.msra.mxu1 %v4943_v54 }
 0xa90   :  { %4104 = vmatprep.subr.bf16.mxu1 %v4948_v35 }
 0xa93   :  { %4105 = vmatpush1.bf16.msra.mxu1 %v4946_v51 }
 0xa94   :  { %4106 = vmatprep.subr.bf16.mxu1 %v4951_v36 }
 0xa97   :  { %4107 = vmatpush1.bf16.msra.mxu1 %v4949_v34 }
 0xb06   :  { %v3919_v5 = vpop.xlane.xlu0 %3918 }
 0xb07   :  { %v3926_v24 = vmul.f32 0.0078125, %v3919_v5 }
 0xb08   :  { %v3921_v57 = vpop.xlane.xlu1 %3920 }
 0xb09   :  { %v3930_v25 = vsub.f32 %v6085_v13, %v3926_v24  ;;  %v3927_v16 = vmul.f32 0.0078125, %v3921_v57  ;;  %v4952_v57 = vld [vmem:[%s6299_s15 + $0x40] sm:$0xff]  }
 0xb0a   :  { %v3923_v42 = vpop.xlane.xlu0 %3922  ;;  %4654 = vmatprep.subr.bf16.mxu0 %v4952_v57 }
 0xb0b   :  { %v3931_v6 = vsub.f32 %v6088_v12, %v3927_v16  ;;  %v3928_v53 = vmul.f32 0.0078125, %v3923_v42  ;;  %v3934_v33 = vmul.f32 %v3930_v25, %v3930_v25  ;;  %v4954_v16 = vld [vmem:[%s6299_s15 + $0x48] sm:$0xff]  }
 0xb0c   :  { %v4955_v42 = vld [vmem:[%s6299_s15 + $0x8] sm:$0xff]  }
 0xb0d   :  { %v6115_v49 = vsub.f32 %v6092_v20, %v3928_v53  ;;  %3938 = vadd.xlane.f32.xlu0 %v3934_v33  ;;  %v3935_v7 = vmul.f32 %v3931_v6, %v3931_v6  ;;  %v4957_v53 = vld [vmem:[%s6299_s15 + $0x10] sm:$0xff]   ;;  %v4958_v33 = vld [vmem:[%s6299_s15 + $0x58] sm:$0xff]  }
 0xb0e   :  { %v3925_v44 = vpop.xlane.xlu0 %3924 }
 0xb0f   :  { %v3929_v32 = vmul.f32 0.0078125, %v3925_v44  ;;  %3940 = vadd.xlane.f32.xlu1 %v3935_v7  ;;  %v3936_v38 = vmul.f32 %v6115_v49, %v6115_v49  ;;  %v4960_v7 = vld [vmem:[%s6299_s15 + $0x60] sm:$0xff]  }
 0xb10   :  { %v4961_v44 = vld [vmem:[%s6299_s15 + $0x20] sm:$0xff]  }
 0xb11   :  { %v3933_v19 = vsub.f32 %v6097_v62, %v3929_v32  ;;  %3942 = vadd.xlane.f32.xlu0 %v3936_v38  ;;  %v4962_v32 = vld [vmem:[%s6299_s15 + $0x68] sm:$0xff]  }
 0xb12   :  { %v4963_v38 = vld [vmem:[%s6299_s15 + $0x28] sm:$0xff]  }
 0xb13   :  { %v3937_v45 = vmul.f32 %v3933_v19, %v3933_v19 }
 0xb15   :  { %3944 = vadd.xlane.f32.xlu1 %v3937_v45  ;;  %v4965_v45 = vld [vmem:[%s6299_s15 + $0x30] sm:$0xff]  }
 0xb9a   :  { %v3939_v41 = vpop.xlane.xlu0 %3938 }
 0xb9b   :  { %v3946_v63 = vmul.f32 0.0078125, %v3939_v41 }
 0xb9c   :  { %v3941_v39 = vpop.xlane.xlu1 %3940 }
 0xb9d   :  { %v3950_v50 = vadd.f32 1e-06, %v3946_v63  ;;  %v3947_v40 = vmul.f32 0.0078125, %v3941_v39 }
 0xb9e   :  { %v3943_v28 = vpop.xlane.xlu0 %3942 }
 0xb9f   :  { %5040 = vrsqrt.f32 %v3950_v50  ;;  %v3951_v23 = vadd.f32 1e-06, %v3947_v40  ;;  %v3948_v37 = vmul.f32 0.0078125, %v3943_v28 }
 0xba1   :  { %5042 = vrsqrt.f32 %v3951_v23  ;;  %v3952_v55 = vadd.f32 1e-06, %v3948_v37 }
 0xba2   :  { %v3945_v27 = vpop.xlane.xlu1 %3944 }
 0xba3   :  { %5044 = vrsqrt.f32 %v3952_v55  ;;  %v3949_v30 = vmul.f32 0.0078125, %v3945_v27 }
 0xba5   :  { %v3953_v9 = vadd.f32 1e-06, %v3949_v30 }
 0xba7   :  { %5046 = vrsqrt.f32 %v3953_v9 }
 0xba9   :  { %v5041_v47 = vpop.eup %5040 }
 0xbaa   :  { %v3958_v15 = vmul.f32 %v5041_v47, %v3930_v25  ;;  %v4953_v25 = vld [vmem:[%s6299_s15] sm:$0xff]  }
 0xbab   :  { %v5043_v26 = vpop.eup %5042  ;;  %4655 = vmatpush3.bf16.msra.mxu0 %v4953_v25 }
 0xbac   :  { %v3959_v10 = vmul.f32 %v5043_v26, %v3931_v6  ;;  %v3968_v18 = vmul.f32 %v4519_v60, %v3958_v15  ;;  %4656 = vmatprep.subr.bf16.mxu0 %v4954_v16  ;;  %v4956_v6 = vld [vmem:[%s6299_s15 + $0x50] sm:$0xff]  }
 0xbad   :  { %v5045_v14 = vpop.eup %5044 }
 0xbae   :  { %v3969_v11 = vmul.f32 %v4519_v60, %v3959_v10  ;;  %v3978_v17 = vadd.f32 %v4520_v22, %v3968_v18  ;;  %v3960_v58 = vmul.f32 %v5045_v14, %v6115_v49  ;;  %v4959_v49 = vld [vmem:[%s6299_s15 + $0x18] sm:$0xff]  }
 0xbaf   :  { %4657 = vmatpush3.bf16.msra.mxu0 %v4955_v42 }
 0xbb0   :  { %v3979_v59 = vadd.f32 %v4520_v22, %v3969_v11  ;;  %v3970_v4 = vmul.f32 %v4519_v60, %v3960_v58  ;;  %4658 = vmatprep.subr.bf16.mxu0 %v4956_v6 }
 0xbb1   :  { %v5047_v31 = vpop.eup %5046 }
 0xbb2   :  { %v3982_v29 = vpack.c.bf16 %v3979_v59, %v3978_v17  ;;  %v3961_v2 = vmul.f32 %v5047_v31, %v3933_v19  ;;  %v3980_v5 = vadd.f32 %v4520_v22, %v3970_v4  ;;  %v4964_v19 = vld [vmem:[%s6299_s15 + $0x70] sm:$0xff]  }
 0xbb3   :  { %4659 = vmatpush3.bf16.msra.mxu0 %v4957_v53 }
 0xbb4   :  { %4125 = vmatmul.mubr.bf16.vlgmr.msra.gmra.mrb[52].mxu1 %v3982_v29  ;;  %v3971_v3 = vmul.f32 %v4519_v60, %v3961_v2  ;;  %4660 = vmatprep.subr.bf16.mxu0 %v4958_v33 }
 0xbb5   :  { %4134 = vmatprep.mubr.bf16.mxu1 %v5071_v46  ;;  %v4005_v46 = vrot.slane %v4000_v48, %v4004_v56 }
 0xbb6   :  { %v3981_v43 = vadd.f32 %v4520_v22, %v3971_v3 }
 0xbb7   :  { %4661 = vmatpush3.bf16.msra.mxu0 %v4959_v49 }
 0xbb8   :  { %v3983_v24 = vpack.c.bf16 %v3981_v43, %v3980_v5  ;;  %4662 = vmatprep.subr.bf16.mxu0 %v4960_v7 }
 0xbbb   :  { %4663 = vmatpush3.bf16.msra.mxu0 %v4961_v44 }
 0xbbc   :  { %4135 = vmatmul.mubr.bf16.gmra.mrb[56].mxu1 %v3983_v24  ;;  %4664 = vmatprep.subr.bf16.mxu0 %v4962_v32 }
 0xbbf   :  { %4665 = vmatpush3.bf16.msra.mxu0 %v4963_v38 }
 0xbc0   :  { %4666 = vmatprep.subr.bf16.mxu0 %v4964_v19 }
 0xbc3   :  { %4667 = vmatpush3.bf16.msra.mxu0 %v4965_v45 }
 0xbc4   :  { %4668 = vmatprep.subr.bf16.mxu0 %v4966_v8 }
 0xbc7   :  { %4669 = vmatpush3.bf16.msra.mxu0 %v4967_v61 }
 0xc87   :  { %v4126_v0 = vpop.f32.mrb[52].mxu1 }
 0xc88   :  { %v6216_v54 = vadd.f32 %v4126_v0, %v4005_v46  ;;  %v4128_v35 = vpop.f32.mrb[53].mxu1 }
 0xc89   :  { %v6218_v51 = vadd.f32 %v4128_v35, %v4009_v21  ;;  %v4130_v36 = vpop.f32.mrb[54].mxu1 }
 0xc8a   :  { %v4145_v34 = vmul.f32 %v6216_v54, %v6216_v54  ;;  %v6222_v41 = vadd.f32 %v4130_v36, %v4005_v46  ;;  %v4132_v63 = vpop.f32.mrb[55].mxu1 }
 0xc8b   :  { %v4146_v39 = vmul.f32 %v6218_v51, %v6218_v51  ;;  %v6226_v50 = vadd.f32 %v4132_v63, %v4009_v21 }
 0xc8c   :  { %v4153_v52 = vmul.f32 %v4145_v34, %v6216_v54  ;;  %v4147_v40 = vmul.f32 %v6222_v41, %v6222_v41 }
 0xc8d   :  { %v4154_v28 = vmul.f32 %v4146_v39, %v6218_v51  ;;  %v4148_v23 = vmul.f32 %v6226_v50, %v6226_v50 }
 0xc8e   :  { %v4161_v37 = vmul.f32 0.044715, %v4153_v52  ;;  %v4155_v55 = vmul.f32 %v4147_v40, %v6222_v41 }
 0xc8f   :  { %v4162_v27 = vmul.f32 0.044715, %v4154_v28  ;;  %v4156_v30 = vmul.f32 %v4148_v23, %v6226_v50  ;;  %v4136_v9 = vpop.f32.mrb[56].mxu1 }
 0xc90   :  { %v4169_v47 = vadd.f32 %v4161_v37, %v6216_v54  ;;  %v4163_v60 = vmul.f32 0.044715, %v4155_v55  ;;  %v6237_v15 = vadd.f32 %v4136_v9, %v4005_v46  ;;  %v4138_v26 = vpop.f32.mrb[57].mxu1 }
 0xc91   :  { %v4170_v10 = vadd.f32 %v4162_v27, %v6218_v51  ;;  %v4164_v18 = vmul.f32 0.044715, %v4156_v30  ;;  %v6240_v14 = vadd.f32 %v4138_v26, %v4009_v21  ;;  %v4140_v22 = vpop.f32.mrb[58].mxu1 }
 0xc92   :  { %v4177_v11 = vmul.f32 0.7978846, %v4169_v47  ;;  %v4171_v17 = vadd.f32 %v4163_v60, %v6222_v41  ;;  %v4149_v59 = vmul.f32 %v6237_v15, %v6237_v15  ;;  %v6245_v58 = vadd.f32 %v4140_v22, %v4005_v46  ;;  %v4142_v31 = vpop.f32.mrb[59].mxu1 }
 0xc93   :  { %v4178_v29 = vmul.f32 0.7978846, %v4170_v10  ;;  %v4172_v2 = vadd.f32 %v4164_v18, %v6226_v50  ;;  %v4150_v4 = vmul.f32 %v6240_v14, %v6240_v14  ;;  %v6250_v3 = vadd.f32 %v4142_v31, %v4009_v21 }
 0xc94   :  { %5048 = vtanh.f32 %v4177_v11  ;;  %v4179_v43 = vmul.f32 0.7978846, %v4171_v17  ;;  %v4157_v5 = vmul.f32 %v4149_v59, %v6237_v15  ;;  %v4151_v24 = vmul.f32 %v6245_v58, %v6245_v58 }
 0xc95   :  { %5050 = vtanh.f32 %v4178_v29  ;;  %v4180_v57 = vmul.f32 0.7978846, %v4172_v2  ;;  %v4158_v25 = vmul.f32 %v4150_v4, %v6240_v14  ;;  %v4152_v16 = vmul.f32 %v6250_v3, %v6250_v3 }
 0xc96   :  { %5052 = vtanh.f32 %v4179_v43  ;;  %v4165_v42 = vmul.f32 0.044715, %v4157_v5  ;;  %v4159_v6 = vmul.f32 %v4151_v24, %v6245_v58  ;;  %v4537_v5 = vld [vmem:[%s6301_s16] ss:$0 sm:$0xff] }
 0xc97   :  { %5054 = vtanh.f32 %v4180_v57  ;;  %v4166_v53 = vmul.f32 0.044715, %v4158_v25  ;;  %v4160_v33 = vmul.f32 %v4152_v16, %v6250_v3 }
 0xc98   :  { %v4173_v49 = vadd.f32 %v4165_v42, %v6237_v15  ;;  %v4167_v7 = vmul.f32 0.044715, %v4159_v6 }
 0xc99   :  { %v4174_v44 = vadd.f32 %v4166_v53, %v6240_v14  ;;  %v4168_v32 = vmul.f32 0.044715, %v4160_v33 }
 0xc9a   :  { %v4181_v38 = vmul.f32 0.7978846, %v4173_v49  ;;  %v4175_v19 = vadd.f32 %v4167_v7, %v6245_v58 }
 0xc9b   :  { %v4182_v45 = vmul.f32 0.7978846, %v4174_v44  ;;  %v4176_v8 = vadd.f32 %v4168_v32, %v6250_v3 }
 0xc9c   :  { %5056 = vtanh.f32 %v4181_v38  ;;  %v4183_v61 = vmul.f32 0.7978846, %v4175_v19 }
 0xc9d   :  { %5058 = vtanh.f32 %v4182_v45  ;;  %v4184_v56 = vmul.f32 0.7978846, %v4176_v8 }
 0xc9e   :  { %v5049_v48 = vpop.eup %5048  ;;  %5060 = vtanh.f32 %v4183_v61 }
 0xc9f   :  { %v5051_v1 = vpop.eup %5050  ;;  %v4193_v46 = vadd.f32 1.0, %v5049_v48  ;;  %5062 = vtanh.f32 %v4184_v56 }
 0xca0   :  { %v5053_v21 = vpop.eup %5052  ;;  %v4194_v0 = vadd.f32 1.0, %v5051_v1 }
 0xca1   :  { %v5055_v35 = vpop.eup %5054  ;;  %v4201_v36 = vmul.f32 0.5, %v4193_v46  ;;  %v4195_v34 = vadd.f32 1.0, %v5053_v21 }
 0xca2   :  { %v4196_v63 = vadd.f32 1.0, %v5055_v35  ;;  %v4202_v39 = vmul.f32 0.5, %v4194_v0 }
 0xca3   :  { %v4203_v52 = vmul.f32 0.5, %v4195_v34  ;;  %v4209_v28 = vmul.f32 %v4201_v36, %v6216_v54 }
 0xca4   :  { %v4204_v40 = vmul.f32 0.5, %v4196_v63  ;;  %v4210_v55 = vmul.f32 %v4202_v39, %v6218_v51 }
 0xca5   :  { %v4211_v23 = vmul.f32 %v4203_v52, %v6222_v41 }
 0xca6   :  { %v5057_v37 = vpop.eup %5056  ;;  %v4212_v27 = vmul.f32 %v4204_v40, %v6226_v50 }
 0xca7   :  { %v5059_v30 = vpop.eup %5058  ;;  %v4217_v9 = vpack.c.bf16 %v4211_v23, %v4209_v28  ;;  %v4197_v47 = vadd.f32 1.0, %v5057_v37 }
 0xca8   :  { %v5061_v60 = vpop.eup %5060  ;;  %v4218_v26 = vpack.c.bf16 %v4212_v27, %v4210_v55  ;;  %v4198_v10 = vadd.f32 1.0, %v5059_v30 }
 0xca9   :  { %v5063_v18 = vpop.eup %5062  ;;  %v4199_v22 = vadd.f32 1.0, %v5061_v60  ;;  %v4205_v11 = vmul.f32 0.5, %v4197_v47 }
 0xcaa   :  { %4388 = vmatprep.mubr.bf16.mxu0 %v4218_v26  ;;  %v4200_v17 = vadd.f32 1.0, %v5063_v18  ;;  %v4206_v59 = vmul.f32 0.5, %v4198_v10 }
 0xcab   :  { %4389 = vmatmul.mubr.bf16.vlgmr.msra.gmra.mrb[28].mxu0 %v4217_v9  ;;  %v4207_v54 = vmul.f32 0.5, %v4199_v22  ;;  %v4213_v31 = vmul.f32 %v4205_v11, %v6237_v15 }
 0xcac   :  { %v4208_v41 = vmul.f32 0.5, %v4200_v17  ;;  %v4214_v50 = vmul.f32 %v4206_v59, %v6240_v14 }
 0xcad   :  { %v4215_v51 = vmul.f32 %v4207_v54, %v6245_v58 }
 0xcae   :  { %v4216_v29 = vmul.f32 %v4208_v41, %v6250_v3 }
 0xcaf   :  { %v4219_v2 = vpack.c.bf16 %v4215_v51, %v4213_v31 }
 0xcb0   :  { %v4220_v4 = vpack.c.bf16 %v4216_v29, %v4214_v50 }
 0xcb2   :  { %4396 = vmatprep.mubr.bf16.mxu0 %v4220_v4 }
 0xcb3   :  { %4397 = vmatmul.mubr.bf16.gmra.mrb[32].mxu0 %v4219_v2 }
 0xd7e   :  { %v4670_v43 = vpop.f32.mrb[28].mxu0 }
 0xd7f   :  { %v4671_v24 = vpop.f32.mrb[29].mxu0 }
 0xd80   :  { %v4672_v57 = vadd.f32 %v4671_v24, %v4670_v43  ;;  %v4673_v25 = vpop.f32.mrb[30].mxu0 }
 0xd81   :  { %v4674_v16 = vpop.f32.mrb[31].mxu0 }
 0xd82   :  { %v4391_v15 = vadd.f32 %v4672_v57, %v4537_v5  ;;  %v4675_v42 = vadd.f32 %v4674_v16, %v4673_v25 }
 0xd84   :  { %v4394_v58 = vadd.f32 %v4675_v42, %v4537_v5  ;;  %v4405_v14 = vadd.f32 %v4391_v15, %v6085_v13 }
 0xd86   :  { %v4406_v3 = vadd.f32 %v4394_v58, %v6088_v12  ;;  %v4676_v6 = vpop.f32.mrb[32].mxu0 }
 0xd87   :  { %v4677_v53 = vpop.f32.mrb[33].mxu0 }
 0xd88   :  { %v4573_v33 = vpack.c.bf16 %v4406_v3, %v4405_v14  ;;  %v4678_v49 = vadd.f32 %v4677_v53, %v4676_v6  ;;  %v4679_v7 = vpop.f32.mrb[34].mxu0 }
 0xd89   :  { %v4680_v44 = vpop.f32.mrb[35].mxu0 }
 0xd8a   :  { %4574 = vst [vmem:[%s6302_s17] sm:$0xff] %v4573_v33   ;;  %v4399_v32 = vadd.f32 %v4678_v49, %v4537_v5  ;;  %v4681_v38 = vadd.f32 %v4680_v44, %v4679_v7 }
 0xd8c   :  { %v4402_v19 = vadd.f32 %v4681_v38, %v4537_v5  ;;  %v4407_v45 = vadd.f32 %v4399_v32, %v6092_v20 }
 0xd8e   :  { %v4408_v8 = vadd.f32 %v4402_v19, %v6097_v62 }
 0xd90   :  { %v4578_v13 = vpack.c.bf16 %v4408_v8, %v4407_v45 }
 0xd92   :  { %4581 = vst [vmem:[%s6302_s17 + $0x8] sm:$0xff] %v4578_v13  }

// kernel: _lambda_.5
= control target key start
LH: loop header
LB: loop body
LE: loop exit
PB: predicated region body
PF: predicated region fallthrough
CT: control target
= control target key end

     0   :  { %s6397_s0 = inlined_call_operand.vmem [shape: bf16[2,16,128], index: 0, kind: input, shape index: {}]   ;;  %s6398_s1 = inlined_call_operand.vmem [shape: f32[1,128], index: 1, kind: input, shape index: {}]   ;;  %s6399_s2 = inlined_call_operand.vmem [shape: f32[1,128], index: 2, kind: input, shape index: {}]   ;;  %s6400_s3 = inlined_call_operand.vmem [shape: bf16[128,128], index: 3, kind: input, shape index: {}]   ;;  %s6401_s4 = inlined_call_operand.vmem [shape: f32[1,128], index: 4, kind: input, shape index: {}]   ;;  %s6402_s5 = inlined_call_operand.vmem [shape: bf16[128,128], index: 5, kind: input, shape index: {}]   ;;  %s6403_s6 = inlined_call_operand.vmem [shape: f32[1,128], index: 6, kind: input, shape index: {}]   ;;  %s6404_s7 = inlined_call_operand.vmem [shape: bf16[128,128], index: 7, kind: input, shape index: {}]   ;;  %s6405_s8 = inlined_call_operand.vmem [shape: f32[1,128], index: 8, kind: input, shape index: {}]   ;;  %s6406_s9 = inlined_call_operand.vmem [shape: bf16[128,128], index: 9, kind: input, shape index: {}]   ;;  %s6407_s10 = inlined_call_operand.vmem [shape: f32[1,128], index: 10, kind: input, shape index: {}]   ;;  %s6408_s11 = inlined_call_operand.vmem [shape: f32[1,128], index: 11, kind: input, shape index: {}]   ;;  %s6409_s12 = inlined_call_operand.vmem [shape: f32[1,128], index: 12, kind: input, shape index: {}]   ;;  %s6410_s13 = inlined_call_operand.vmem [shape: bf16[128,256], index: 13, kind: input, shape index: {}]   ;;  %s6411_s14 = inlined_call_operand.vmem [shape: f32[1,256], index: 14, kind: input, shape index: {}]   ;;  %s6412_s15 = inlined_call_operand.vmem [shape: bf16[256,128], index: 15, kind: input, shape index: {}]   ;;  %s6413_s16 = inlined_call_operand.vmem [shape: f32[1,128], index: 16, kind: input, shape index: {}]   ;;  %s6414_s17 = inlined_call_operand.vmem [shape: f32[1,128], index: 17, kind: input, shape index: {}]   ;;  %s6415_s18 = inlined_call_operand.vmem [shape: f32[1,128], index: 18, kind: input, shape index: {}]   ;;  %s6416_s19 = inlined_call_operand.hbm [shape: f32[2,16,128], index: 19, kind: output, shape index: {}]  }
   0x1   :  { %6419 = sst [smem:[#allocation5_spill]] %s6397_s0 }
   0x2   :  { %6420 = sst [smem:[#allocation6_spill]] %s6398_s1 }
   0x3   :  { %6421 = sst [smem:[#allocation7_spill]] %s6399_s2 }
   0x4   :  { %6422 = sst [smem:[#allocation8_spill]] %s6400_s3 }
   0x5   :  { %s6423_s20 = sld [smem:[#allocation5_spill]]  ;;  %s6424_s23 = sld [smem:[#allocation8_spill]]  ;;  %v4952_v7 = vld [vmem:[%s6402_s5] sm:$0xff]  }
   0x6   :  { %4754 = vmatprep.subr.bf16.mxu1 %v4952_v7 }
   0x7   :  { %4755 = vmatpush3.bf16.msra.mxu1 %v4952_v7 }
   0xb   :  { %v4626_v0 = vld [vmem:[%s6423_s20] sm:$0xff]   ;;  %v4633_v1 = vld [vmem:[%s6423_s20 + $0x8] sm:$0xff]  }
   0xc   :  { %v5268_v2 = vunpack.c.l.bf16 %v4626_v0  ;;  %v5270_v3 = vunpack.c.l.bf16 %v4633_v1  ;;  %v5274_v4 = vunpack.c.h.bf16 %v4626_v0  ;;  %v5276_v5 = vunpack.c.h.bf16 %v4633_v1  ;;  %v4951_v6 = vld [vmem:[%s6424_s23] sm:$0xff]  }
   0xd   :  { %4734 = vmatprep.subr.bf16.mxu0 %v4951_v6 }
   0xe   :  { %74 = vadd.xlane.f32.xlu0 %v5268_v2  ;;  %78 = vadd.xlane.f32.xlu1 %v5270_v3 }
   0xf   :  { %4735 = vmatpush3.bf16.msra.mxu0 %v4951_v6 }
  0x12   :  { %76 = vadd.xlane.f32.xlu0 %v5274_v4  ;;  %80 = vadd.xlane.f32.xlu1 %v5276_v5 }
  0x13   :  { %24 = vsyncpa [#allocation3], 0  ;;  %v4953_v24 = vld [vmem:[%s6424_s23 + $0x8] sm:$0xff]   ;;  %v4955_v26 = vld [vmem:[%s6424_s23 + $0x10] sm:$0xff]   ;;  %s6425_s27 = sld [smem:[#allocation6_spill]]  ;;  %s6426_s0 = sld [smem:[#allocation7_spill]] }
  0x14   :  { %v4954_v25 = vld [vmem:[%s6402_s5 + $0x8] sm:$0xff]   ;;  %4736 = vmatprep.subr.bf16.mxu0 %v4953_v24  ;;  %v4956_v27 = vld [vmem:[%s6402_s5 + $0x10] sm:$0xff]   ;;  %v4957_v28 = vld [vmem:[%s6424_s23 + $0x18] sm:$0xff]   ;;  %vm5155_vm0 = vmmov 0   ;;  %vm1389_vm1 = vcmask 261120   ;;  %vm1578_vm2 = vcmask 130048  }
  0x15   :  { %4737 = vmatpush3.bf16.msra.mxu0 %v4953_v24  ;;  %4756 = vmatprep.subr.bf16.mxu1 %v4954_v25  ;;  %v4958_v29 = vld [vmem:[%s6402_s5 + $0x18] sm:$0xff]   ;;  %v4959_v30 = vld [vmem:[%s6424_s23 + $0x20] sm:$0xff]   ;;  %v4961_v32 = vld [vmem:[%s6424_s23 + $0x28] sm:$0xff]   ;;  %vm2145_vm3 = vcmask 523264   ;;  %vm2148_vm4 = vcmask 785408  }
  0x16   :  { %4757 = vmatpush3.bf16.msra.mxu1 %v4954_v25  ;;  %4738 = vmatprep.subr.bf16.mxu0 %v4955_v26  ;;  %v4960_v31 = vld [vmem:[%s6402_s5 + $0x20] sm:$0xff]   ;;  %v4962_v33 = vld [vmem:[%s6402_s5 + $0x28] sm:$0xff]   ;;  %v4963_v34 = vld [vmem:[%s6424_s23 + $0x30] sm:$0xff]  }
  0x17   :  { %4758 = vmatprep.subr.bf16.mxu1 %v4956_v27  ;;  %v4964_v35 = vld [vmem:[%s6402_s5 + $0x30] sm:$0xff]   ;;  %v4965_v36 = vld [vmem:[%s6424_s23 + $0x38] sm:$0xff]   ;;  %v4967_v38 = vld [vmem:[%s6404_s7] sm:$0xff]  }
  0x18   :  { %v4966_v37 = vld [vmem:[%s6402_s5 + $0x38] sm:$0xff]  }
  0x19   :  { %4739 = vmatpush3.bf16.msra.mxu0 %v4955_v26  ;;  %v4502_v53 = vld [vmem:[%s6425_s27] ss:$0 sm:$0xff] }
  0x1a   :  { %4759 = vmatpush3.bf16.msra.mxu1 %v4956_v27  ;;  %4740 = vmatprep.subr.bf16.mxu0 %v4957_v28  ;;  %v4503_v58 = vld [vmem:[%s6426_s0] ss:$0 sm:$0xff] }
  0x1b   :  { %4760 = vmatprep.subr.bf16.mxu1 %v4958_v29 }
  0x1d   :  { %4741 = vmatpush3.bf16.msra.mxu0 %v4957_v28 }
  0x1e   :  { %4761 = vmatpush3.bf16.msra.mxu1 %v4958_v29  ;;  %4742 = vmatprep.subr.bf16.mxu0 %v4959_v30 }
  0x1f   :  { %4762 = vmatprep.subr.bf16.mxu1 %v4960_v31 }
  0x21   :  { %4743 = vmatpush3.bf16.msra.mxu0 %v4959_v30 }
  0x22   :  { %4763 = vmatpush3.bf16.msra.mxu1 %v4960_v31  ;;  %4744 = vmatprep.subr.bf16.mxu0 %v4961_v32 }
  0x23   :  { %4764 = vmatprep.subr.bf16.mxu1 %v4962_v33 }
  0x25   :  { %4745 = vmatpush3.bf16.msra.mxu0 %v4961_v32 }
  0x26   :  { %4765 = vmatpush3.bf16.msra.mxu1 %v4962_v33  ;;  %4746 = vmatprep.subr.bf16.mxu0 %v4963_v34 }
  0x27   :  { %4766 = vmatprep.subr.bf16.mxu1 %v4964_v35 }
  0x29   :  { %4747 = vmatpush3.bf16.msra.mxu0 %v4963_v34 }
  0x2a   :  { %4767 = vmatpush3.bf16.msra.mxu1 %v4964_v35  ;;  %4748 = vmatprep.subr.bf16.mxu0 %v4965_v36 }
  0x2b   :  { %4768 = vmatprep.subr.bf16.mxu1 %v4966_v37 }
  0x2d   :  { %4749 = vmatpush3.bf16.msra.mxu0 %v4965_v36  ;;  %v5154_v36 = vmov 0.0  }
  0x2e   :  { %4769 = vmatpush3.bf16.msra.mxu1 %v4966_v37  ;;  %4774 = vmatprep.subr.bf16.mxu0 %v4967_v38  ;;  %v4522_v37 = vld [vmem:[%s6405_s8] ss:$0 sm:$0xff] }
  0x2f   :  { %4794 = vmatprep.subr.bf16.mxu1 %v5154_v36 }
  0x9b   :  { %v75_v8 = vpop.xlane.xlu0 %74  ;;  %v79_v9 = vpop.xlane.xlu1 %78 }
  0x9c   :  { %v83_v10 = vmul.f32 0.0078125, %v75_v8  ;;  %v85_v11 = vmul.f32 0.0078125, %v79_v9 }
  0x9e   :  { %v5287_v12 = vsub.f32 %v5268_v2, %v83_v10  ;;  %v5290_v13 = vsub.f32 %v5270_v3, %v85_v11  ;;  %v4968_v11 = vld [vmem:[%s6404_s7 + $0x8] sm:$0xff]  }
  0x9f   :  { %v77_v14 = vpop.xlane.xlu0 %76  ;;  %v81_v15 = vpop.xlane.xlu1 %80 }
  0xa0   :  { %v84_v16 = vmul.f32 0.0078125, %v77_v14  ;;  %v91_v17 = vmul.f32 %v5287_v12, %v5287_v12  ;;  %v86_v18 = vmul.f32 0.0078125, %v81_v15  ;;  %v93_v21 = vmul.f32 %v5290_v13, %v5290_v13  ;;  %v4971_v14 = vld [vmem:[%s6404_s7 + $0x20] sm:$0xff]   ;;  %v4972_v15 = vld [vmem:[%s6404_s7 + $0x28] sm:$0xff]  }
  0xa2   :  { %v5295_v19 = vsub.f32 %v5274_v4, %v84_v16  ;;  %95 = vadd.xlane.f32.xlu0 %v91_v17  ;;  %v5298_v20 = vsub.f32 %v5276_v5, %v86_v18  ;;  %v4973_v16 = vld [vmem:[%s6404_s7 + $0x30] sm:$0xff]   ;;  %v4974_v17 = vld [vmem:[%s6404_s7 + $0x38] sm:$0xff]   ;;  %v4504_v18 = vld [vmem:[%s6401_s4] ss:$0 sm:$0xff]  ;;  %s5151_s4 = smov 64  }
  0xa4   :  { %v92_v22 = vmul.f32 %v5295_v19, %v5295_v19  ;;  %v94_v23 = vmul.f32 %v5298_v20, %v5298_v20 }
  0xa6   :  { %99 = vadd.xlane.f32.xlu0 %v93_v21  ;;  %97 = vadd.xlane.f32.xlu1 %v92_v22 }
  0xaa   :  { %101 = vadd.xlane.f32.xlu1 %v94_v23 }
 0x12f   :  { %v96_v39 = vpop.xlane.xlu0 %95 }
 0x130   :  { %v103_v40 = vmul.f32 0.0078125, %v96_v39 }
 0x132   :  { %v107_v41 = vadd.f32 1e-06, %v103_v40 }
 0x133   :  { %v98_v42 = vpop.xlane.xlu1 %97  ;;  %v100_v43 = vpop.xlane.xlu0 %99 }
 0x134   :  { %5023 = vrsqrt.f32 %v107_v41  ;;  %v104_v44 = vmul.f32 0.0078125, %v98_v42  ;;  %v105_v45 = vmul.f32 0.0078125, %v100_v43 }
 0x136   :  { %v108_v46 = vadd.f32 1e-06, %v104_v44  ;;  %v109_v47 = vadd.f32 1e-06, %v105_v45 }
 0x137   :  { %v102_v48 = vpop.xlane.xlu1 %101 }
 0x138   :  { %5025 = vrsqrt.f32 %v108_v46  ;;  %v106_v49 = vmul.f32 0.0078125, %v102_v48  ;;  %v5156_v46 = vmov 1983009808   ;;  %v526_v48 = vlaneseq }
 0x139   :  { %5027 = vrsqrt.f32 %v109_v47  ;;  %v524_v47 = vunpack.c.l.s4 %v5156_v46 }
 0x13a   :  { %v110_v50 = vadd.f32 1e-06, %v106_v49  ;;  %v5157_v49 = vmov 1934713408  }
 0x13c   :  { %5029 = vrsqrt.f32 %v110_v50  ;;  %v556_v50 = vunpack.c.l.s4 %v5157_v49 }
 0x13e   :  { %v5024_v51 = vpop.eup %5023 }
 0x13f   :  { %v115_v52 = vmul.f32 %v5024_v51, %v5287_v12  ;;  %v4969_v12 = vld [vmem:[%s6404_s7 + $0x10] sm:$0xff]   ;;  %v525_v51 = vunpack.c.0.s8 %v524_v47 }
 0x141   :  { %v125_v57 = vmul.f32 %v4502_v53, %v115_v52  ;;  %v5457_v52 = vshrl.u32 %v526_v48, 7 }
 0x142   :  { %v5026_v54 = vpop.eup %5025 }
 0x143   :  { %v5028_v55 = vpop.eup %5027  ;;  %v116_v56 = vmul.f32 %v5026_v54, %v5295_v19  ;;  %v135_v62 = vadd.f32 %v4503_v58, %v125_v57  ;;  %v4513_v19 = vld [vmem:[%s6403_s6] ss:$0 sm:$0xff]  ;;  %s5152_s6 = smov 96  }
 0x144   :  { %v117_v59 = vmul.f32 %v5028_v55, %v5290_v13  ;;  %v4970_v13 = vld [vmem:[%s6404_s7 + $0x18] sm:$0xff]   ;;  %s5153_s7 = smov 32   ;;  %v557_v55 = vunpack.c.0.s8 %v556_v50 }
 0x145   :  { %v126_v60 = vmul.f32 %v4502_v53, %v116_v56  ;;  %v5460_v56 = vsub.s32 %v525_v51, %v5457_v52 }
 0x146   :  { %v5030_v61 = vpop.eup %5029  ;;  %v127_v1 = vmul.f32 %v4502_v53, %v117_v59 }
 0x147   :  { %v136_v63 = vadd.f32 %v4503_v58, %v126_v60  ;;  %v118_v0 = vmul.f32 %v5030_v61, %v5298_v20 }
 0x148   :  { %v137_v8 = vadd.f32 %v4503_v58, %v127_v1 }
 0x149   :  { %v139_v6 = vpack.c.bf16 %v136_v63, %v135_v62  ;;  %v128_v7 = vmul.f32 %v4502_v53, %v118_v0  ;;  %v5465_v63 = vsub.s32 %v557_v55, %v5457_v52 }
 0x14b   :  { %4750 = vmatprep.mubr.bf16.mxu0 %v139_v6  ;;  %4770 = vmatprep.mubr.bf16.mxu1 %v139_v6  ;;  %v138_v9 = vadd.f32 %v4503_v58, %v128_v7 }
 0x14d   :  { %v140_v10 = vpack.c.bf16 %v138_v9, %v137_v8 }
 0x14f   :  { %4751 = vmatmul.mubr.bf16.vlgmr.msra.gmra.mrb[0].mxu0 %v140_v10  ;;  %4771 = vmatmul.mubr.bf16.vlgmr.msra.gmra.mrb[0].mxu1 %v140_v10 }
 0x150   :  { %4775 = vmatpush3.bf16.msra.mxu0 %v4967_v38  ;;  %4790 = vmatprep.mubr.bf16.mxu0 %v139_v6 }
 0x151   :  { %4776 = vmatprep.subr.bf16.mxu0 %v4968_v11  ;;  %4796 = vmatprep.mubr.msk.bf16.mxu1 %vm5155_vm0, %v5154_v36 }
 0x154   :  { %4777 = vmatpush3.bf16.msra.mxu0 %v4968_v11 }
 0x155   :  { %4778 = vmatprep.subr.bf16.mxu0 %v4969_v12 }
 0x158   :  { %4779 = vmatpush3.bf16.msra.mxu0 %v4969_v12 }
 0x159   :  { %4780 = vmatprep.subr.bf16.mxu0 %v4970_v13 }
 0x15c   :  { %4781 = vmatpush3.bf16.msra.mxu0 %v4970_v13 }
 0x15d   :  { %4782 = vmatprep.subr.bf16.mxu0 %v4971_v14 }
 0x160   :  { %4783 = vmatpush3.bf16.msra.mxu0 %v4971_v14 }
 0x161   :  { %4784 = vmatprep.subr.bf16.mxu0 %v4972_v15 }
 0x164   :  { %4785 = vmatpush3.bf16.msra.mxu0 %v4972_v15 }
 0x165   :  { %4786 = vmatprep.subr.bf16.mxu0 %v4973_v16 }
 0x168   :  { %4787 = vmatpush3.bf16.msra.mxu0 %v4973_v16 }
 0x169   :  { %4788 = vmatprep.subr.bf16.mxu0 %v4974_v17 }
 0x16c   :  { %4789 = vmatpush3.bf16.msra.mxu0 %v4974_v17 }
 0x16d   :  { %4842 = vmatprep.subr.bf16.mxu0 %v5154_v36 }
 0x16f   :  { %4791 = vmatmul.mubr.bf16.vlgmr.msra.gmra.mrb[4].mxu0 %v140_v10 }
 0x170   :  { %4844 = vmatprep.mubr.msk.bf16.mxu0 %vm5155_vm0, %v5154_v36 }
 0x222   :  { %v4752_v20 = vpop.f32.mrb[0].mxu0  ;;  %v4772_v21 = vpop.f32.mrb[0].mxu1 }
 0x223   :  { %v5388_v22 = vadd.f32 %v4752_v20, %v4504_v18  ;;  %v5390_v23 = vadd.f32 %v4772_v21, %v4513_v19  ;;  %v246_v24 = vpop.f32.mrb[1].mxu0  ;;  %v366_v25 = vpop.f32.mrb[1].mxu1 }
 0x224   :  { %v5392_v26 = vadd.f32 %v4513_v19, %v366_v25  ;;  %v4753_v27 = vpop.f32.mrb[2].mxu0  ;;  %v4773_v28 = vpop.f32.mrb[2].mxu1  ;;  %v5408_v34 = vadd.f32 %v4504_v18, %v246_v24 }
 0x225   :  { %v5394_v29 = vadd.f32 %v4753_v27, %v4504_v18  ;;  %v5396_v30 = vadd.f32 %v4773_v28, %v4513_v19  ;;  %v249_v31 = vpop.f32.mrb[3].mxu0  ;;  %v369_v32 = vpop.f32.mrb[3].mxu1 }
 0x226   :  { %805 = vrot.lane.b32.xlu1 %v5392_v26, %s5151_s4  ;;  %799 = vrot.lane.b32.xlu0 %v5392_v26, %s5152_s6  ;;  %v5402_v33 = vadd.f32 %v4513_v19, %v369_v32  ;;  %v5418_v35 = vadd.f32 %v4504_v18, %v249_v31 }
 0x22a   :  { %801 = vrot.lane.b32.xlu1 %v5402_v33, %s5152_s6  ;;  %811 = vrot.lane.b32.xlu0 %v5392_v26, %s5153_s7 }
 0x22e   :  { %807 = vrot.lane.b32.xlu1 %v5402_v33, %s5151_s4  ;;  %503 = vrot.lane.b32.xlu0 %v5408_v34, %s5152_s6 }
 0x232   :  { %813 = vrot.lane.b32.xlu1 %v5402_v33, %s5153_s7  ;;  %509 = vrot.lane.b32.xlu0 %v5408_v34, %s5151_s4 }
 0x236   :  { %505 = vrot.lane.b32.xlu1 %v5418_v35, %s5152_s6  ;;  %515 = vrot.lane.b32.xlu0 %v5408_v34, %s5153_s7 }
 0x23a   :  { %511 = vrot.lane.b32.xlu1 %v5418_v35, %s5151_s4 }
 0x23e   :  { %517 = vrot.lane.b32.xlu1 %v5418_v35, %s5153_s7 }
 0x242   :  { %v4792_v38 = vpop.f32.mrb[4].mxu0 }
 0x243   :  { %v5433_v39 = vadd.f32 %v4792_v38, %v4522_v37  ;;  %v486_v40 = vpop.f32.mrb[5].mxu0 }
 0x244   :  { %v5435_v41 = vadd.f32 %v4522_v37, %v486_v40  ;;  %v4793_v42 = vpop.f32.mrb[6].mxu0 }
 0x245   :  { %v5437_v43 = vadd.f32 %v4793_v42, %v4522_v37  ;;  %v489_v44 = vpop.f32.mrb[7].mxu0 }
 0x246   :  { %1101 = vrot.lane.b32.xlu1 %v5435_v41, %s5151_s4  ;;  %1095 = vrot.lane.b32.xlu0 %v5435_v41, %s5152_s6  ;;  %v5443_v45 = vadd.f32 %v4522_v37, %v489_v44 }
 0x24a   :  { %1097 = vrot.lane.b32.xlu1 %v5443_v45, %s5152_s6  ;;  %1107 = vrot.lane.b32.xlu0 %v5435_v41, %s5153_s7 }
 0x24e   :  { %1103 = vrot.lane.b32.xlu1 %v5443_v45, %s5151_s4 }
 0x252   :  { %1109 = vrot.lane.b32.xlu1 %v5443_v45, %s5153_s7 }
 0x298   :  { %v806_v53 = vpop.permute.xlu1 %805  ;;  %v800_v54 = vpop.permute.xlu0 %799 }
 0x299   :  { %v817_v57 = vcombine.low %v5392_v26, %v806_v53  ;;  %v818_v58 = vcombine.high %v5392_v26, %v806_v53 }
 0x29b   :  { %v825_v0 = vrot.slane %v817_v57, %v5460_v56  ;;  %v832_v1 = vrot.slane %v818_v58, %v5460_v56 }
 0x29c   :  { %v802_v59 = vpop.permute.xlu1 %801  ;;  %v812_v60 = vpop.permute.xlu0 %811 }
 0x29d   :  { %v833_v61 = vcombine.low %v800_v54, %v812_v60  ;;  %v834_v62 = vcombine.high %v800_v54, %v812_v60 }
 0x29f   :  { %v841_v6 = vrot.slane %v833_v61, %v5460_v56  ;;  %v848_v7 = vrot.slane %v834_v62, %v5460_v56 }
 0x2a0   :  { %v808_v8 = vpop.permute.xlu1 %807  ;;  %v504_v9 = vpop.permute.xlu0 %503 }
 0x2a1   :  { %v849_v10 = vcombine.low %v825_v0, %v841_v6  ;;  %v850_v11 = vcombine.high %v825_v0, %v841_v6  ;;  %v865_v12 = vcombine.low %v832_v1, %v848_v7  ;;  %v866_v13 = vcombine.high %v832_v1, %v848_v7 }
 0x2a2   :  { %v885_v14 = vcombine.low %v5402_v33, %v808_v8  ;;  %v886_v15 = vcombine.high %v5402_v33, %v808_v8 }
 0x2a3   :  { %v857_v16 = vrot.slane %v849_v10, %v5465_v63  ;;  %v864_v17 = vrot.slane %v850_v11, %v5465_v63  ;;  %v873_v18 = vrot.slane %v865_v12, %v5465_v63  ;;  %v880_v19 = vrot.slane %v866_v13, %v5465_v63 }
 0x2a4   :  { %v814_v20 = vpop.permute.xlu1 %813  ;;  %v510_v21 = vpop.permute.xlu0 %509  ;;  %v893_v27 = vrot.slane %v885_v14, %v5460_v56  ;;  %v900_v33 = vrot.slane %v886_v15, %v5460_v56 }
 0x2a5   :  { %v953_v24 = vcombine.low %v857_v16, %v864_v17  ;;  %v4535_v25 = vcombine.high %v857_v16, %v864_v17  ;;  %v969_v26 = vcombine.low %v873_v18, %v880_v19  ;;  %v901_v28 = vcombine.low %v802_v59, %v814_v20 }
 0x2a6   :  { %v902_v31 = vcombine.high %v802_v59, %v814_v20  ;;  %v4536_v32 = vcombine.high %v873_v18, %v880_v19  ;;  %v521_v37 = vcombine.low %v5408_v34, %v510_v21  ;;  %v522_v38 = vcombine.high %v5408_v34, %v510_v21 }
 0x2a7   :  { %v5482_v40 = vrot.slane %v953_v24, %v5460_v56  ;;  %v5485_v42 = vrot.slane %v4535_v25, %v5460_v56  ;;  %v909_v44 = vrot.slane %v901_v28, %v5460_v56  ;;  %v5490_v49 = vrot.slane %v969_v26, %v5460_v56 }
 0x2a8   :  { %v916_v46 = vrot.slane %v902_v31, %v5460_v56  ;;  %v506_v47 = vpop.permute.xlu1 %505  ;;  %v516_v48 = vpop.permute.xlu0 %515  ;;  %v529_v57 = vrot.slane %v521_v37, %v5460_v56  ;;  %v536_v58 = vrot.slane %v522_v38, %v5460_v56  ;;  %v5497_v61 = vrot.slane %v4536_v32, %v5460_v56 }
 0x2a9   :  { %v537_v50 = vcombine.low %v504_v9, %v516_v48  ;;  %v538_v51 = vcombine.high %v504_v9, %v516_v48  ;;  %v917_v53 = vcombine.low %v893_v27, %v909_v44  ;;  %v918_v54 = vcombine.high %v893_v27, %v909_v44 }
 0x2aa   :  { %v933_v34 = vcombine.low %v900_v33, %v916_v46  ;;  %v934_v55 = vcombine.high %v900_v33, %v916_v46  ;;  %v985_v6 = vcombine.low %v5482_v40, %v5485_v42  ;;  %v1001_v19 = vcombine.low %v5490_v49, %v5497_v61 }
 0x2ab   :  { %v545_v59 = vrot.slane %v537_v50, %v5460_v56  ;;  %v552_v60 = vrot.slane %v538_v51, %v5460_v56  ;;  %v925_v62 = vrot.slane %v917_v53, %v5465_v63  ;;  %v932_v0 = vrot.slane %v918_v54, %v5465_v63 }
 0x2ac   :  { %v512_v1 = vpop.permute.xlu1 %511  ;;  %v941_v11 = vrot.slane %v933_v34, %v5465_v63  ;;  %v948_v12 = vrot.slane %v934_v55, %v5465_v63  ;;  %v5510_v18 = vrot.slane %v985_v6, %v5465_v63 }
 0x2ad   :  { %v553_v7 = vcombine.low %v529_v57, %v545_v59  ;;  %v554_v8 = vcombine.high %v529_v57, %v545_v59  ;;  %v569_v9 = vcombine.low %v536_v58, %v552_v60  ;;  %v570_v10 = vcombine.high %v536_v58, %v552_v60 }
 0x2ae   :  { %v1021_v20 = vcombine.low %v925_v62, %v932_v0  ;;  %v4537_v21 = vcombine.high %v925_v62, %v932_v0  ;;  %v589_v26 = vcombine.low %v5418_v35, %v512_v1  ;;  %v590_v27 = vcombine.high %v5418_v35, %v512_v1 }
 0x2af   :  { %v561_v13 = vrot.slane %v553_v7, %v5465_v63  ;;  %v568_v14 = vrot.slane %v554_v8, %v5465_v63  ;;  %v577_v15 = vrot.slane %v569_v9, %v5465_v63  ;;  %v584_v16 = vrot.slane %v570_v10, %v5465_v63 }
 0x2b0   :  { %v518_v17 = vpop.permute.xlu1 %517  ;;  %v1037_v32 = vcombine.low %v941_v11, %v948_v12  ;;  %v4538_v33 = vcombine.high %v941_v11, %v948_v12  ;;  %v597_v44 = vrot.slane %v589_v26, %v5460_v56  ;;  %v604_v46 = vrot.slane %v590_v27, %v5460_v56 }
 0x2b1   :  { %v657_v24 = vcombine.low %v561_v13, %v568_v14  ;;  %v4531_v25 = vcombine.high %v561_v13, %v568_v14  ;;  %v605_v28 = vcombine.low %v506_v47, %v518_v17  ;;  %v606_v31 = vcombine.high %v506_v47, %v518_v17 }
 0x2b2   :  { %v673_v37 = vcombine.low %v577_v15, %v584_v16  ;;  %v4532_v38 = vcombine.high %v577_v15, %v584_v16  ;;  %v5521_v51 = vrot.slane %v1021_v20, %v5460_v56  ;;  %v5524_v53 = vrot.slane %v4537_v21, %v5460_v56 }
 0x2b3   :  { %v613_v48 = vrot.slane %v605_v28, %v5460_v56  ;;  %v620_v50 = vrot.slane %v606_v31, %v5460_v56  ;;  %v5527_v35 = vrot.slane %v657_v24, %v5460_v56  ;;  %v5530_v47 = vrot.slane %v4531_v25, %v5460_v56 }
 0x2b4   :  { %v5533_v58 = vrot.slane %v1037_v32, %v5460_v56  ;;  %v5536_v59 = vrot.slane %v4538_v33, %v5460_v56  ;;  %v5539_v60 = vrot.slane %v673_v37, %v5460_v56  ;;  %v5542_v62 = vrot.slane %v4532_v38, %v5460_v56 }
 0x2b5   :  { %v621_v54 = vcombine.low %v597_v44, %v613_v48  ;;  %v622_v34 = vcombine.high %v597_v44, %v613_v48  ;;  %v637_v55 = vcombine.low %v604_v46, %v620_v50  ;;  %v638_v57 = vcombine.high %v604_v46, %v620_v50 }
 0x2b6   :  { %v689_v10 = vcombine.low %v5527_v35, %v5530_v47  ;;  %v5552_v12 = vrot.slane %v1001_v19, %v5465_v63  ;;  %v1053_v13 = vcombine.low %v5521_v51, %v5524_v53  ;;  %v705_v20 = vcombine.low %v5539_v60, %v5542_v62 }
 0x2b7   :  { %v629_v0 = vrot.slane %v621_v54, %v5465_v63  ;;  %v636_v1 = vrot.slane %v622_v34, %v5465_v63  ;;  %v645_v6 = vrot.slane %v637_v55, %v5465_v63  ;;  %v652_v7 = vrot.slane %v638_v57, %v5465_v63 }
 0x2b8   :  { %v1102_v8 = vpop.permute.xlu1 %1101  ;;  %v1096_v9 = vpop.permute.xlu0 %1095  ;;  %v1061_v24 = vrot.slane %v1053_v13, %v5465_v63  ;;  %v1069_v25 = vcombine.low %v5533_v58, %v5536_v59  ;;  %v1017_v48 = vcombine.low %v5510_v18, %v5552_v12  ;;  %v5586_v57 = vrot.slane %v689_v10, %v5465_v63 }
 0x2b9   :  { %v1113_v11 = vcombine.low %v5435_v41, %v1102_v8  ;;  %v725_v14 = vcombine.low %v629_v0, %v636_v1  ;;  %v4533_v15 = vcombine.high %v629_v0, %v636_v1  ;;  %v741_v16 = vcombine.low %v645_v6, %v652_v7 }
 0x2ba   :  { %v4534_v17 = vcombine.high %v645_v6, %v652_v7  ;;  %v1114_v21 = vcombine.high %v5435_v41, %v1102_v8  ;;  %v1077_v41 = vrot.slane %v1069_v25, %v5465_v63  ;;  %v5589_v0 = vrot.slane %v705_v20, %v5465_v63 }
 0x2bb   :  { %v5563_v19 = vrot.slane %v725_v14, %v5460_v56  ;;  %v5566_v26 = vrot.slane %v4533_v15, %v5460_v56  ;;  %v5569_v27 = vrot.slane %v741_v16, %v5460_v56  ;;  %v1121_v46 = vrot.slane %v1113_v11, %v5460_v56 }
 0x2bc   :  { %v5572_v28 = vrot.slane %v4534_v17, %v5460_v56  ;;  %v1098_v31 = vpop.permute.xlu1 %1097  ;;  %v1108_v32 = vpop.permute.xlu0 %1107  ;;  %v1128_v50 = vrot.slane %v1114_v21, %v5460_v56  ;;  %v1085_v54 = vcombine.low %v1061_v24, %v1077_v41 }
 0x2bd   :  { %v1129_v33 = vcombine.low %v1096_v9, %v1108_v32  ;;  %v1130_v37 = vcombine.high %v1096_v9, %v1108_v32  ;;  %v757_v38 = vcombine.low %v5563_v19, %v5566_v26  ;;  %v758_v32 = vcombine.high %v5563_v19, %v5566_v26 }
 0x2be   :  { %v773_v44 = vcombine.low %v5569_v27, %v5572_v28  ;;  %v1089_v8 = vpack.c.bf16 %v1085_v54, %v1017_v48 }
 0x2bf   :  { %v1137_v34 = vrot.slane %v1129_v33, %v5460_v56  ;;  %v1144_v55 = vrot.slane %v1130_v37, %v5460_v56  ;;  %v5592_v1 = vrot.slane %v757_v38, %v5465_v63  ;;  %v1018_v38 = vcombine.high %v5510_v18, %v5552_v12 }
 0x2c0   :  { %v5595_v6 = vrot.slane %v773_v44, %v5465_v63  ;;  %v1104_v7 = vpop.permute.xlu1 %1103  ;;  %v1394_v17 = vsel %vm1389_vm1, %v1089_v8, 0 }
 0x2c1   :  { %v1145_v9 = vcombine.low %v1121_v46, %v1137_v34  ;;  %v1146_v11 = vcombine.high %v1121_v46, %v1137_v34  ;;  %v1161_v13 = vcombine.low %v1128_v50, %v1144_v55  ;;  %v1162_v14 = vcombine.high %v1128_v50, %v1144_v55  ;;  %4795 = vmatpush3.bf16.xpose.msra.mxu1 %v1394_v17 }
 0x2c2   :  { %v1181_v15 = vcombine.low %v5443_v45, %v1104_v7  ;;  %v1182_v10 = vcombine.high %v5443_v45, %v1104_v7  ;;  %v789_v16 = vcombine.low %v5592_v1, %v5595_v6  ;;  %v721_v45 = vcombine.low %v5586_v57, %v5589_v0  ;;  %4800 = vmatprep.subr.bf16.mxu1 %v5154_v36 }
 0x2c3   :  { %v1153_v20 = vrot.slane %v1145_v9, %v5465_v63  ;;  %v1160_v21 = vrot.slane %v1146_v11, %v5465_v63  ;;  %v1169_v25 = vrot.slane %v1161_v13, %v5465_v63  ;;  %v1176_v33 = vrot.slane %v1162_v14, %v5465_v63 }
 0x2c4   :  { %v1110_v37 = vpop.permute.xlu1 %1109  ;;  %v1189_v34 = vrot.slane %v1181_v15, %v5460_v56  ;;  %v1196_v55 = vrot.slane %v1182_v10, %v5460_v56  ;;  %v1086_v7 = vcombine.high %v1061_v24, %v1077_v41  ;;  %v793_v13 = vpack.c.bf16 %v789_v16, %v721_v45 }
 0x2c5   :  { %v1249_v44 = vcombine.low %v1153_v20, %v1160_v21  ;;  %v4539_v46 = vcombine.high %v1153_v20, %v1160_v21  ;;  %v1197_v48 = vcombine.low %v1098_v31, %v1110_v37  ;;  %v1198_v50 = vcombine.high %v1098_v31, %v1110_v37 }
 0x2c6   :  { %v1265_v54 = vcombine.low %v1169_v25, %v1176_v33  ;;  %v4540_v8 = vcombine.high %v1169_v25, %v1176_v33  ;;  %v1090_v31 = vpack.c.bf16 %v1086_v7, %v1018_v38  ;;  %v722_v14 = vcombine.high %v5586_v57, %v5589_v0 }
 0x2c7   :  { %v1205_v9 = vrot.slane %v1197_v48, %v5460_v56  ;;  %v1212_v11 = vrot.slane %v1198_v50, %v5460_v56  ;;  %v5618_v18 = vrot.slane %v1249_v44, %v5460_v56  ;;  %v5621_v12 = vrot.slane %v4539_v46, %v5460_v56 }
 0x2c8   :  { %v1272_v41 = vrot.slane %v1265_v54, %v5460_v56  ;;  %v1441_v20 = vsel %vm1389_vm1, %v1090_v31, 0  ;;  %v986_v16 = vcombine.high %v5482_v40, %v5485_v42  ;;  %v1002_v21 = vcombine.high %v5490_v49, %v5497_v61  ;;  %4797 = vmatmul.mubr.msk.bf16.vlgmr.msra.gmra.mrb[4].mxu1 %vm1389_vm1, %v793_v13 }
 0x2c9   :  { %v1213_v15 = vcombine.low %v1189_v34, %v1205_v9  ;;  %v1214_v17 = vcombine.high %v1189_v34, %v1205_v9  ;;  %v1229_v10 = vcombine.low %v1196_v55, %v1212_v11  ;;  %v1230_v24 = vcombine.high %v1196_v55, %v1212_v11  ;;  %4801 = vmatpush3.bf16.xpose.msra.mxu1 %v1441_v20 }
 0x2ca   :  { %v1280_v37 = vrot.slane %v4540_v8, %v5460_v56  ;;  %4802 = vmatprep.mubr.msk.bf16.mxu1 %vm5155_vm0, %v5154_v36  ;;  %v790_v40 = vcombine.high %v5592_v1, %v5595_v6  ;;  %v1054_v42 = vcombine.high %v5521_v51, %v5524_v53  ;;  %4806 = vmatprep.subr.bf16.mxu1 %v5154_v36 }
 0x2cb   :  { %v1221_v25 = vrot.slane %v1213_v15, %v5465_v63  ;;  %v1228_v33 = vrot.slane %v1214_v17, %v5465_v63  ;;  %v1237_v57 = vrot.slane %v1229_v10, %v5465_v63  ;;  %v1244_v0 = vrot.slane %v1230_v24, %v5465_v63 }
 0x2cc   :  { %v1000_v44 = vrot.slane %v986_v16, %v5465_v63  ;;  %v1016_v46 = vrot.slane %v1002_v21, %v5465_v63  ;;  %v1068_v48 = vrot.slane %v1054_v42, %v5465_v63  ;;  %v1070_v50 = vcombine.high %v5533_v58, %v5536_v59 }
 0x2cd   :  { %v1317_v49 = vcombine.low %v1221_v25, %v1228_v33  ;;  %v4541_v61 = vcombine.high %v1221_v25, %v1228_v33  ;;  %v1333_v45 = vcombine.low %v1237_v57, %v1244_v0  ;;  %v4542_v38 = vcombine.high %v1237_v57, %v1244_v0 }
 0x2ce   :  { %v690_v54 = vcombine.high %v5527_v35, %v5530_v47  ;;  %v774_v34 = vcombine.high %v5569_v27, %v5572_v28  ;;  %v1084_v55 = vrot.slane %v1070_v50, %v5465_v63  ;;  %v794_v7 = vpack.c.bf16 %v790_v40, %v722_v14 }
 0x2cf   :  { %v1324_v1 = vrot.slane %v1317_v49, %v5460_v56  ;;  %v1332_v6 = vrot.slane %v4541_v61, %v5460_v56  ;;  %v1340_v51 = vrot.slane %v1333_v45, %v5460_v56  ;;  %v1348_v53 = vrot.slane %v4542_v38, %v5460_v56 }
 0x2d0   :  { %v1281_v58 = vcombine.low %v5618_v18, %v5621_v12  ;;  %v1297_v59 = vcombine.low %v1272_v41, %v1280_v37  ;;  %v706_v9 = vcombine.high %v5539_v60, %v5542_v62  ;;  %v1019_v11 = vcombine.low %v1000_v44, %v1016_v46  ;;  %4803 = vmatmul.mubr.msk.bf16.vlgmr.msra.gmra.mrb[8].mxu1 %vm1389_vm1, %v794_v7 }
 0x2d1   :  { %v1349_v8 = vcombine.low %v1324_v1, %v1332_v6  ;;  %v1087_v13 = vcombine.low %v1068_v48, %v1084_v55  ;;  %v1365_v31 = vcombine.low %v1340_v51, %v1348_v53  ;;  %v772_v35 = vrot.slane %v758_v32, %v5465_v63  ;;  %4808 = vmatprep.mubr.msk.bf16.mxu1 %vm5155_vm0, %v5154_v36 }
 0x2d2   :  { %v1289_v47 = vrot.slane %v1281_v58, %v5465_v63  ;;  %v1305_v27 = vrot.slane %v1297_v59, %v5465_v63  ;;  %v788_v14 = vrot.slane %v774_v34, %v5465_v63  ;;  %v1282_v62 = vcombine.high %v5618_v18, %v5621_v12 }
 0x2d3   :  { %v1357_v28 = vrot.slane %v1349_v8, %v5465_v63  ;;  %v1091_v15 = vpack.c.bf16 %v1087_v13, %v1019_v11  ;;  %v1373_v60 = vrot.slane %v1365_v31, %v5465_v63  ;;  %v704_v19 = vrot.slane %v690_v54, %v5465_v63 }
 0x2d4   :  { %v1314_v26 = vcombine.high %v1289_v47, %v1305_v27  ;;  %v1298_v32 = vcombine.high %v1272_v41, %v1280_v37  ;;  %v1350_v17 = vcombine.high %v1324_v1, %v1332_v6  ;;  %v720_v10 = vrot.slane %v706_v9, %v5465_v63 }
 0x2d5   :  { %v1488_v24 = vsel %vm1389_vm1, %v1091_v15, 0  ;;  %v1088_v20 = vcombine.high %v1068_v48, %v1084_v55  ;;  %v1382_v16 = vcombine.high %v1357_v28, %v1373_v60  ;;  %v1296_v21 = vrot.slane %v1282_v62, %v5465_v63 }
 0x2d6   :  { %4807 = vmatpush3.bf16.xpose.msra.mxu1 %v1488_v24  ;;  %v1312_v25 = vrot.slane %v1298_v32, %v5465_v63  ;;  %v1364_v33 = vrot.slane %v1350_v17, %v5465_v63  ;;  %v1366_v57 = vcombine.high %v1340_v51, %v1348_v53  ;;  %v791_v18 = vcombine.low %v772_v35, %v788_v14 }
 0x2d7   :  { %4812 = vmatprep.subr.bf16.mxu1 %v5154_v36  ;;  %v1020_v12 = vcombine.high %v1000_v44, %v1016_v46  ;;  %v5683_v41 = vpack.c.bf16 %v1382_v16, %v1314_v26  ;;  %v723_v42 = vcombine.low %v704_v19, %v720_v10  ;;  %v792_v44 = vcombine.high %v772_v35, %v788_v14 }
 0x2d8   :  { %v1315_v0 = vcombine.low %v1296_v21, %v1312_v25  ;;  %v1380_v37 = vrot.slane %v1366_v57, %v5465_v63  ;;  %v1316_v40 = vcombine.high %v1296_v21, %v1312_v25  ;;  %v1381_v46 = vcombine.low %v1357_v28, %v1373_v60 }
 0x2d9   :  { %v1092_v49 = vpack.c.bf16 %v1088_v20, %v1020_v12  ;;  %v795_v38 = vpack.c.bf16 %v791_v18, %v723_v42  ;;  %v724_v6 = vcombine.high %v704_v19, %v720_v10  ;;  %v1313_v51 = vcombine.low %v1289_v47, %v1305_v27 }
 0x2da   :  { %v1383_v61 = vcombine.low %v1364_v33, %v1380_v37  ;;  %v1384_v45 = vcombine.high %v1364_v33, %v1380_v37 }
 0x2db   :  { %v1535_v1 = vsel %vm1389_vm1, %v1092_v49, 0  ;;  %v796_v53 = vpack.c.bf16 %v792_v44, %v724_v6  ;;  %v1385_v54 = vpack.c.bf16 %v1381_v46, %v1313_v51 }
 0x2dc   :  { %v5686_v48 = vpack.c.bf16 %v1383_v61, %v1315_v0  ;;  %v5688_v50 = vpack.c.bf16 %v1384_v45, %v1316_v40 }
 0x2dd   :  { %4809 = vmatmul.mubr.msk.bf16.vlgmr.msra.gmra.mrb[12].mxu1 %vm1389_vm1, %v795_v38 }
 0x2de   :  { %4813 = vmatpush3.bf16.xpose.msra.mxu1 %v1535_v1  ;;  %4814 = vmatprep.mubr.msk.bf16.mxu1 %vm5155_vm0, %v5154_v36 }
 0x2df   :  { %4818 = vmatprep.subr.bf16.mxu1 %v5154_v36 }
 0x2e5   :  { %4815 = vmatmul.mubr.msk.bf16.vlgmr.msra.gmra.mrb[16].mxu1 %vm1389_vm1, %v796_v53 }
 0x2e6   :  { %4819 = vmatpush3.bf16.msra.mxu1 %v1385_v54  ;;  %4820 = vmatprep.mubr.msk.bf16.mxu1 %vm5155_vm0, %v5154_v36 }
 0x2e7   :  { %4824 = vmatprep.subr.bf16.mxu1 %v5154_v36 }
 0x39b   :  { %v1430_v34 = vpop.f32.mrb[4].mxu1 }
 0x39c   :  { %v4798_v55 = vpop.f32.mrb[5].mxu1  ;;  %v1579_v7 = vsel %vm1578_vm2, %v1430_v34, -inf }
 0x39d   :  { %1580 = vmax.xlane.f32.xlu0 %v1579_v7  ;;  %v1433_v58 = vpop.f32.mrb[6].mxu1 }
 0x39e   :  { %v4799_v59 = vpop.f32.mrb[7].mxu1  ;;  %v1582_v8 = vsel %vm1578_vm2, %v1433_v58, -inf }
 0x39f   :  { %1583 = vmax.xlane.f32.xlu1 %v1582_v8 }
 0x3a3   :  { %v1477_v9 = vpop.f32.mrb[8].mxu1 }
 0x3a4   :  { %v4804_v11 = vpop.f32.mrb[9].mxu1  ;;  %v1585_v13 = vsel %vm1578_vm2, %v1477_v9, -inf }
 0x3a5   :  { %1586 = vmax.xlane.f32.xlu0 %v1585_v13  ;;  %v1480_v31 = vpop.f32.mrb[10].mxu1 }
 0x3a6   :  { %v4805_v35 = vpop.f32.mrb[11].mxu1  ;;  %v1588_v47 = vsel %vm1578_vm2, %v1480_v31, -inf }
 0x3a9   :  { %1589 = vmax.xlane.f32.xlu0 %v1588_v47 }
 0x3b0   :  { %v1524_v27 = vpop.f32.mrb[12].mxu1  ;;  %2451 = vrot.lane.b32.xlu1 %v5396_v30, %s5152_s6 }
 0x3b1   :  { %v4810_v28 = vpop.f32.mrb[13].mxu1  ;;  %v1591_v14 = vsel %vm1578_vm2, %v1524_v27, -inf }
 0x3b2   :  { %1592 = vmax.xlane.f32.xlu0 %v1591_v14  ;;  %v1527_v15 = vpop.f32.mrb[14].mxu1 }
 0x3b3   :  { %v4811_v60 = vpop.f32.mrb[15].mxu1  ;;  %v1594_v17 = vsel %vm1578_vm2, %v1527_v15, -inf }
 0x3b4   :  { %2455 = vrot.lane.b32.xlu1 %v5390_v23, %s5151_s4 }
 0x3b8   :  { %v5708_v62 = vpop.f32.mrb[16].mxu1 }
 0x3b9   :  { %v4816_v19 = vpop.f32.mrb[17].mxu1  ;;  %v1597_v10 = vsel %vm1578_vm2, %v5708_v62, -inf }
 0x3ba   :  { %v5710_v26 = vpop.f32.mrb[18].mxu1 }
 0x3bb   :  { %v4817_v32 = vpop.f32.mrb[19].mxu1  ;;  %v1600_v24 = vsel %vm1578_vm2, %v5710_v26, -inf }
 0x3c8   :  { %2449 = vrot.lane.b32.xlu0 %v5390_v23, %s5152_s6 }
 0x3d8   :  { %1595 = vmax.xlane.f32.xlu1 %v1594_v17 }
 0x3e7   :  { %1598 = vmax.xlane.f32.xlu0 %v1597_v10 }
 0x3e9   :  { %2457 = vrot.lane.b32.xlu1 %v5396_v30, %s5151_s4 }
 0x3fd   :  { %2461 = vrot.lane.b32.xlu0 %v5390_v23, %s5153_s7 }
 0x401   :  { %2153 = vrot.lane.b32.xlu0 %v5388_v22, %s5152_s6 }
 0x405   :  { %2159 = vrot.lane.b32.xlu0 %v5388_v22, %s5151_s4 }
 0x40d   :  { %1601 = vmax.xlane.f32.xlu1 %v1600_v24 }
 0x41e   :  { %2463 = vrot.lane.b32.xlu1 %v5396_v30, %s5153_s7 }
 0x422   :  { %2155 = vrot.lane.b32.xlu1 %v5394_v29, %s5152_s6 }
 0x426   :  { %2161 = vrot.lane.b32.xlu1 %v5394_v29, %s5151_s4 }
 0x42a   :  { %v1581_v20 = vpop.xlane.xlu0 %1580 }
 0x42b   :  { %v1603_v16 = vsub.f32 %v1430_v34, %v1581_v20 }
 0x42c   :  { %v1584_v25 = vpop.xlane.xlu1 %1583 }
 0x42d   :  { %v1611_v21 = vmul.f32 1.442695, %v1603_v16  ;;  %v1604_v18 = vsub.f32 %v1433_v58, %v1584_v25 }
 0x42f   :  { %5031 = vpow2.f32 %v1611_v21  ;;  %v1613_v37 = vmul.f32 1.442695, %v1604_v18 }
 0x430   :  { %v5753_v7 = vpop.permute.xlu1 %2451 }
 0x432   :  { %v1587_v33 = vpop.xlane.xlu0 %1586 }
 0x433   :  { %v1605_v57 = vsub.f32 %v1477_v9, %v1587_v33 }
 0x434   :  { %v2456_v58 = vpop.permute.xlu1 %2455 }
 0x435   :  { %v1615_v12 = vmul.f32 1.442695, %v1605_v57  ;;  %v2467_v47 = vcombine.low %v5390_v23, %v2456_v58 }
 0x436   :  { %v1590_v0 = vpop.xlane.xlu0 %1589 }
 0x437   :  { %5033 = vpow2.f32 %v1615_v12  ;;  %v1606_v40 = vsub.f32 %v1480_v31, %v1590_v0  ;;  %v2475_v32 = vrot.slane %v2467_v47, %v5460_v56 }
 0x438   :  { %5035 = vpow2.f32 %v1613_v37 }
 0x439   :  { %v5733_v42 = vpop.eup %5031  ;;  %v1617_v61 = vmul.f32 1.442695, %v1606_v40 }
 0x43a   :  { %v1627_v49 = vsel %vm1578_vm2, %v5733_v42, 0.0 }
 0x43b   :  { %1628 = vadd.xlane.f32.xlu0 %v1627_v49  ;;  %5037 = vpow2.f32 %v1617_v61 }
 0x43f   :  { %v1593_v45 = vpop.xlane.xlu0 %1592 }
 0x440   :  { %v1607_v38 = vsub.f32 %v1524_v27, %v1593_v45  ;;  %v2468_v27 = vcombine.high %v5390_v23, %v2456_v58 }
 0x441   :  { %v5737_v44 = vpop.eup %5033 }
 0x442   :  { %v1619_v1 = vmul.f32 1.442695, %v1607_v38  ;;  %v1633_v46 = vsel %vm1578_vm2, %v5737_v44, 0.0  ;;  %v5741_v6 = vpop.eup %5035  ;;  %v2482_v17 = vrot.slane %v2468_v27, %v5460_v56 }
 0x443   :  { %1634 = vadd.xlane.f32.xlu0 %v1633_v46  ;;  %v1630_v51 = vsel %vm1578_vm2, %v5741_v6, 0.0  ;;  %v2450_v11 = vpop.permute.xlu0 %2449 }
 0x444   :  { %5039 = vpow2.f32 %v1619_v1 }
 0x445   :  { %v5745_v53 = vpop.eup %5037 }
 0x446   :  { %v1636_v55 = vsel %vm1578_vm2, %v5745_v53, 0.0 }
 0x44a   :  { %1631 = vadd.xlane.f32.xlu1 %v1630_v51 }
 0x44e   :  { %v5747_v54 = vpop.eup %5039  ;;  %1637 = vadd.xlane.f32.xlu1 %v1636_v55 }
 0x44f   :  { %v1639_v34 = vsel %vm1578_vm2, %v5747_v54, 0.0 }
 0x450   :  { %1640 = vadd.xlane.f32.xlu0 %v1639_v34 }
 0x465   :  { %v1596_v59 = vpop.xlane.xlu1 %1595 }
 0x466   :  { %v1608_v8 = vsub.f32 %v1527_v15, %v1596_v59 }
 0x468   :  { %v1621_v9 = vmul.f32 1.442695, %v1608_v8 }
 0x469   :  { %v2458_v47 = vpop.permute.xlu1 %2457 }
 0x46a   :  { %5041 = vpow2.f32 %v1621_v9 }
 0x474   :  { %v1599_v13 = vpop.xlane.xlu0 %1598  ;;  %v5756_v35 = vpop.eup %5041 }
 0x475   :  { %v1609_v31 = vsub.f32 %v5708_v62, %v1599_v13  ;;  %v1642_v14 = vsel %vm1578_vm2, %v5756_v35, 0.0 }
 0x476   :  { %1643 = vadd.xlane.f32.xlu0 %v1642_v14  ;;  %v2535_v14 = vcombine.low %v5396_v30, %v2458_v47 }
 0x477   :  { %v1623_v28 = vmul.f32 1.442695, %v1609_v31 }
 0x478   :  { %v2462_v60 = vpop.permute.xlu0 %2461 }
 0x479   :  { %5043 = vpow2.f32 %v1623_v28  ;;  %v2483_v15 = vcombine.low %v2450_v11, %v2462_v60  ;;  %v2484_v19 = vcombine.high %v2450_v11, %v2462_v60  ;;  %v2536_v60 = vcombine.high %v5396_v30, %v2458_v47 }
 0x47b   :  { %v2491_v62 = vrot.slane %v2483_v15, %v5460_v56  ;;  %v2498_v10 = vrot.slane %v2484_v19, %v5460_v56 }
 0x47d   :  { %v2499_v24 = vcombine.low %v2475_v32, %v2491_v62  ;;  %v2500_v20 = vcombine.high %v2475_v32, %v2491_v62  ;;  %v2515_v23 = vcombine.low %v2482_v17, %v2498_v10  ;;  %v2516_v16 = vcombine.high %v2482_v17, %v2498_v10 }
 0x47e   :  { %v2543_v62 = vrot.slane %v2535_v14, %v5460_v56  ;;  %v2550_v10 = vrot.slane %v2536_v60, %v5460_v56 }
 0x47f   :  { %v2507_v21 = vrot.slane %v2499_v24, %v5465_v63  ;;  %v2514_v25 = vrot.slane %v2500_v20, %v5465_v63  ;;  %v2523_v33 = vrot.slane %v2515_v23, %v5465_v63  ;;  %v2530_v57 = vrot.slane %v2516_v16, %v5465_v63 }
 0x481   :  { %v2603_v18 = vcombine.low %v2507_v21, %v2514_v25  ;;  %v4559_v12 = vcombine.high %v2507_v21, %v2514_v25  ;;  %v2619_v0 = vcombine.low %v2523_v33, %v2530_v57  ;;  %v4560_v37 = vcombine.high %v2523_v33, %v2530_v57 }
 0x483   :  { %v5770_v40 = vpop.eup %5043  ;;  %v2610_v49 = vrot.slane %v2603_v18, %v5460_v56  ;;  %v2618_v61 = vrot.slane %v4559_v12, %v5460_v56  ;;  %v2626_v45 = vrot.slane %v2619_v0, %v5460_v56  ;;  %v2634_v38 = vrot.slane %v4560_v37, %v5460_v56 }
 0x484   :  { %v1645_v1 = vsel %vm1578_vm2, %v5770_v40, 0.0 }
 0x485   :  { %1646 = vadd.xlane.f32.xlu0 %v1645_v1  ;;  %v2635_v46 = vcombine.low %v2610_v49, %v2618_v61  ;;  %v2651_v51 = vcombine.low %v2626_v45, %v2634_v38  ;;  %v2636_v34 = vcombine.high %v2610_v49, %v2618_v61  ;;  %v2652_v55 = vcombine.high %v2626_v45, %v2634_v38 }
 0x487   :  { %v2643_v58 = vrot.slane %v2635_v46, %v5465_v63  ;;  %v2659_v59 = vrot.slane %v2651_v51, %v5465_v63  ;;  %v2650_v8 = vrot.slane %v2636_v34, %v5465_v63  ;;  %v2666_v9 = vrot.slane %v2652_v55, %v5465_v63 }
 0x489   :  { %v2668_v11 = vcombine.high %v2643_v58, %v2659_v59  ;;  %v2669_v13 = vcombine.low %v2650_v8, %v2666_v9  ;;  %v2670_v31 = vcombine.high %v2650_v8, %v2666_v9 }
 0x49a   :  { %v1602_v27 = vpop.xlane.xlu1 %1601 }
 0x49b   :  { %2165 = vrot.lane.b32.xlu0 %v5388_v22, %s5153_s7  ;;  %v1610_v28 = vsub.f32 %v5710_v26, %v1602_v27 }
 0x49d   :  { %v1625_v15 = vmul.f32 1.442695, %v1610_v28  ;;  %v2667_v28 = vcombine.low %v2643_v58, %v2659_v59  ;;  %v2154_v58 = vpop.permute.xlu0 %2153 }
 0x49e   :  { %v2464_v19 = vpop.permute.xlu1 %2463 }
 0x49f   :  { %5045 = vpow2.f32 %v1625_v15  ;;  %v2551_v32 = vcombine.low %v5753_v7, %v2464_v19  ;;  %v2552_v17 = vcombine.high %v5753_v7, %v2464_v19 }
 0x4a1   :  { %v2559_v24 = vrot.slane %v2551_v32, %v5460_v56  ;;  %v2566_v20 = vrot.slane %v2552_v17, %v5460_v56 }
 0x4a2   :  { %v5819_v59 = vpop.permute.xlu1 %2155 }
 0x4a3   :  { %v2567_v26 = vcombine.low %v2543_v62, %v2559_v24  ;;  %v2568_v23 = vcombine.high %v2543_v62, %v2559_v24  ;;  %v2583_v16 = vcombine.low %v2550_v10, %v2566_v20  ;;  %v2584_v21 = vcombine.high %v2550_v10, %v2566_v20  ;;  %v2160_v20 = vpop.permute.xlu0 %2159 }
 0x4a5   :  { %v2575_v30 = vrot.slane %v2567_v26, %v5465_v63  ;;  %v2582_v25 = vrot.slane %v2568_v23, %v5465_v63  ;;  %v2591_v33 = vrot.slane %v2583_v16, %v5465_v63  ;;  %v2598_v7 = vrot.slane %v2584_v21, %v5465_v63 }
 0x4a6   :  { %v5821_v26 = vpop.permute.xlu1 %2161 }
 0x4a7   :  { %v2671_v57 = vcombine.low %v2575_v30, %v2582_v25  ;;  %v4561_v18 = vcombine.high %v2575_v30, %v2582_v25  ;;  %v2687_v12 = vcombine.low %v2591_v33, %v2598_v7  ;;  %v4562_v0 = vcombine.high %v2591_v33, %v2598_v7 }
 0x4a9   :  { %v5797_v37 = vpop.eup %5045  ;;  %v2678_v49 = vrot.slane %v2671_v57, %v5460_v56  ;;  %v2686_v61 = vrot.slane %v4561_v18, %v5460_v56  ;;  %v2694_v45 = vrot.slane %v2687_v12, %v5460_v56  ;;  %v2702_v38 = vrot.slane %v4562_v0, %v5460_v56 }
 0x4aa   :  { %v1648_v1 = vsel %vm1578_vm2, %v5797_v37, 0.0 }
 0x4ab   :  { %1649 = vadd.xlane.f32.xlu1 %v1648_v1  ;;  %v2703_v46 = vcombine.low %v2678_v49, %v2686_v61  ;;  %v2719_v51 = vcombine.low %v2694_v45, %v2702_v38  ;;  %v2704_v34 = vcombine.high %v2678_v49, %v2686_v61  ;;  %v2720_v55 = vcombine.high %v2694_v45, %v2702_v38 }
 0x4ad   :  { %v2711_v8 = vrot.slane %v2703_v46, %v5465_v63  ;;  %v2727_v9 = vrot.slane %v2719_v51, %v5465_v63  ;;  %v2718_v47 = vrot.slane %v2704_v34, %v5465_v63  ;;  %v2734_v27 = vrot.slane %v2720_v55, %v5465_v63 }
 0x4ae   :  { %v2171_v46 = vcombine.low %v5388_v22, %v2160_v20 }
 0x4af   :  { %v2735_v14 = vcombine.low %v2711_v8, %v2727_v9  ;;  %v2736_v60 = vcombine.high %v2711_v8, %v2727_v9  ;;  %v2737_v15 = vcombine.low %v2718_v47, %v2734_v27  ;;  %v2738_v19 = vcombine.high %v2718_v47, %v2734_v27 }
 0x4b0   :  { %v2179_v34 = vrot.slane %v2171_v46, %v5460_v56 }
 0x4b1   :  { %v2739_v32 = vpack.c.bf16 %v2735_v14, %v2667_v28  ;;  %v5809_v17 = vpack.c.bf16 %v2736_v60, %v2668_v11  ;;  %v5811_v62 = vpack.c.bf16 %v2737_v15, %v2669_v13  ;;  %v5813_v10 = vpack.c.bf16 %v2738_v19, %v2670_v31 }
 0x4b2   :  { %v2239_v15 = vcombine.low %v5394_v29, %v5821_v26  ;;  %v2240_v19 = vcombine.high %v5394_v29, %v5821_v26 }
 0x4b3   :  { %v3043_v24 = vsel %vm1389_vm1, %v2739_v32, 0 }
 0x4b4   :  { %4843 = vmatpush3.bf16.xpose.msra.mxu0 %v3043_v24 }
 0x4b5   :  { %4854 = vmatprep.subr.bf16.mxu0 %v5154_v36 }
 0x4bc   :  { %2167 = vrot.lane.b32.xlu1 %v5394_v29, %s5153_s7 }
 0x4c8   :  { %v1629_v11 = vpop.xlane.xlu0 %1628 }
 0x4c9   :  { %5047 = vrcp.f32 %v1629_v11 }
 0x4d0   :  { %v1635_v31 = vpop.xlane.xlu0 %1634 }
 0x4d3   :  { %v5048_v16 = vpop.eup %5047 }
 0x4d4   :  { %v1659_v30 = vmul.f32 %v5048_v16, %v5733_v42  ;;  %v2254_v16 = vrot.slane %v2240_v19, %v5460_v56 }
 0x4d7   :  { %v1632_v13 = vpop.xlane.xlu1 %1631 }
 0x4d8   :  { %5049 = vrcp.f32 %v1632_v13 }
 0x4db   :  { %v1638_v23 = vpop.xlane.xlu1 %1637 }
 0x4dc   :  { %5051 = vrcp.f32 %v1638_v23  ;;  %v2247_v23 = vrot.slane %v2239_v15, %v5460_v56 }
 0x4dd   :  { %5053 = vrcp.f32 %v1635_v31 }
 0x4e2   :  { %v5050_v21 = vpop.eup %5049 }
 0x4e3   :  { %v1660_v25 = vmul.f32 %v5050_v21, %v5741_v6 }
 0x4e5   :  { %v1667_v33 = vpack.c.bf16 %v1660_v25, %v1659_v30 }
 0x4e6   :  { %v5052_v7 = vpop.eup %5051 }
 0x4e7   :  { %4821 = vmatmul.mubr.msk.bf16.vlgmr.msra.gmra.mrb[20].mxu1 %vm1578_vm2, %v1667_v33  ;;  %v5054_v57 = vpop.eup %5053  ;;  %v1662_v18 = vmul.f32 %v5052_v7, %v5745_v53 }
 0x4e8   :  { %4825 = vmatpush3.bf16.msra.mxu1 %v5683_v41  ;;  %4826 = vmatprep.mubr.msk.bf16.mxu1 %vm5155_vm0, %v5154_v36  ;;  %v1661_v12 = vmul.f32 %v5054_v57, %v5737_v44  ;;  %v1641_v41 = vpop.xlane.xlu0 %1640 }
 0x4e9   :  { %4830 = vmatprep.subr.bf16.mxu1 %v5154_v36  ;;  %5055 = vrcp.f32 %v1641_v41 }
 0x4ea   :  { %v1668_v0 = vpack.c.bf16 %v1662_v18, %v1661_v12 }
 0x4ef   :  { %4827 = vmatmul.mubr.msk.bf16.vlgmr.msra.gmra.mrb[24].mxu1 %vm1578_vm2, %v1668_v0 }
 0x4f0   :  { %4831 = vmatpush3.bf16.msra.mxu1 %v5686_v48  ;;  %4832 = vmatprep.mubr.msk.bf16.mxu1 %vm5155_vm0, %v5154_v36 }
 0x4f1   :  { %4836 = vmatprep.subr.bf16.mxu1 %v5154_v36 }
 0x4f3   :  { %v5056_v6 = vpop.eup %5055 }
 0x4f4   :  { %v1663_v49 = vmul.f32 %v5056_v6, %v5747_v54  ;;  %v2172_v54 = vcombine.high %v5388_v22, %v2160_v20 }
 0x503   :  { %v1644_v42 = vpop.xlane.xlu0 %1643 }
 0x504   :  { %5057 = vrcp.f32 %v1644_v42 }
 0x50e   :  { %v5058_v53 = vpop.eup %5057 }
 0x50f   :  { %v1664_v44 = vmul.f32 %v5058_v53, %v5756_v35 }
 0x511   :  { %v1669_v61 = vpack.c.bf16 %v1664_v44, %v1663_v49 }
 0x512   :  { %v1647_v48 = vpop.xlane.xlu0 %1646 }
 0x513   :  { %4833 = vmatmul.mubr.msk.bf16.vlgmr.msra.gmra.mrb[28].mxu1 %vm1578_vm2, %v1669_v61  ;;  %5059 = vrcp.f32 %v1647_v48 }
 0x514   :  { %4837 = vmatpush3.bf16.msra.mxu1 %v5688_v50  ;;  %4838 = vmatprep.mubr.msk.bf16.mxu1 %vm5155_vm0, %v5154_v36  ;;  %v2186_v50 = vrot.slane %v2172_v54, %v5460_v56 }
 0x515   :  { %4848 = vmatprep.subr.bf16.mxu1 %v5154_v36 }
 0x516   :  { %v2166_v45 = vpop.permute.xlu0 %2165 }
 0x517   :  { %v2187_v38 = vcombine.low %v2154_v58, %v2166_v45  ;;  %v2188_v1 = vcombine.high %v2154_v58, %v2166_v45 }
 0x519   :  { %v2195_v35 = vrot.slane %v2187_v38, %v5460_v56  ;;  %v2202_v51 = vrot.slane %v2188_v1, %v5460_v56 }
 0x51b   :  { %v2203_v55 = vcombine.low %v2179_v34, %v2195_v35  ;;  %v2204_v8 = vcombine.high %v2179_v34, %v2195_v35  ;;  %v2219_v9 = vcombine.low %v2186_v50, %v2202_v51  ;;  %v2220_v47 = vcombine.high %v2186_v50, %v2202_v51 }
 0x51d   :  { %v2211_v27 = vrot.slane %v2203_v55, %v5465_v63  ;;  %v2218_v28 = vrot.slane %v2204_v8, %v5465_v63  ;;  %v2227_v14 = vrot.slane %v2219_v9, %v5465_v63  ;;  %v2234_v22 = vrot.slane %v2220_v47, %v5465_v63  ;;  %v5060_v7 = vpop.eup %5059 }
 0x51e   :  { %v1665_v49 = vmul.f32 %v5060_v7, %v5770_v40  ;;  %v3090_v40 = vsel %vm1389_vm1, %v5809_v17, 0 }
 0x51f   :  { %v2307_v32 = vcombine.low %v2211_v27, %v2218_v28  ;;  %v4555_v24 = vcombine.high %v2211_v27, %v2218_v28  ;;  %v2323_v58 = vcombine.low %v2227_v14, %v2234_v22  ;;  %v4556_v20 = vcombine.high %v2227_v14, %v2234_v22 }
 0x521   :  { %v2314_v25 = vrot.slane %v2307_v32, %v5460_v56  ;;  %v2322_v29 = vrot.slane %v4555_v24, %v5460_v56  ;;  %v2330_v26 = vrot.slane %v2323_v58, %v5460_v56  ;;  %v2338_v33 = vrot.slane %v4556_v20, %v5460_v56 }
 0x523   :  { %v2339_v44 = vcombine.low %v2314_v25, %v2322_v29  ;;  %v2355_v61 = vcombine.low %v2330_v26, %v2338_v33  ;;  %v2340_v22 = vcombine.high %v2314_v25, %v2322_v29  ;;  %v2356_v17 = vcombine.high %v2330_v26, %v2338_v33 }
 0x525   :  { %v2363_v55 = vrot.slane %v2355_v61, %v5465_v63 }
 0x538   :  { %v1650_v60 = vpop.xlane.xlu1 %1649 }
 0x539   :  { %5061 = vrcp.f32 %v1650_v60 }
 0x53c   :  { %v2168_v11 = vpop.permute.xlu1 %2167 }
 0x53d   :  { %v2255_v13 = vcombine.low %v5819_v59, %v2168_v11  ;;  %v2256_v31 = vcombine.high %v5819_v59, %v2168_v11 }
 0x53f   :  { %v2263_v21 = vrot.slane %v2255_v13, %v5460_v56  ;;  %v2270_v30 = vrot.slane %v2256_v31, %v5460_v56  ;;  %v2354_v13 = vrot.slane %v2340_v22, %v5465_v63  ;;  %v2370_v31 = vrot.slane %v2356_v17, %v5465_v63 }
 0x541   :  { %v2271_v57 = vcombine.low %v2247_v23, %v2263_v21  ;;  %v2272_v18 = vcombine.high %v2247_v23, %v2263_v21  ;;  %v2287_v59 = vcombine.low %v2254_v16, %v2270_v30  ;;  %v2288_v12 = vcombine.high %v2254_v16, %v2270_v30 }
 0x542   :  { %v3137_v23 = vsel %vm1389_vm1, %v5811_v62, 0  ;;  %v3184_v16 = vsel %vm1389_vm1, %v5813_v10, 0  ;;  %v2373_v25 = vcombine.low %v2354_v13, %v2370_v31  ;;  %v2374_v29 = vcombine.high %v2354_v13, %v2370_v31 }
 0x543   :  { %v5062_v0 = vpop.eup %5061  ;;  %v2279_v41 = vrot.slane %v2271_v57, %v5465_v63  ;;  %v2286_v42 = vrot.slane %v2272_v18, %v5465_v63  ;;  %v2295_v6 = vrot.slane %v2287_v59, %v5465_v63  ;;  %v2302_v53 = vrot.slane %v2288_v12, %v5465_v63 }
 0x544   :  { %v1666_v48 = vmul.f32 %v5062_v0, %v5797_v37  ;;  %v2347_v37 = vrot.slane %v2339_v44, %v5465_v63 }
 0x545   :  { %v2375_v45 = vcombine.low %v2279_v41, %v2286_v42  ;;  %v4557_v38 = vcombine.high %v2279_v41, %v2286_v42  ;;  %v2391_v1 = vcombine.low %v2295_v6, %v2302_v53  ;;  %v4558_v46 = vcombine.high %v2295_v6, %v2302_v53 }
 0x546   :  { %v1670_v54 = vpack.c.bf16 %v1666_v48, %v1665_v49  ;;  %v2371_v60 = vcombine.low %v2347_v37, %v2363_v55  ;;  %v2372_v19 = vcombine.high %v2347_v37, %v2363_v55 }
 0x547   :  { %v2382_v35 = vrot.slane %v2375_v45, %v5460_v56  ;;  %v2390_v51 = vrot.slane %v4557_v38, %v5460_v56  ;;  %v2398_v34 = vrot.slane %v2391_v1, %v5460_v56  ;;  %v2406_v50 = vrot.slane %v4558_v46, %v5460_v56 }
 0x548   :  { %4839 = vmatmul.mubr.msk.bf16.vlgmr.msra.gmra.mrb[32].mxu1 %vm1578_vm2, %v1670_v54 }
 0x549   :  { %v2407_v8 = vcombine.low %v2382_v35, %v2390_v51  ;;  %v2423_v9 = vcombine.low %v2398_v34, %v2406_v50  ;;  %4849 = vmatpush3.bf16.xpose.msra.mxu1 %v3090_v40  ;;  %4850 = vmatprep.mubr.msk.bf16.mxu1 %vm5155_vm0, %v5154_v36  ;;  %v2408_v47 = vcombine.high %v2382_v35, %v2390_v51 }
 0x54a   :  { %4860 = vmatprep.subr.bf16.mxu1 %v5154_v36  ;;  %v2424_v28 = vcombine.high %v2398_v34, %v2406_v50 }
 0x54b   :  { %v2415_v27 = vrot.slane %v2407_v8, %v5465_v63  ;;  %v2431_v14 = vrot.slane %v2423_v9, %v5465_v63  ;;  %v2422_v24 = vrot.slane %v2408_v47, %v5465_v63 }
 0x54c   :  { %v2438_v58 = vrot.slane %v2424_v28, %v5465_v63 }
 0x54d   :  { %v2439_v15 = vcombine.low %v2415_v27, %v2431_v14  ;;  %v2440_v32 = vcombine.high %v2415_v27, %v2431_v14 }
 0x54e   :  { %v2441_v21 = vcombine.low %v2422_v24, %v2438_v58  ;;  %v2442_v30 = vcombine.high %v2422_v24, %v2438_v58 }
 0x54f   :  { %v2443_v20 = vpack.c.bf16 %v2439_v15, %v2371_v60  ;;  %v2444_v11 = vpack.c.bf16 %v2440_v32, %v2372_v19 }
 0x550   :  { %v2445_v62 = vpack.c.bf16 %v2441_v21, %v2373_v25  ;;  %v2446_v26 = vpack.c.bf16 %v2442_v30, %v2374_v29 }
 0x551   :  { %4845 = vmatmul.mubr.msk.bf16.vlgmr.msra.gmra.mrb[8].mxu0 %vm1389_vm1, %v2443_v20  ;;  %4851 = vmatmul.mubr.msk.bf16.vlgmr.msra.gmra.mrb[36].mxu1 %vm1389_vm1, %v2444_v11 }
 0x552   :  { %4855 = vmatpush3.bf16.xpose.msra.mxu0 %v3137_v23  ;;  %4861 = vmatpush3.bf16.xpose.msra.mxu1 %v3184_v16 }
 0x553   :  { %4856 = vmatprep.mubr.msk.bf16.mxu0 %vm5155_vm0, %v5154_v36  ;;  %4862 = vmatprep.mubr.msk.bf16.mxu1 %vm5155_vm0, %v5154_v36 }
 0x554   :  { %4866 = vmatprep.subr.bf16.mxu0 %v5154_v36  ;;  %4872 = vmatprep.subr.bf16.mxu1 %v5154_v36 }
 0x559   :  { %4857 = vmatmul.mubr.msk.bf16.vlgmr.msra.gmra.mrb[12].mxu0 %vm1389_vm1, %v2445_v62  ;;  %4863 = vmatmul.mubr.msk.bf16.vlgmr.msra.gmra.mrb[40].mxu1 %vm1389_vm1, %v2446_v26 }
 0x55a   :  { %4868 = vmatprep.mubr.msk.bf16.mxu0 %vm5155_vm0, %v5154_v36  ;;  %4874 = vmatprep.mubr.msk.bf16.mxu1 %vm5155_vm0, %v5154_v36 }
 0x5ba   :  { %v1708_v10 = vpop.f32.mrb[20].mxu1 }
 0x5bb   :  { %v4822_v33 = vpop.f32.mrb[21].mxu1 }
 0x5bc   :  { %v1711_v7 = vpop.f32.mrb[22].mxu1 }
 0x5bd   :  { %v4823_v57 = vpop.f32.mrb[23].mxu1 }
 0x5c2   :  { %v1752_v18 = vpop.f32.mrb[24].mxu1 }
 0x5c3   :  { %v4828_v59 = vpop.f32.mrb[25].mxu1 }
 0x5c4   :  { %v1755_v12 = vpop.f32.mrb[26].mxu1 }
 0x5c5   :  { %v4829_v0 = vpop.f32.mrb[27].mxu1 }
 0x5e6   :  { %v1796_v41 = vpop.f32.mrb[28].mxu1 }
 0x5e7   :  { %v1847_v42 = vcombine.low %v1708_v10, %v1796_v41  ;;  %v1848_v6 = vcombine.high %v1708_v10, %v1796_v41  ;;  %v4834_v53 = vpop.f32.mrb[29].mxu1 }
 0x5e8   :  { %v1799_v49 = vpop.f32.mrb[30].mxu1 }
 0x5e9   :  { %v1915_v44 = vcombine.low %v1711_v7, %v1799_v49  ;;  %v1916_v61 = vcombine.high %v1711_v7, %v1799_v49  ;;  %v4835_v48 = vpop.f32.mrb[31].mxu1  ;;  %v1855_v54 = vrot.slane %v1847_v42, %v5460_v56  ;;  %v1862_v35 = vrot.slane %v1848_v6, %v5460_v56 }
 0x5eb   :  { %v1923_v28 = vrot.slane %v1915_v44, %v5460_v56  ;;  %v1930_v14 = vrot.slane %v1916_v61, %v5460_v56 }
 0x61b   :  { %v1840_v45 = vpop.f32.mrb[32].mxu1 }
 0x61c   :  { %v1863_v38 = vcombine.low %v1752_v18, %v1840_v45  ;;  %v1864_v1 = vcombine.high %v1752_v18, %v1840_v45  ;;  %v4840_v46 = vpop.f32.mrb[33].mxu1 }
 0x61d   :  { %v1843_v51 = vpop.f32.mrb[34].mxu1 }
 0x61e   :  { %v1871_v34 = vrot.slane %v1863_v38, %v5460_v56  ;;  %v1878_v50 = vrot.slane %v1864_v1, %v5460_v56  ;;  %v1931_v40 = vcombine.low %v1755_v12, %v1843_v51  ;;  %v1932_v37 = vcombine.high %v1755_v12, %v1843_v51  ;;  %v4841_v55 = vpop.f32.mrb[35].mxu1 }
 0x620   :  { %v1879_v8 = vcombine.low %v1855_v54, %v1871_v34  ;;  %v1880_v9 = vcombine.high %v1855_v54, %v1871_v34  ;;  %v1895_v47 = vcombine.low %v1862_v35, %v1878_v50  ;;  %v1896_v27 = vcombine.high %v1862_v35, %v1878_v50 }
 0x621   :  { %v1939_v22 = vrot.slane %v1931_v40, %v5460_v56  ;;  %v1946_v17 = vrot.slane %v1932_v37, %v5460_v56 }
 0x622   :  { %v1887_v60 = vrot.slane %v1879_v8, %v5465_v63  ;;  %v1894_v15 = vrot.slane %v1880_v9, %v5465_v63  ;;  %v1903_v19 = vrot.slane %v1895_v47, %v5465_v63  ;;  %v1910_v32 = vrot.slane %v1896_v27, %v5465_v63 }
 0x623   :  { %v1947_v24 = vcombine.low %v1923_v28, %v1939_v22  ;;  %v1948_v58 = vcombine.high %v1923_v28, %v1939_v22  ;;  %v1963_v20 = vcombine.low %v1930_v14, %v1946_v17  ;;  %v1964_v11 = vcombine.high %v1930_v14, %v1946_v17 }
 0x624   :  { %v1983_v13 = vcombine.low %v1887_v60, %v1894_v15  ;;  %v4551_v31 = vcombine.high %v1887_v60, %v1894_v15  ;;  %v1999_v23 = vcombine.low %v1903_v19, %v1910_v32  ;;  %v4552_v16 = vcombine.high %v1903_v19, %v1910_v32  ;;  %v5922_v21 = vpop.f32.mrb[8].mxu0  ;;  %v5924_v30 = vpop.f32.mrb[36].mxu1 }
 0x625   :  { %v1955_v25 = vrot.slane %v1947_v24, %v5465_v63  ;;  %v1962_v29 = vrot.slane %v1948_v58, %v5465_v63  ;;  %v1971_v62 = vrot.slane %v1963_v20, %v5465_v63  ;;  %v1978_v26 = vrot.slane %v1964_v11, %v5465_v63  ;;  %v4846_v10 = vpop.f32.mrb[9].mxu0  ;;  %v4852_v33 = vpop.f32.mrb[37].mxu1 }
 0x626   :  { %v1990_v7 = vrot.slane %v1983_v13, %v5460_v56  ;;  %v1998_v57 = vrot.slane %v4551_v31, %v5460_v56  ;;  %v2006_v18 = vrot.slane %v1999_v23, %v5460_v56  ;;  %v2014_v59 = vrot.slane %v4552_v16, %v5460_v56  ;;  %v5934_v12 = vpop.f32.mrb[38].mxu1  ;;  %v5936_v0 = vpop.f32.mrb[10].mxu0 }
 0x627   :  { %v2051_v41 = vcombine.low %v1955_v25, %v1962_v29  ;;  %v4553_v42 = vcombine.high %v1955_v25, %v1962_v29  ;;  %v2067_v6 = vcombine.low %v1971_v62, %v1978_v26  ;;  %v4554_v53 = vcombine.high %v1971_v62, %v1978_v26  ;;  %v4847_v49 = vpop.f32.mrb[11].mxu0  ;;  %v4853_v44 = vpop.f32.mrb[39].mxu1 }
 0x628   :  { %v3227_v61 = vsel %vm1578_vm2, %v5922_v21, -inf  ;;  %v3230_v48 = vsel %vm1578_vm2, %v5936_v0, -inf  ;;  %v3233_v45 = vsel %vm1578_vm2, %v5924_v30, -inf  ;;  %v2016_v35 = vcombine.high %v1990_v7, %v1998_v57 }
 0x629   :  { %v2058_v38 = vrot.slane %v2051_v41, %v5460_v56  ;;  %v2066_v1 = vrot.slane %v4553_v42, %v5460_v56  ;;  %v2074_v46 = vrot.slane %v2067_v6, %v5460_v56  ;;  %v2082_v54 = vrot.slane %v4554_v53, %v5460_v56  ;;  %3228 = vmax.xlane.f32.xlu0 %v3227_v61 }
 0x62a   :  { %3231 = vmax.xlane.f32.xlu1 %v3230_v48  ;;  %v2032_v51 = vcombine.high %v2006_v18, %v2014_v59  ;;  %v2015_v34 = vcombine.low %v1990_v7, %v1998_v57  ;;  %v2031_v50 = vcombine.low %v2006_v18, %v2014_v59  ;;  %v2030_v27 = vrot.slane %v2016_v35, %v5465_v63 }
 0x62b   :  { %v2084_v40 = vcombine.high %v2058_v38, %v2066_v1  ;;  %v2100_v37 = vcombine.high %v2074_v46, %v2082_v54  ;;  %v2083_v55 = vcombine.low %v2058_v38, %v2066_v1  ;;  %v2099_v8 = vcombine.low %v2074_v46, %v2082_v54 }
 0x62c   :  { %v3173_v9 = vpop.f32.mrb[12].mxu0  ;;  %v5948_v47 = vpop.f32.mrb[40].mxu1  ;;  %v2046_v28 = vrot.slane %v2032_v51, %v5465_v63  ;;  %v5953_v14 = vrot.slane %v2015_v34, %v5465_v63  ;;  %v5956_v22 = vrot.slane %v2031_v50, %v5465_v63  ;;  %v3236_v62 = vsel %vm1578_vm2, %v5934_v12, -inf }
 0x62d   :  { %3234 = vmax.xlane.f32.xlu0 %v3233_v45  ;;  %v4858_v17 = vpop.f32.mrb[13].mxu0  ;;  %v4864_v60 = vpop.f32.mrb[41].mxu1  ;;  %v2098_v15 = vrot.slane %v2084_v40, %v5465_v63  ;;  %v2114_v19 = vrot.slane %v2100_v37, %v5465_v63  ;;  %v5973_v26 = vrot.slane %v2083_v55, %v5465_v63  ;;  %v5976_v10 = vrot.slane %v2099_v8, %v5465_v63 }
 0x62e   :  { %v5960_v32 = vpop.f32.mrb[42].mxu1  ;;  %v5962_v24 = vpop.f32.mrb[14].mxu0  ;;  %v2049_v58 = vcombine.low %v2030_v27, %v2046_v28  ;;  %v2050_v20 = vcombine.high %v2030_v27, %v2046_v28  ;;  %v2047_v11 = vcombine.low %v5953_v14, %v5956_v22  ;;  %v2048_v13 = vcombine.high %v5953_v14, %v5956_v22  ;;  %v4975_v14 = vld [vmem:[%s6406_s9] sm:$0xff]   ;;  %v4976_v22 = vld [vmem:[%s6406_s9 + $0x8] sm:$0xff]  }
 0x62f   :  { %v4859_v31 = vpop.f32.mrb[15].mxu0  ;;  %v4865_v23 = vpop.f32.mrb[43].mxu1  ;;  %v3242_v16 = vsel %vm1578_vm2, %v5962_v24, -inf  ;;  %v2117_v25 = vcombine.low %v2098_v15, %v2114_v19  ;;  %v2118_v29 = vcombine.high %v2098_v15, %v2114_v19  ;;  %v2116_v57 = vcombine.high %v5973_v26, %v5976_v10 }
 0x630   :  { %3243 = vmax.xlane.f32.xlu1 %v3242_v16  ;;  %v2115_v18 = vcombine.low %v5973_v26, %v5976_v10  ;;  %v3239_v59 = vsel %vm1578_vm2, %v3173_v9, -inf  ;;  %v3245_v42 = vsel %vm1578_vm2, %v5948_v47, -inf }
 0x631   :  { %3237 = vmax.xlane.f32.xlu0 %v3236_v62  ;;  %v5978_v33 = vpack.i.bf16 %v2117_v25, %v2049_v58  ;;  %v5980_v7 = vpack.i.bf16 %v2118_v29, %v2050_v20  ;;  %v5987_v41 = vpack.i.bf16 %v2116_v57, %v2048_v13 }
 0x635   :  { %3240 = vmax.xlane.f32.xlu0 %v3239_v59 }
 0x639   :  { %3246 = vmax.xlane.f32.xlu0 %v3245_v42 }
 0x6b6   :  { %v3229_v6 = vpop.xlane.xlu0 %3228 }
 0x6b7   :  { %v3251_v53 = vsub.f32 %v5922_v21, %v3229_v6  ;;  %v3232_v49 = vpop.xlane.xlu1 %3231 }
 0x6b8   :  { %v3252_v44 = vsub.f32 %v5936_v0, %v3232_v49 }
 0x6b9   :  { %v3259_v61 = vmul.f32 1.442695, %v3251_v53 }
 0x6ba   :  { %v3261_v48 = vmul.f32 1.442695, %v3252_v44  ;;  %v3235_v21 = vpop.xlane.xlu0 %3234 }
 0x6bb   :  { %5063 = vpow2.f32 %v3259_v61  ;;  %v3253_v35 = vsub.f32 %v5924_v30, %v3235_v21  ;;  %v3248_v30 = vsel %vm1578_vm2, %v5960_v32, -inf }
 0x6bc   :  { %5065 = vpow2.f32 %v3261_v48 }
 0x6bd   :  { %v3263_v51 = vmul.f32 1.442695, %v3253_v35  ;;  %v3244_v20 = vpop.xlane.xlu1 %3243 }
 0x6be   :  { %v3238_v0 = vpop.xlane.xlu0 %3237  ;;  %v3256_v13 = vsub.f32 %v5962_v24, %v3244_v20 }
 0x6bf   :  { %5067 = vpow2.f32 %v3263_v51  ;;  %v3254_v60 = vsub.f32 %v5934_v12, %v3238_v0 }
 0x6c0   :  { %v3269_v31 = vmul.f32 1.442695, %v3256_v13 }
 0x6c1   :  { %v3265_v15 = vmul.f32 1.442695, %v3254_v60 }
 0x6c2   :  { %v3241_v54 = vpop.xlane.xlu0 %3240 }
 0x6c3   :  { %v3255_v34 = vsub.f32 %v3173_v9, %v3241_v54 }
 0x6c5   :  { %v5993_v45 = vpop.eup %5063  ;;  %v3267_v40 = vmul.f32 1.442695, %v3255_v34 }
 0x6c6   :  { %v5995_v38 = vpop.eup %5065  ;;  %v3275_v1 = vsel %vm1578_vm2, %v5993_v45, 0.0  ;;  %v3247_v50 = vpop.xlane.xlu0 %3246 }
 0x6c7   :  { %3276 = vadd.xlane.f32.xlu0 %v3275_v1  ;;  %v3278_v46 = vsel %vm1578_vm2, %v5995_v38, 0.0  ;;  %v3257_v37 = vsub.f32 %v5948_v47, %v3247_v50  ;;  %5069 = vpow2.f32 %v3267_v40 }
 0x6c8   :  { %3279 = vadd.xlane.f32.xlu1 %v3278_v46 }
 0x6c9   :  { %v3271_v55 = vmul.f32 1.442695, %v3257_v37  ;;  %v6011_v8 = vpop.eup %5067 }
 0x6ca   :  { %v3281_v27 = vsel %vm1578_vm2, %v6011_v8, 0.0 }
 0x6cb   :  { %5071 = vpow2.f32 %v3271_v55 }
 0x6cc   :  { %5073 = vpow2.f32 %v3265_v15 }
 0x6cd   :  { %5075 = vpow2.f32 %v3269_v31 }
 0x6d1   :  { %v6015_v28 = vpop.eup %5069 }
 0x6d2   :  { %v3287_v9 = vsel %vm1578_vm2, %v6015_v28, 0.0 }
 0x6d5   :  { %v6021_v17 = vpop.eup %5071 }
 0x6d6   :  { %v3293_v47 = vsel %vm1578_vm2, %v6021_v17, 0.0  ;;  %v6028_v19 = vpop.eup %5073 }
 0x6d7   :  { %v3284_v58 = vsel %vm1578_vm2, %v6028_v19, 0.0  ;;  %v6035_v23 = vpop.eup %5075 }
 0x6d8   :  { %v3290_v12 = vsel %vm1578_vm2, %v6035_v23, 0.0 }
 0x6d9   :  { %2747 = vrot.lane.b32.xlu1 %v5437_v43, %s5152_s6 }
 0x6dd   :  { %2745 = vrot.lane.b32.xlu0 %v5433_v39, %s5152_s6  ;;  %2751 = vrot.lane.b32.xlu1 %v5433_v39, %s5151_s4 }
 0x6e1   :  { %2757 = vrot.lane.b32.xlu0 %v5433_v39, %s5153_s7 }
 0x700   :  { %3282 = vadd.xlane.f32.xlu0 %v3281_v27 }
 0x701   :  { %3249 = vmax.xlane.f32.xlu1 %v3248_v30 }
 0x704   :  { %3288 = vadd.xlane.f32.xlu0 %v3287_v9 }
 0x708   :  { %3294 = vadd.xlane.f32.xlu0 %v3293_v47 }
 0x712   :  { %2753 = vrot.lane.b32.xlu1 %v5437_v43, %s5151_s4 }
 0x736   :  { %3285 = vadd.xlane.f32.xlu1 %v3284_v58 }
 0x747   :  { %2759 = vrot.lane.b32.xlu1 %v5437_v43, %s5153_s7 }
 0x754   :  { %v3277_v6 = vpop.xlane.xlu0 %3276 }
 0x755   :  { %v3280_v16 = vpop.xlane.xlu1 %3279 }
 0x758   :  { %v2746_v53 = vpop.permute.xlu0 %2745 }
 0x759   :  { %v2748_v25 = vpop.permute.xlu1 %2747 }
 0x75d   :  { %v2752_v29 = vpop.permute.xlu1 %2751 }
 0x75e   :  { %v2763_v49 = vcombine.low %v5433_v39, %v2752_v29  ;;  %v2764_v44 = vcombine.high %v5433_v39, %v2752_v29 }
 0x760   :  { %v2771_v61 = vrot.slane %v2763_v49, %v5460_v56  ;;  %v2778_v1 = vrot.slane %v2764_v44, %v5460_v56 }
 0x76b   :  { %3291 = vadd.xlane.f32.xlu1 %v3290_v12 }
 0x77c   :  { %4927 = vrot.lane.b32.xlu1 %v5978_v33, %s5151_s4  ;;  %v2758_v33 = vpop.permute.xlu0 %2757 }
 0x780   :  { %4932 = vrot.lane.b32.xlu1 %v5980_v7, %s5152_s6  ;;  %v2779_v7 = vcombine.low %v2746_v53, %v2758_v33 }
 0x782   :  { %v2787_v48 = vrot.slane %v2779_v7, %v5460_v56 }
 0x784   :  { %v2795_v21 = vcombine.low %v2771_v61, %v2787_v48  ;;  %v2796_v0 = vcombine.high %v2771_v61, %v2787_v48 }
 0x786   :  { %v2803_v34 = vrot.slane %v2795_v21, %v5465_v63 }
 0x78d   :  { %v3283_v13 = vpop.xlane.xlu0 %3282 }
 0x78e   :  { %v3250_v62 = vpop.xlane.xlu1 %3249 }
 0x78f   :  { %v3258_v24 = vsub.f32 %v5960_v32, %v3250_v62  ;;  %v2780_v32 = vcombine.high %v2746_v53, %v2758_v33 }
 0x791   :  { %v3273_v57 = vmul.f32 1.442695, %v3258_v24  ;;  %v2794_v46 = vrot.slane %v2780_v32, %v5460_v56 }
 0x792   :  { %v2754_v51 = vpop.permute.xlu1 %2753 }
 0x793   :  { %5077 = vpow2.f32 %v3273_v57  ;;  %v2811_v54 = vcombine.low %v2778_v1, %v2794_v46  ;;  %v2812_v35 = vcombine.high %v2778_v1, %v2794_v46  ;;  %v2831_v55 = vcombine.low %v5437_v43, %v2754_v51 }
 0x794   :  { %v2832_v27 = vcombine.high %v5437_v43, %v2754_v51  ;;  %5079 = vrcp.f32 %v3277_v6 }
 0x795   :  { %v2819_v39 = vrot.slane %v2811_v54, %v5465_v63  ;;  %v2826_v50 = vrot.slane %v2812_v35, %v5465_v63  ;;  %5081 = vrcp.f32 %v3280_v16  ;;  %v2839_v31 = vrot.slane %v2831_v55, %v5460_v56 }
 0x796   :  { %v2846_v12 = vrot.slane %v2832_v27, %v5460_v56 }
 0x797   :  { %v2915_v9 = vcombine.low %v2819_v39, %v2826_v50  ;;  %v4564_v47 = vcombine.high %v2819_v39, %v2826_v50 }
 0x799   :  { %v2922_v24 = vrot.slane %v2915_v9, %v5460_v56  ;;  %v2930_v57 = vrot.slane %v4564_v47, %v5460_v56 }
 0x79b   :  { %v2947_v32 = vcombine.low %v2922_v24, %v2930_v57 }
 0x79d   :  { %v6044_v59 = vpop.eup %5077  ;;  %v2955_v39 = vrot.slane %v2947_v32, %v5465_v63 }
 0x79e   :  { %v3296_v42 = vsel %vm1578_vm2, %v6044_v59, 0.0  ;;  %v5080_v21 = vpop.eup %5079 }
 0x79f   :  { %3297 = vadd.xlane.f32.xlu0 %v3296_v42 }
 0x7b5   :  { %4922 = vrot.lane.b32.xlu0 %v5987_v41, %s5153_s7  ;;  %v2810_v41 = vrot.slane %v2796_v0, %v5465_v63 }
 0x7b7   :  { %v2899_v37 = vcombine.low %v2803_v34, %v2810_v41  ;;  %v4563_v30 = vcombine.high %v2803_v34, %v2810_v41  ;;  %v5082_v34 = vpop.eup %5081 }
 0x7b9   :  { %v2906_v20 = vrot.slane %v2899_v37, %v5460_v56  ;;  %v2914_v43 = vrot.slane %v4563_v30, %v5460_v56 }
 0x7bb   :  { %v2931_v44 = vcombine.low %v2906_v20, %v2914_v43  ;;  %v2932_v50 = vcombine.high %v2906_v20, %v2914_v43 }
 0x7bd   :  { %v2939_v41 = vrot.slane %v2931_v44, %v5465_v63 }
 0x7bf   :  { %v2963_v20 = vcombine.low %v2939_v41, %v2955_v39 }
 0x7c3   :  { %v3286_v40 = vpop.xlane.xlu1 %3285 }
 0x7c4   :  { %5083 = vrcp.f32 %v3286_v40  ;;  %v2948_v40 = vcombine.high %v2922_v24, %v2930_v57  ;;  %v3308_v24 = vmul.f32 %v5082_v34, %v5995_v38 }
 0x7c5   :  { %5085 = vrcp.f32 %v3283_v13 }
 0x7c7   :  { %v2760_v60 = vpop.permute.xlu1 %2759 }
 0x7c8   :  { %v2847_v15 = vcombine.low %v2748_v25, %v2760_v60  ;;  %v2848_v58 = vcombine.high %v2748_v25, %v2760_v60 }
 0x7ca   :  { %v2855_v29 = vrot.slane %v2847_v15, %v5460_v56  ;;  %v2862_v62 = vrot.slane %v2848_v58, %v5460_v56 }
 0x7cc   :  { %v2863_v25 = vcombine.low %v2839_v31, %v2855_v29  ;;  %v2864_v16 = vcombine.high %v2839_v31, %v2855_v29  ;;  %v2879_v42 = vcombine.low %v2846_v12, %v2862_v62  ;;  %v2880_v6 = vcombine.high %v2846_v12, %v2862_v62 }
 0x7cd   :  { %v2946_v31 = vrot.slane %v2932_v50, %v5465_v63  ;;  %v2962_v12 = vrot.slane %v2948_v40, %v5465_v63  ;;  %v2964_v62 = vcombine.high %v2939_v41, %v2955_v39 }
 0x7ce   :  { %v2871_v53 = vrot.slane %v2863_v25, %v5465_v63  ;;  %v2878_v33 = vrot.slane %v2864_v16, %v5465_v63  ;;  %v2887_v49 = vrot.slane %v2879_v42, %v5465_v63  ;;  %v2894_v7 = vrot.slane %v2880_v6, %v5465_v63  ;;  %v5084_v9 = vpop.eup %5083 }
 0x7cf   :  { %v5086_v13 = vpop.eup %5085  ;;  %v3310_v57 = vmul.f32 %v5084_v9, %v6028_v19 }
 0x7d0   :  { %v2967_v61 = vcombine.low %v2871_v53, %v2878_v33  ;;  %v4565_v48 = vcombine.high %v2871_v53, %v2878_v33  ;;  %v2983_v1 = vcombine.low %v2887_v49, %v2894_v7  ;;  %v4566_v46 = vcombine.high %v2887_v49, %v2894_v7 }
 0x7d1   :  { %v3307_v53 = vmul.f32 %v5080_v21, %v5993_v45  ;;  %v3309_v33 = vmul.f32 %v5086_v13, %v6011_v8  ;;  %v2965_v49 = vcombine.low %v2946_v31, %v2962_v12  ;;  %v2966_v7 = vcombine.high %v2946_v31, %v2962_v12  ;;  %v3289_v45 = vpop.xlane.xlu0 %3288  ;;  %v4978_v31 = vld [vmem:[%s6406_s9 + $0x18] sm:$0xff]  }
 0x7d2   :  { %v2974_v0 = vrot.slane %v2967_v61, %v5460_v56  ;;  %v2982_v54 = vrot.slane %v4565_v48, %v5460_v56  ;;  %v2990_v35 = vrot.slane %v2983_v1, %v5460_v56  ;;  %v2998_v51 = vrot.slane %v4566_v46, %v5460_v56 }
 0x7d3   :  { %v3315_v44 = vpack.c.bf16 %v3308_v24, %v3307_v53  ;;  %v3316_v32 = vpack.c.bf16 %v3310_v57, %v3309_v33  ;;  %5087 = vrcp.f32 %v3289_v45  ;;  %v4980_v24 = vld [vmem:[%s6406_s9 + $0x28] sm:$0xff]  }
 0x7d4   :  { %v2999_v37 = vcombine.low %v2974_v0, %v2982_v54  ;;  %v3015_v55 = vcombine.low %v2990_v35, %v2998_v51  ;;  %v3000_v27 = vcombine.high %v2974_v0, %v2982_v54  ;;  %v3016_v30 = vcombine.high %v2990_v35, %v2998_v51 }
 0x7d5   :  { %v3295_v0 = vpop.xlane.xlu0 %3294 }
 0x7d6   :  { %v3007_v47 = vrot.slane %v2999_v37, %v5465_v63  ;;  %v3023_v60 = vrot.slane %v3015_v55, %v5465_v63  ;;  %v3014_v15 = vrot.slane %v3000_v27, %v5465_v63  ;;  %v3030_v58 = vrot.slane %v3016_v30, %v5465_v63 }
 0x7d8   :  { %v3031_v29 = vcombine.low %v3007_v47, %v3023_v60  ;;  %v3032_v43 = vcombine.high %v3007_v47, %v3023_v60  ;;  %v3033_v42 = vcombine.low %v3014_v15, %v3030_v58  ;;  %v3034_v6 = vcombine.high %v3014_v15, %v3030_v58 }
 0x7da   :  { %v3035_v25 = vpack.c.bf16 %v3031_v29, %v2963_v20  ;;  %v3036_v16 = vpack.c.bf16 %v3032_v43, %v2964_v62  ;;  %v3037_v38 = vpack.c.bf16 %v3033_v42, %v2965_v49  ;;  %v3038_v19 = vpack.c.bf16 %v3034_v6, %v2966_v7  ;;  %v4979_v43 = vld [vmem:[%s6406_s9 + $0x20] sm:$0xff]  }
 0x7dc   :  { %4867 = vmatpush3.bf16.msra.mxu0 %v3035_v25  ;;  %4873 = vmatpush3.bf16.msra.mxu1 %v3036_v16 }
 0x7dd   :  { %4878 = vmatprep.subr.bf16.mxu0 %v5154_v36  ;;  %4884 = vmatprep.subr.bf16.mxu1 %v5154_v36  ;;  %v5088_v61 = vpop.eup %5087 }
 0x7de   :  { %v3311_v1 = vmul.f32 %v5088_v61, %v6015_v28 }
 0x7df   :  { %4869 = vmatmul.mubr.msk.bf16.vlgmr.msra.gmra.mrb[16].mxu0 %vm1578_vm2, %v3315_v44  ;;  %4875 = vmatmul.mubr.msk.bf16.vlgmr.msra.gmra.mrb[44].mxu1 %vm1578_vm2, %v3316_v32 }
 0x7e0   :  { %4879 = vmatpush3.bf16.msra.mxu0 %v3037_v38  ;;  %4885 = vmatpush3.bf16.msra.mxu1 %v3038_v19 }
 0x7e1   :  { %4880 = vmatprep.mubr.msk.bf16.mxu0 %vm5155_vm0, %v5154_v36  ;;  %4886 = vmatprep.mubr.msk.bf16.mxu1 %vm5155_vm0, %v5154_v36 }
 0x7e2   :  { %4890 = vmatprep.subr.bf16.mxu0 %v4975_v14 }
 0x7f8   :  { %v3292_v8 = vpop.xlane.xlu1 %3291 }
 0x7f9   :  { %5089 = vrcp.f32 %v3292_v8 }
 0x7fa   :  { %5091 = vrcp.f32 %v3295_v0 }
 0x7fc   :  { %v4928_v54 = vpop.permute.xlu1 %4927 }
 0x7fd   :  { %v4930_v39 = vunpack.i.h.bf16 %v4928_v54  ;;  %v4929_v50 = vunpack.i.l.bf16 %v4928_v54 }
 0x800   :  { %v4933_v51 = vpop.permute.xlu1 %4932 }
 0x801   :  { %v4935_v40 = vunpack.i.h.bf16 %v4933_v51  ;;  %v4934_v28 = vunpack.i.l.bf16 %v4933_v51 }
 0x803   :  { %v5090_v48 = vpop.eup %5089 }
 0x804   :  { %v3312_v46 = vmul.f32 %v5090_v48, %v6035_v23  ;;  %v5092_v30 = vpop.eup %5091 }
 0x805   :  { %v3313_v26 = vmul.f32 %v5092_v30, %v6021_v17 }
 0x806   :  { %v3317_v21 = vpack.c.bf16 %v3312_v46, %v3311_v1 }
 0x808   :  { %4881 = vmatmul.mubr.msk.bf16.vlgmr.msra.gmra.mrb[20].mxu0 %vm1578_vm2, %v3317_v21 }
 0x809   :  { %4891 = vmatpush3.bf16.msra.mxu0 %v4975_v14 }
 0x80a   :  { %4892 = vmatprep.subr.bf16.mxu0 %v4976_v22 }
 0x80d   :  { %4893 = vmatpush3.bf16.msra.mxu0 %v4976_v22 }
 0x82c   :  { %v3298_v35 = vpop.xlane.xlu0 %3297 }
 0x82d   :  { %5093 = vrcp.f32 %v3298_v35 }
 0x830   :  { %v4923_v36 = vpop.permute.xlu0 %4922 }
 0x831   :  { %v4925_v34 = vunpack.i.h.bf16 %v4923_v36  ;;  %v4924_v41 = vunpack.i.l.bf16 %v4923_v36 }
 0x833   :  { %v2144_v23 = vsel %vm1389_vm1, %v2115_v18, %v4925_v34  ;;  %v2143_v37 = vsel %vm1389_vm1, %v2047_v11, %v4924_v41  ;;  %v4977_v11 = vld [vmem:[%s6406_s9 + $0x10] sm:$0xff]  }
 0x834   :  { %v2146_v55 = vsel %vm2145_vm3, %v2143_v37, %v4929_v50  ;;  %v2147_v27 = vsel %vm2145_vm3, %v2144_v23, %v4930_v39  ;;  %4894 = vmatprep.subr.bf16.mxu0 %v4977_v11 }
 0x835   :  { %v2149_v9 = vsel %vm2148_vm4, %v2146_v55, %v4934_v28  ;;  %v2150_v47 = vsel %vm2148_vm4, %v2147_v27, %v4935_v40  ;;  %4895 = vmatpush3.bf16.msra.mxu0 %v4977_v11 }
 0x836   :  { %v3797_v60 = vpack.c.bf16 %v2150_v47, %v2149_v9  ;;  %4896 = vmatprep.subr.bf16.mxu0 %v4978_v31 }
 0x837   :  { %v5094_v15 = vpop.eup %5093 }
 0x838   :  { %v3314_v10 = vmul.f32 %v5094_v15, %v6044_v59  ;;  %4906 = vmatprep.mubr.bf16.mxu0 %v3797_v60 }
 0x839   :  { %4897 = vmatpush3.bf16.msra.mxu0 %v4978_v31 }
 0x83a   :  { %v3318_v18 = vpack.c.bf16 %v3314_v10, %v3313_v26  ;;  %4898 = vmatprep.subr.bf16.mxu0 %v4979_v43 }
 0x83c   :  { %4887 = vmatmul.mubr.msk.bf16.vlgmr.msra.gmra.mrb[48].mxu1 %vm1578_vm2, %v3318_v18 }
 0x83d   :  { %4899 = vmatpush3.bf16.msra.mxu0 %v4979_v43 }
 0x83e   :  { %4900 = vmatprep.subr.bf16.mxu0 %v4980_v24 }
 0x841   :  { %4901 = vmatpush3.bf16.msra.mxu0 %v4980_v24  ;;  %v4981_v24 = vld [vmem:[%s6406_s9 + $0x30] sm:$0xff]  }
 0x842   :  { %4902 = vmatprep.subr.bf16.mxu0 %v4981_v24 }
 0x845   :  { %4903 = vmatpush3.bf16.msra.mxu0 %v4981_v24 }
 0x8b2   :  { %v3356_v17 = vpop.f32.mrb[16].mxu0  ;;  %v3400_v59 = vpop.f32.mrb[44].mxu1 }
 0x8b3   :  { %v4870_v58 = vpop.f32.mrb[17].mxu0  ;;  %v4876_v13 = vpop.f32.mrb[45].mxu1 }
 0x8b4   :  { %v3359_v12 = vpop.f32.mrb[18].mxu0  ;;  %v3403_v20 = vpop.f32.mrb[46].mxu1 }
 0x8b5   :  { %v4871_v29 = vpop.f32.mrb[19].mxu0  ;;  %v4877_v62 = vpop.f32.mrb[47].mxu1 }
 0x8db   :  { %v3444_v57 = vpop.f32.mrb[20].mxu0 }
 0x8dc   :  { %v3495_v25 = vcombine.low %v3356_v17, %v3444_v57  ;;  %v3496_v16 = vcombine.high %v3356_v17, %v3444_v57  ;;  %v4882_v42 = vpop.f32.mrb[21].mxu0 }
 0x8dd   :  { %v3447_v6 = vpop.f32.mrb[22].mxu0 }
 0x8de   :  { %v3563_v53 = vcombine.low %v3359_v12, %v3447_v6  ;;  %v3564_v33 = vcombine.high %v3359_v12, %v3447_v6  ;;  %v4883_v49 = vpop.f32.mrb[23].mxu0  ;;  %v3503_v19 = vrot.slane %v3495_v25, %v5460_v56  ;;  %v3510_v45 = vrot.slane %v3496_v16, %v5460_v56 }
 0x8e0   :  { %v3571_v36 = vrot.slane %v3563_v53, %v5460_v56  ;;  %v3578_v34 = vrot.slane %v3564_v33, %v5460_v56 }
 0x90f   :  { %v3488_v7 = vpop.f32.mrb[48].mxu1 }
 0x910   :  { %v3511_v44 = vcombine.low %v3400_v59, %v3488_v7  ;;  %v3512_v32 = vcombine.high %v3400_v59, %v3488_v7  ;;  %v4888_v38 = vpop.f32.mrb[49].mxu1 }
 0x911   :  { %v3491_v8 = vpop.f32.mrb[50].mxu1 }
 0x912   :  { %v3519_v61 = vrot.slane %v3511_v44, %v5460_v56  ;;  %v3526_v48 = vrot.slane %v3512_v32, %v5460_v56  ;;  %v3579_v1 = vcombine.low %v3403_v20, %v3491_v8  ;;  %v3580_v46 = vcombine.high %v3403_v20, %v3491_v8  ;;  %v4889_v21 = vpop.f32.mrb[51].mxu1 }
 0x913   :  { %v4982_v21 = vld [vmem:[%s6406_s9 + $0x38] sm:$0xff]  }
 0x914   :  { %v3527_v0 = vcombine.low %v3503_v19, %v3519_v61  ;;  %v3528_v54 = vcombine.high %v3503_v19, %v3519_v61  ;;  %v3543_v35 = vcombine.low %v3510_v45, %v3526_v48  ;;  %v3544_v51 = vcombine.high %v3510_v45, %v3526_v48  ;;  %4904 = vmatprep.subr.bf16.mxu0 %v4982_v21 }
 0x915   :  { %v3587_v41 = vrot.slane %v3579_v1, %v5460_v56  ;;  %v3594_v39 = vrot.slane %v3580_v46, %v5460_v56  ;;  %4905 = vmatpush3.bf16.msra.mxu0 %v4982_v21  ;;  %v4995_v21 = vld [vmem:[%s6410_s13 + $0x40] ss:$8 sps:$4 sm:$0xff]  }
 0x916   :  { %v3535_v50 = vrot.slane %v3527_v0, %v5465_v63  ;;  %v3542_v40 = vrot.slane %v3528_v54, %v5465_v63  ;;  %v3551_v28 = vrot.slane %v3543_v35, %v5465_v63  ;;  %v3558_v23 = vrot.slane %v3544_v51, %v5465_v63 }
 0x917   :  { %v3595_v37 = vcombine.low %v3571_v36, %v3587_v41  ;;  %v3596_v55 = vcombine.high %v3571_v36, %v3587_v41  ;;  %v3611_v27 = vcombine.low %v3578_v34, %v3594_v39  ;;  %v3612_v30 = vcombine.high %v3578_v34, %v3594_v39 }
 0x918   :  { %v3631_v9 = vcombine.low %v3535_v50, %v3542_v40  ;;  %v4575_v47 = vcombine.high %v3535_v50, %v3542_v40  ;;  %v3647_v60 = vcombine.low %v3551_v28, %v3558_v23  ;;  %v4576_v15 = vcombine.high %v3551_v28, %v3558_v23 }
 0x919   :  { %v3603_v26 = vrot.slane %v3595_v37, %v5465_v63  ;;  %v3610_v10 = vrot.slane %v3596_v55, %v5465_v63  ;;  %v3619_v18 = vrot.slane %v3611_v27, %v5465_v63  ;;  %v3626_v14 = vrot.slane %v3612_v30, %v5465_v63 }
 0x91a   :  { %v3638_v22 = vrot.slane %v3631_v9, %v5460_v56  ;;  %v3646_v11 = vrot.slane %v4575_v47, %v5460_v56  ;;  %v3654_v17 = vrot.slane %v3647_v60, %v5460_v56  ;;  %v3662_v59 = vrot.slane %v4576_v15, %v5460_v56 }
 0x91b   :  { %v3699_v58 = vcombine.low %v3603_v26, %v3610_v10  ;;  %v4577_v13 = vcombine.high %v3603_v26, %v3610_v10  ;;  %v3715_v31 = vcombine.low %v3619_v18, %v3626_v14  ;;  %v4578_v12 = vcombine.high %v3619_v18, %v3626_v14  ;;  %v4579_v18 = vld [vmem:[%s6407_s10] ss:$0 sm:$0xff] }
 0x91c   :  { %v3664_v20 = vcombine.high %v3638_v22, %v3646_v11  ;;  %v3680_v29 = vcombine.high %v3654_v17, %v3662_v59  ;;  %v3663_v62 = vcombine.low %v3638_v22, %v3646_v11  ;;  %v3679_v43 = vcombine.low %v3654_v17, %v3662_v59 }
 0x91d   :  { %v3706_v57 = vrot.slane %v3699_v58, %v5460_v56  ;;  %v3714_v25 = vrot.slane %v4577_v13, %v5460_v56  ;;  %v3722_v16 = vrot.slane %v3715_v31, %v5460_v56  ;;  %v3730_v42 = vrot.slane %v4578_v12, %v5460_v56 }
 0x91e   :  { %v3678_v6 = vrot.slane %v3664_v20, %v5465_v63  ;;  %v3694_v53 = vrot.slane %v3680_v29, %v5465_v63  ;;  %v3671_v33 = vrot.slane %v3663_v62, %v5465_v63  ;;  %v3687_v49 = vrot.slane %v3679_v43, %v5465_v63 }
 0x91f   :  { %v3732_v7 = vcombine.high %v3706_v57, %v3714_v25  ;;  %v3748_v44 = vcombine.high %v3722_v16, %v3730_v42  ;;  %v3731_v32 = vcombine.low %v3706_v57, %v3714_v25  ;;  %v3747_v38 = vcombine.low %v3722_v16, %v3730_v42 }
 0x920   :  { %v3697_v19 = vcombine.low %v3678_v6, %v3694_v53  ;;  %v3695_v45 = vcombine.low %v3671_v33, %v3687_v49  ;;  %v3696_v8 = vcombine.high %v3671_v33, %v3687_v49  ;;  %v3698_v61 = vcombine.high %v3678_v6, %v3694_v53 }
 0x921   :  { %v3746_v56 = vrot.slane %v3732_v7, %v5465_v63  ;;  %v3762_v48 = vrot.slane %v3748_v44, %v5465_v63  ;;  %v3739_v1 = vrot.slane %v3731_v32, %v5465_v63  ;;  %v3755_v46 = vrot.slane %v3747_v38, %v5465_v63 }
 0x923   :  { %v3765_v0 = vcombine.low %v3746_v56, %v3762_v48  ;;  %v3764_v54 = vcombine.high %v3739_v1, %v3755_v46  ;;  %v3763_v35 = vcombine.low %v3739_v1, %v3755_v46  ;;  %v3766_v51 = vcombine.high %v3746_v56, %v3762_v48  ;;  %v4994_v56 = vld [vmem:[%s6410_s13 + $0x34] ss:$8 sps:$4 sm:$0xff]   ;;  %v4992_v48 = vld [vmem:[%s6410_s13 + $0x30] ss:$8 sps:$4 sm:$0xff]   ;;  %v4997_v1 = vld [vmem:[%s6410_s13 + $0x44] ss:$8 sps:$4 sm:$0xff]  }
 0x924   :  { %v5158_v46 = vmov 0  }
 0x925   :  { %v4941_v36 = vpack.i.bf16 %v3765_v0, %v3697_v19  ;;  %v4936_v34 = vpack.i.bf16 %v3764_v54, %v3696_v8  ;;  %v4946_v41 = vpack.i.bf16 %v3766_v51, %v3698_v61  ;;  %v4989_v8 = vld [vmem:[%s6410_s13 + $0x20] ss:$8 sps:$4 sm:$0xff]   ;;  %v4991_v61 = vld [vmem:[%s6410_s13 + $0x24] ss:$8 sps:$4 sm:$0xff]   ;;  %4131 = vmatprep.mubr.bf16.mxu1 %v5158_v46  ;;  %v5000_v0 = vld [vmem:[%s6410_s13 + $0x54] ss:$8 sps:$4 sm:$0xff]  }
 0x926   :  { %v4998_v54 = vld [vmem:[%s6410_s13 + $0x50] ss:$8 sps:$4 sm:$0xff]   ;;  %v5001_v51 = vld [vmem:[%s6410_s13 + $0x60] ss:$8 sps:$4 sm:$0xff]  }
 0x927   :  { %4942 = vrot.lane.b32.xlu0 %v4941_v36, %s5151_s4  ;;  %4937 = vrot.lane.b32.xlu1 %v4936_v34, %s5153_s7  ;;  %v5006_v36 = vld [vmem:[%s6410_s13 + $0x74] ss:$8 sps:$4 sm:$0xff]   ;;  %v5004_v34 = vld [vmem:[%s6410_s13 + $0x70] ss:$8 sps:$4 sm:$0xff]  }
 0x92b   :  { %4947 = vrot.lane.b32.xlu1 %v4946_v41, %s5152_s6 }
 0x999   :  { %v4943_v63 = vpop.permute.xlu0 %4942  ;;  %v4938_v39 = vpop.permute.xlu1 %4937 }
 0x99a   :  { %v4940_v50 = vunpack.i.h.bf16 %v4938_v39  ;;  %v4939_v40 = vunpack.i.l.bf16 %v4938_v39  ;;  %v4945_v28 = vunpack.i.h.bf16 %v4943_v63  ;;  %v4944_v23 = vunpack.i.l.bf16 %v4943_v63 }
 0x99c   :  { %v3791_v37 = vsel %vm1389_vm1, %v3695_v45, %v4939_v40  ;;  %v3792_v55 = vsel %vm1389_vm1, %v3763_v35, %v4940_v50  ;;  %v5003_v35 = vld [vmem:[%s6410_s13 + $0x64] ss:$8 sps:$4 sm:$0xff]  }
 0x99d   :  { %v4948_v27 = vpop.permute.xlu1 %4947  ;;  %v3793_v47 = vsel %vm2145_vm3, %v3791_v37, %v4944_v23  ;;  %v3794_v60 = vsel %vm2145_vm3, %v3792_v55, %v4945_v28 }
 0x99e   :  { %v4950_v30 = vunpack.i.h.bf16 %v4948_v27  ;;  %v4949_v9 = vunpack.i.l.bf16 %v4948_v27 }
 0x9a0   :  { %v3795_v15 = vsel %vm2148_vm4, %v3793_v47, %v4949_v9  ;;  %v3796_v26 = vsel %vm2148_vm4, %v3794_v60, %v4950_v30  ;;  %v4588_v60 = vld [vmem:[%s6408_s11] ss:$0 sm:$0xff] }
 0x9a1   :  { %v3798_v10 = vpack.c.bf16 %v3796_v26, %v3795_v15 }
 0x9a3   :  { %4907 = vmatmul.mubr.bf16.vlgmr.msra.gmra.mrb[24].mxu0 %v3798_v10 }
 0xa76   :  { %v4908_v14 = vpop.f32.mrb[24].mxu0 }
 0xa77   :  { %v3904_v22 = vpop.f32.mrb[25].mxu0  ;;  %v3913_v58 = vadd.f32 %v4908_v14, %v4579_v18 }
 0xa78   :  { %v3905_v11 = vadd.f32 %v4579_v18, %v3904_v22  ;;  %v4909_v17 = vpop.f32.mrb[26].mxu0  ;;  %v4589_v22 = vld [vmem:[%s6409_s12] ss:$0 sm:$0xff] }
 0xa79   :  { %v3907_v59 = vpop.f32.mrb[27].mxu0  ;;  %v6192_v20 = vadd.f32 %v5270_v3, %v3913_v58  ;;  %v3916_v29 = vadd.f32 %v4909_v17, %v4579_v18  ;;  %v4988_v3 = vld [vmem:[%s6410_s13 + $0x14] ss:$8 sps:$4 sm:$0xff]  }
 0xa7a   :  { %v6185_v13 = vadd.f32 %v5268_v2, %v3905_v11  ;;  %v3908_v31 = vadd.f32 %v4579_v18, %v3907_v59  ;;  %v4983_v2 = vld [vmem:[%s6410_s13] ss:$8 sps:$4 sm:$0xff]  }
 0xa7b   :  { %v6197_v62 = vadd.f32 %v5276_v5, %v3916_v29  ;;  %v4986_v5 = vld [vmem:[%s6410_s13 + $0x10] ss:$8 sps:$4 sm:$0xff]  }
 0xa7c   :  { %v6188_v12 = vadd.f32 %v5274_v4, %v3908_v31  ;;  %3925 = vadd.xlane.f32.xlu0 %v6185_v13  ;;  %v4985_v4 = vld [vmem:[%s6410_s13 + $0x4] ss:$8 sps:$4 sm:$0xff]  }
 0xa7d   :  { %4099 = vmatprep.subr.bf16.mxu1 %v4985_v4 }
 0xa7e   :  { %3927 = vadd.xlane.f32.xlu1 %v6188_v12  ;;  %4100 = vmatpush1.bf16.msra.mxu1 %v4983_v2 }
 0xa7f   :  { %4101 = vmatprep.subr.bf16.mxu1 %v4988_v3 }
 0xa80   :  { %3929 = vadd.xlane.f32.xlu0 %v6192_v20 }
 0xa82   :  { %4102 = vmatpush1.bf16.msra.mxu1 %v4986_v5 }
 0xa83   :  { %4103 = vmatprep.subr.bf16.mxu1 %v4991_v61  ;;  %v5022_v61 = vld [vmem:[%s6412_s15 + $0x38] sm:$0xff]  }
 0xa84   :  { %3931 = vadd.xlane.f32.xlu0 %v6197_v62 }
 0xa86   :  { %4104 = vmatpush1.bf16.msra.mxu1 %v4989_v8  ;;  %v5021_v8 = vld [vmem:[%s6412_s15 + $0x78] sm:$0xff]  }
 0xa87   :  { %4105 = vmatprep.subr.bf16.mxu1 %v4994_v56  ;;  %v4011_v56 = vsub.s32 0, %v5457_v52 }
 0xa8a   :  { %4106 = vmatpush1.bf16.msra.mxu1 %v4992_v48  ;;  %v4007_v48 = vld [vmem:[%s6411_s14] sm:$0x3] }
 0xa8b   :  { %4107 = vmatprep.subr.bf16.mxu1 %v4997_v1  ;;  %v4015_v1 = vsub.s32 1, %v5457_v52 }
 0xa8e   :  { %4108 = vmatpush1.bf16.msra.mxu1 %v4995_v21  ;;  %v4016_v21 = vrot.slane %v4007_v48, %v4015_v1 }
 0xa8f   :  { %4109 = vmatprep.subr.bf16.mxu1 %v5000_v0 }
 0xa92   :  { %4110 = vmatpush1.bf16.msra.mxu1 %v4998_v54 }
 0xa93   :  { %4111 = vmatprep.subr.bf16.mxu1 %v5003_v35 }
 0xa96   :  { %4112 = vmatpush1.bf16.msra.mxu1 %v5001_v51 }
 0xa97   :  { %4113 = vmatprep.subr.bf16.mxu1 %v5006_v36 }
 0xa9a   :  { %4114 = vmatpush1.bf16.msra.mxu1 %v5004_v34 }
 0xb09   :  { %v3926_v43 = vpop.xlane.xlu0 %3925 }
 0xb0a   :  { %v3933_v24 = vmul.f32 0.0078125, %v3926_v43 }
 0xb0b   :  { %v3928_v57 = vpop.xlane.xlu1 %3927 }
 0xb0c   :  { %v3937_v25 = vsub.f32 %v6185_v13, %v3933_v24  ;;  %v3934_v16 = vmul.f32 0.0078125, %v3928_v57  ;;  %v5007_v57 = vld [vmem:[%s6412_s15 + $0x40] sm:$0xff]  }
 0xb0d   :  { %v3930_v42 = vpop.xlane.xlu0 %3929  ;;  %4706 = vmatprep.subr.bf16.mxu0 %v5007_v57 }
 0xb0e   :  { %v3938_v6 = vsub.f32 %v6188_v12, %v3934_v16  ;;  %v3935_v53 = vmul.f32 0.0078125, %v3930_v42  ;;  %v3941_v33 = vmul.f32 %v3937_v25, %v3937_v25  ;;  %v5009_v16 = vld [vmem:[%s6412_s15 + $0x48] sm:$0xff]  }
 0xb0f   :  { %v5010_v42 = vld [vmem:[%s6412_s15 + $0x8] sm:$0xff]  }
 0xb10   :  { %v6215_v49 = vsub.f32 %v6192_v20, %v3935_v53  ;;  %3945 = vadd.xlane.f32.xlu0 %v3941_v33  ;;  %v3942_v7 = vmul.f32 %v3938_v6, %v3938_v6  ;;  %v5012_v53 = vld [vmem:[%s6412_s15 + $0x10] sm:$0xff]   ;;  %v5013_v33 = vld [vmem:[%s6412_s15 + $0x58] sm:$0xff]  }
 0xb11   :  { %v3932_v44 = vpop.xlane.xlu0 %3931 }
 0xb12   :  { %v3936_v32 = vmul.f32 0.0078125, %v3932_v44  ;;  %3947 = vadd.xlane.f32.xlu1 %v3942_v7  ;;  %v3943_v38 = vmul.f32 %v6215_v49, %v6215_v49  ;;  %v5015_v7 = vld [vmem:[%s6412_s15 + $0x60] sm:$0xff]  }
 0xb13   :  { %v5016_v44 = vld [vmem:[%s6412_s15 + $0x20] sm:$0xff]  }
 0xb14   :  { %v3940_v19 = vsub.f32 %v6197_v62, %v3936_v32  ;;  %3949 = vadd.xlane.f32.xlu0 %v3943_v38  ;;  %v5017_v32 = vld [vmem:[%s6412_s15 + $0x68] sm:$0xff]  }
 0xb15   :  { %v5018_v38 = vld [vmem:[%s6412_s15 + $0x28] sm:$0xff]  }
 0xb16   :  { %v3944_v45 = vmul.f32 %v3940_v19, %v3940_v19 }
 0xb18   :  { %3951 = vadd.xlane.f32.xlu1 %v3944_v45  ;;  %v5020_v45 = vld [vmem:[%s6412_s15 + $0x30] sm:$0xff]  }
 0xb9d   :  { %v3946_v41 = vpop.xlane.xlu0 %3945 }
 0xb9e   :  { %v3953_v63 = vmul.f32 0.0078125, %v3946_v41 }
 0xb9f   :  { %v3948_v39 = vpop.xlane.xlu1 %3947 }
 0xba0   :  { %v3957_v50 = vadd.f32 1e-06, %v3953_v63  ;;  %v3954_v40 = vmul.f32 0.0078125, %v3948_v39 }
 0xba1   :  { %v3950_v28 = vpop.xlane.xlu0 %3949 }
 0xba2   :  { %5095 = vrsqrt.f32 %v3957_v50  ;;  %v3958_v23 = vadd.f32 1e-06, %v3954_v40  ;;  %v3955_v37 = vmul.f32 0.0078125, %v3950_v28 }
 0xba4   :  { %5097 = vrsqrt.f32 %v3958_v23  ;;  %v3959_v55 = vadd.f32 1e-06, %v3955_v37 }
 0xba5   :  { %v3952_v27 = vpop.xlane.xlu1 %3951 }
 0xba6   :  { %5099 = vrsqrt.f32 %v3959_v55  ;;  %v3956_v30 = vmul.f32 0.0078125, %v3952_v27 }
 0xba8   :  { %v3960_v9 = vadd.f32 1e-06, %v3956_v30 }
 0xbaa   :  { %5101 = vrsqrt.f32 %v3960_v9 }
 0xbac   :  { %v5096_v47 = vpop.eup %5095 }
 0xbad   :  { %v3965_v15 = vmul.f32 %v5096_v47, %v3937_v25  ;;  %v5008_v25 = vld [vmem:[%s6412_s15] sm:$0xff]  }
 0xbae   :  { %v5098_v26 = vpop.eup %5097  ;;  %4707 = vmatpush3.bf16.msra.mxu0 %v5008_v25 }
 0xbaf   :  { %v3966_v10 = vmul.f32 %v5098_v26, %v3938_v6  ;;  %v3975_v18 = vmul.f32 %v4588_v60, %v3965_v15  ;;  %4708 = vmatprep.subr.bf16.mxu0 %v5009_v16  ;;  %v5011_v6 = vld [vmem:[%s6412_s15 + $0x50] sm:$0xff]  }
 0xbb0   :  { %v5100_v14 = vpop.eup %5099 }
 0xbb1   :  { %v3976_v11 = vmul.f32 %v4588_v60, %v3966_v10  ;;  %v3985_v17 = vadd.f32 %v4589_v22, %v3975_v18  ;;  %v3967_v58 = vmul.f32 %v5100_v14, %v6215_v49  ;;  %v5014_v49 = vld [vmem:[%s6412_s15 + $0x18] sm:$0xff]  }
 0xbb2   :  { %4709 = vmatpush3.bf16.msra.mxu0 %v5010_v42 }
 0xbb3   :  { %v3986_v59 = vadd.f32 %v4589_v22, %v3976_v11  ;;  %v3977_v4 = vmul.f32 %v4588_v60, %v3967_v58  ;;  %4710 = vmatprep.subr.bf16.mxu0 %v5011_v6 }
 0xbb4   :  { %v5102_v31 = vpop.eup %5101 }
 0xbb5   :  { %v3989_v29 = vpack.c.bf16 %v3986_v59, %v3985_v17  ;;  %v3968_v2 = vmul.f32 %v5102_v31, %v3940_v19  ;;  %v3987_v43 = vadd.f32 %v4589_v22, %v3977_v4  ;;  %v5019_v19 = vld [vmem:[%s6412_s15 + $0x70] sm:$0xff]  }
 0xbb6   :  { %4711 = vmatpush3.bf16.msra.mxu0 %v5012_v53 }
 0xbb7   :  { %4132 = vmatmul.mubr.bf16.vlgmr.msra.gmra.mrb[52].mxu1 %v3989_v29  ;;  %v3978_v3 = vmul.f32 %v4588_v60, %v3968_v2  ;;  %4712 = vmatprep.subr.bf16.mxu0 %v5013_v33 }
 0xbb8   :  { %4141 = vmatprep.mubr.bf16.mxu1 %v5158_v46  ;;  %v4012_v46 = vrot.slane %v4007_v48, %v4011_v56 }
 0xbb9   :  { %v3988_v5 = vadd.f32 %v4589_v22, %v3978_v3 }
 0xbba   :  { %4713 = vmatpush3.bf16.msra.mxu0 %v5014_v49 }
 0xbbb   :  { %v3990_v24 = vpack.c.bf16 %v3988_v5, %v3987_v43  ;;  %4714 = vmatprep.subr.bf16.mxu0 %v5015_v7 }
 0xbbe   :  { %4715 = vmatpush3.bf16.msra.mxu0 %v5016_v44 }
 0xbbf   :  { %4142 = vmatmul.mubr.bf16.gmra.mrb[56].mxu1 %v3990_v24  ;;  %4716 = vmatprep.subr.bf16.mxu0 %v5017_v32 }
 0xbc2   :  { %4717 = vmatpush3.bf16.msra.mxu0 %v5018_v38 }
 0xbc3   :  { %4718 = vmatprep.subr.bf16.mxu0 %v5019_v19 }
 0xbc6   :  { %4719 = vmatpush3.bf16.msra.mxu0 %v5020_v45 }
 0xbc7   :  { %4720 = vmatprep.subr.bf16.mxu0 %v5021_v8 }
 0xbca   :  { %4721 = vmatpush3.bf16.msra.mxu0 %v5022_v61 }
 0xc8a   :  { %v4133_v0 = vpop.f32.mrb[52].mxu1 }
 0xc8b   :  { %v6316_v54 = vadd.f32 %v4133_v0, %v4012_v46  ;;  %v4135_v35 = vpop.f32.mrb[53].mxu1 }
 0xc8c   :  { %v6318_v51 = vadd.f32 %v4135_v35, %v4016_v21  ;;  %v4137_v36 = vpop.f32.mrb[54].mxu1 }
 0xc8d   :  { %v4152_v34 = vmul.f32 %v6316_v54, %v6316_v54  ;;  %v6322_v41 = vadd.f32 %v4137_v36, %v4012_v46  ;;  %v4139_v63 = vpop.f32.mrb[55].mxu1 }
 0xc8e   :  { %v4153_v39 = vmul.f32 %v6318_v51, %v6318_v51  ;;  %v6326_v50 = vadd.f32 %v4139_v63, %v4016_v21 }
 0xc8f   :  { %v4160_v52 = vmul.f32 %v4152_v34, %v6316_v54  ;;  %v4154_v40 = vmul.f32 %v6322_v41, %v6322_v41 }
 0xc90   :  { %v4161_v28 = vmul.f32 %v4153_v39, %v6318_v51  ;;  %v4155_v23 = vmul.f32 %v6326_v50, %v6326_v50 }
 0xc91   :  { %v4168_v37 = vmul.f32 0.044715, %v4160_v52  ;;  %v4162_v55 = vmul.f32 %v4154_v40, %v6322_v41 }
 0xc92   :  { %v4169_v27 = vmul.f32 0.044715, %v4161_v28  ;;  %v4163_v30 = vmul.f32 %v4155_v23, %v6326_v50  ;;  %v4143_v9 = vpop.f32.mrb[56].mxu1 }
 0xc93   :  { %v4176_v47 = vadd.f32 %v4168_v37, %v6316_v54  ;;  %v4170_v60 = vmul.f32 0.044715, %v4162_v55  ;;  %v6337_v15 = vadd.f32 %v4143_v9, %v4012_v46  ;;  %v4145_v26 = vpop.f32.mrb[57].mxu1 }
 0xc94   :  { %v4177_v10 = vadd.f32 %v4169_v27, %v6318_v51  ;;  %v4171_v18 = vmul.f32 0.044715, %v4163_v30  ;;  %v6340_v14 = vadd.f32 %v4145_v26, %v4016_v21  ;;  %v4147_v22 = vpop.f32.mrb[58].mxu1 }
 0xc95   :  { %v4184_v11 = vmul.f32 0.7978846, %v4176_v47  ;;  %v4178_v17 = vadd.f32 %v4170_v60, %v6322_v41  ;;  %v4156_v59 = vmul.f32 %v6337_v15, %v6337_v15  ;;  %v6345_v58 = vadd.f32 %v4147_v22, %v4012_v46  ;;  %v4149_v31 = vpop.f32.mrb[59].mxu1 }
 0xc96   :  { %v4185_v29 = vmul.f32 0.7978846, %v4177_v10  ;;  %v4179_v2 = vadd.f32 %v4171_v18, %v6326_v50  ;;  %v4157_v4 = vmul.f32 %v6340_v14, %v6340_v14  ;;  %v6350_v3 = vadd.f32 %v4149_v31, %v4016_v21 }
 0xc97   :  { %5103 = vtanh.f32 %v4184_v11  ;;  %v4186_v5 = vmul.f32 0.7978846, %v4178_v17  ;;  %v4164_v43 = vmul.f32 %v4156_v59, %v6337_v15  ;;  %v4158_v24 = vmul.f32 %v6345_v58, %v6345_v58 }
 0xc98   :  { %5105 = vtanh.f32 %v4185_v29  ;;  %v4187_v57 = vmul.f32 0.7978846, %v4179_v2  ;;  %v4165_v25 = vmul.f32 %v4157_v4, %v6340_v14  ;;  %v4159_v16 = vmul.f32 %v6350_v3, %v6350_v3 }
 0xc99   :  { %5107 = vtanh.f32 %v4186_v5  ;;  %v4172_v42 = vmul.f32 0.044715, %v4164_v43  ;;  %v4166_v6 = vmul.f32 %v4158_v24, %v6345_v58  ;;  %v4606_v43 = vld [vmem:[%s6413_s16] ss:$0 sm:$0xff] }
 0xc9a   :  { %5109 = vtanh.f32 %v4187_v57  ;;  %v4173_v53 = vmul.f32 0.044715, %v4165_v25  ;;  %v4167_v33 = vmul.f32 %v4159_v16, %v6350_v3 }
 0xc9b   :  { %v4180_v49 = vadd.f32 %v4172_v42, %v6337_v15  ;;  %v4174_v7 = vmul.f32 0.044715, %v4166_v6 }
 0xc9c   :  { %v4181_v44 = vadd.f32 %v4173_v53, %v6340_v14  ;;  %v4175_v32 = vmul.f32 0.044715, %v4167_v33 }
 0xc9d   :  { %v4188_v38 = vmul.f32 0.7978846, %v4180_v49  ;;  %v4182_v19 = vadd.f32 %v4174_v7, %v6345_v58 }
 0xc9e   :  { %v4189_v45 = vmul.f32 0.7978846, %v4181_v44  ;;  %v4183_v8 = vadd.f32 %v4175_v32, %v6350_v3 }
 0xc9f   :  { %5111 = vtanh.f32 %v4188_v38  ;;  %v4190_v61 = vmul.f32 0.7978846, %v4182_v19 }
 0xca0   :  { %5113 = vtanh.f32 %v4189_v45  ;;  %v4191_v56 = vmul.f32 0.7978846, %v4183_v8 }
 0xca1   :  { %v5104_v48 = vpop.eup %5103  ;;  %5115 = vtanh.f32 %v4190_v61 }
 0xca2   :  { %v5106_v1 = vpop.eup %5105  ;;  %v4200_v46 = vadd.f32 1.0, %v5104_v48  ;;  %5117 = vtanh.f32 %v4191_v56 }
 0xca3   :  { %v5108_v21 = vpop.eup %5107  ;;  %v4201_v0 = vadd.f32 1.0, %v5106_v1 }
 0xca4   :  { %v5110_v35 = vpop.eup %5109  ;;  %v4208_v36 = vmul.f32 0.5, %v4200_v46  ;;  %v4202_v34 = vadd.f32 1.0, %v5108_v21 }
 0xca5   :  { %v4203_v63 = vadd.f32 1.0, %v5110_v35  ;;  %v4209_v39 = vmul.f32 0.5, %v4201_v0 }
 0xca6   :  { %v4210_v52 = vmul.f32 0.5, %v4202_v34  ;;  %v4216_v28 = vmul.f32 %v4208_v36, %v6316_v54 }
 0xca7   :  { %v4211_v40 = vmul.f32 0.5, %v4203_v63  ;;  %v4217_v55 = vmul.f32 %v4209_v39, %v6318_v51 }
 0xca8   :  { %v4218_v23 = vmul.f32 %v4210_v52, %v6322_v41 }
 0xca9   :  { %v5112_v37 = vpop.eup %5111  ;;  %v4219_v27 = vmul.f32 %v4211_v40, %v6326_v50 }
 0xcaa   :  { %v5114_v30 = vpop.eup %5113  ;;  %v4224_v9 = vpack.c.bf16 %v4218_v23, %v4216_v28  ;;  %v4204_v47 = vadd.f32 1.0, %v5112_v37 }
 0xcab   :  { %v5116_v60 = vpop.eup %5115  ;;  %v4225_v26 = vpack.c.bf16 %v4219_v27, %v4217_v55  ;;  %v4205_v10 = vadd.f32 1.0, %v5114_v30 }
 0xcac   :  { %v5118_v18 = vpop.eup %5117  ;;  %v4206_v22 = vadd.f32 1.0, %v5116_v60  ;;  %v4212_v11 = vmul.f32 0.5, %v4204_v47 }
 0xcad   :  { %4395 = vmatprep.mubr.bf16.mxu0 %v4225_v26  ;;  %v4207_v17 = vadd.f32 1.0, %v5118_v18  ;;  %v4213_v59 = vmul.f32 0.5, %v4205_v10  ;;  %v4623_v10 = vld [vmem:[%s6414_s17] ss:$0 sm:$0xff]  ;;  %s5159_s17 = smov [#allocation2]  }
 0xcae   :  { %4396 = vmatmul.mubr.bf16.vlgmr.msra.gmra.mrb[28].mxu0 %v4224_v9  ;;  %v4214_v54 = vmul.f32 0.5, %v4206_v22  ;;  %v4220_v31 = vmul.f32 %v4212_v11, %v6337_v15  ;;  %v4624_v11 = vld [vmem:[%s6415_s18] ss:$0 sm:$0xff]  ;;  %s4491_s6 = sshll.u32 %s5159_s17, 4  ;;  %s4492_s6 = int_to_ptr.vmem [resolvable:$true] %s4491_s6 }
 0xcaf   :  { %v4215_v41 = vmul.f32 0.5, %v4207_v17  ;;  %v4221_v50 = vmul.f32 %v4213_v59, %v6340_v14  ;;  %s5127_s18 = scalar_lea.vmem %s4492_s6, 512  ;;  %p5132_p1 = scmp.lt.s32.totalorder %s4492_s6, %s4492_s6 }
 0xcb0   :  { %v4222_v51 = vmul.f32 %v4214_v54, %v6345_v58  ;;  %p5128_p0 = scmp.ne.s32.totalorder %s4492_s6, %s5127_s18  ;;  %p5133_p2 = scmp.lt.s32.totalorder %s5127_s18, %s5127_s18 }
 0xcb1   :  { %v4223_v29 = vmul.f32 %v4215_v41, %v6350_v3 }
 0xcb2   :  { %v4226_v2 = vpack.c.bf16 %v4222_v51, %v4220_v31  ;;  %p5134_p3 = por %p5133_p2, %p5132_p1 }
 0xcb3   :  { %v4227_v4 = vpack.c.bf16 %v4223_v29, %v4221_v50 }
 0xcb4   :  { %p5135_p4 = pnand %p5134_p3, %p5128_p0 }
 0xcb5   :  { %4403 = vmatprep.mubr.bf16.mxu0 %v4227_v4 }
 0xcb6   :  { %4404 = vmatmul.mubr.bf16.gmra.mrb[32].mxu0 %v4226_v2 }
 0xd81   :  { %v4722_v5 = vpop.f32.mrb[28].mxu0 }
 0xd82   :  { %v4723_v24 = vpop.f32.mrb[29].mxu0 }
 0xd83   :  { %v4724_v57 = vadd.f32 %v4723_v24, %v4722_v5  ;;  %v4725_v25 = vpop.f32.mrb[30].mxu0 }
 0xd84   :  { %v4726_v16 = vpop.f32.mrb[31].mxu0 }
 0xd85   :  { %v4398_v15 = vadd.f32 %v4724_v57, %v4606_v43  ;;  %v4727_v42 = vadd.f32 %v4726_v16, %v4725_v25 }
 0xd87   :  { %v4401_v58 = vadd.f32 %v4727_v42, %v4606_v43  ;;  %v4412_v14 = vadd.f32 %v4398_v15, %v6185_v13 }
 0xd89   :  { %4418 = vadd.xlane.f32.xlu0 %v4412_v14  ;;  %v4728_v3 = vpop.f32.mrb[32].mxu0  ;;  %v4413_v6 = vadd.f32 %v4401_v58, %v6188_v12 }
 0xd8a   :  { %v4729_v53 = vpop.f32.mrb[33].mxu0 }
 0xd8b   :  { %v4730_v33 = vadd.f32 %v4729_v53, %v4728_v3  ;;  %4420 = vadd.xlane.f32.xlu1 %v4413_v6  ;;  %v4731_v49 = vpop.f32.mrb[34].mxu0 }
 0xd8c   :  { %v4732_v7 = vpop.f32.mrb[35].mxu0 }
 0xd8d   :  { %v4406_v44 = vadd.f32 %v4730_v33, %v4606_v43  ;;  %v4733_v32 = vadd.f32 %v4732_v7, %v4731_v49 }
 0xd8f   :  { %v4409_v38 = vadd.f32 %v4733_v32, %v4606_v43  ;;  %v4414_v19 = vadd.f32 %v4406_v44, %v6192_v20 }
 0xd91   :  { %4422 = vadd.xlane.f32.xlu0 %v4414_v19  ;;  %v4415_v45 = vadd.f32 %v4409_v38, %v6197_v62 }
 0xd93   :  { %4424 = vadd.xlane.f32.xlu1 %v4415_v45 }
 0xe16   :  { %v4419_v8 = vpop.xlane.xlu0 %4418 }
 0xe17   :  { %v4426_v13 = vmul.f32 0.0078125, %v4419_v8 }
 0xe18   :  { %v4421_v61 = vpop.xlane.xlu1 %4420 }
 0xe19   :  { %v4430_v56 = vsub.f32 %v4412_v14, %v4426_v13  ;;  %v4427_v48 = vmul.f32 0.0078125, %v4421_v61 }
 0xe1b   :  { %v4431_v12 = vsub.f32 %v4413_v6, %v4427_v48  ;;  %v4434_v1 = vmul.f32 %v4430_v56, %v4430_v56 }
 0xe1d   :  { %4438 = vadd.xlane.f32.xlu0 %v4434_v1  ;;  %v4435_v46 = vmul.f32 %v4431_v12, %v4431_v12 }
 0xe1e   :  { %v4423_v21 = vpop.xlane.xlu0 %4422 }
 0xe1f   :  { %v4428_v0 = vmul.f32 0.0078125, %v4423_v21  ;;  %4440 = vadd.xlane.f32.xlu1 %v4435_v46 }
 0xe20   :  { %v4425_v35 = vpop.xlane.xlu1 %4424 }
 0xe21   :  { %v4432_v36 = vsub.f32 %v4414_v19, %v4428_v0  ;;  %v4429_v34 = vmul.f32 0.0078125, %v4425_v35 }
 0xe23   :  { %v4433_v20 = vsub.f32 %v4415_v45, %v4429_v34  ;;  %v4436_v63 = vmul.f32 %v4432_v36, %v4432_v36 }
 0xe25   :  { %4442 = vadd.xlane.f32.xlu0 %v4436_v63  ;;  %v4437_v62 = vmul.f32 %v4433_v20, %v4433_v20 }
 0xe27   :  { %4444 = vadd.xlane.f32.xlu1 %v4437_v62 }
 0xeaa   :  { %v4439_v39 = vpop.xlane.xlu0 %4438 }
 0xeab   :  { %v4446_v52 = vmul.f32 0.0078125, %v4439_v39 }
 0xeac   :  { %v4441_v40 = vpop.xlane.xlu1 %4440 }
 0xead   :  { %v4450_v28 = vadd.f32 1e-06, %v4446_v52  ;;  %v4447_v23 = vmul.f32 0.0078125, %v4441_v40 }
 0xeaf   :  { %5119 = vrsqrt.f32 %v4450_v28  ;;  %v4451_v37 = vadd.f32 1e-06, %v4447_v23 }
 0xeb1   :  { %5121 = vrsqrt.f32 %v4451_v37 }
 0xeb2   :  { %v4443_v55 = vpop.xlane.xlu0 %4442 }
 0xeb3   :  { %v4448_v27 = vmul.f32 0.0078125, %v4443_v55 }
 0xeb4   :  { %v4445_v30 = vpop.xlane.xlu1 %4444 }
 0xeb5   :  { %v4452_v9 = vadd.f32 1e-06, %v4448_v27  ;;  %v4449_v47 = vmul.f32 0.0078125, %v4445_v30 }
 0xeb7   :  { %5123 = vrsqrt.f32 %v4452_v9  ;;  %v4453_v60 = vadd.f32 1e-06, %v4449_v47 }
 0xeb9   :  { %v5120_v26 = vpop.eup %5119  ;;  %5125 = vrsqrt.f32 %v4453_v60 }
 0xeba   :  { %v4458_v18 = vmul.f32 %v5120_v26, %v4430_v56 }
 0xebb   :  { %v5122_v22 = vpop.eup %5121 }
 0xebc   :  { %v4468_v17 = vmul.f32 %v4623_v10, %v4458_v18  ;;  %v4459_v59 = vmul.f32 %v5122_v22, %v4431_v12 }
 0xebe   :  { %v4469_v54 = vmul.f32 %v4623_v10, %v4459_v59  ;;  %v4478_v41 = vadd.f32 %v4624_v11, %v4468_v17 }
 0xec0   :  { %v4479_v31 = vadd.f32 %v4624_v11, %v4469_v54  ;;  %4482 = vst [vmem:[#allocation2] sm:$0xff] %v4478_v41 }
 0xec1   :  { %v5124_v51 = vpop.eup %5123 }
 0xec2   :  { %v4460_v50 = vmul.f32 %v5124_v51, %v4432_v36  ;;  %4483 = vst [vmem:[#allocation2 + $0x8] sm:$0xff] %v4479_v31 }
 0xec3   :  { %v5126_v29 = vpop.eup %5125 }
 0xec4   :  { %v4470_v2 = vmul.f32 %v4623_v10, %v4460_v50  ;;  %v4461_v4 = vmul.f32 %v5126_v29, %v4433_v20 }
 0xec6   :  { %v4480_v5 = vadd.f32 %v4624_v11, %v4470_v2  ;;  %v4471_v43 = vmul.f32 %v4623_v10, %v4461_v4 }
 0xec8   :  { %4484 = vst [vmem:[#allocation2 + $0x10] sm:$0xff] %v4480_v5  ;;  %v4481_v24 = vadd.f32 %v4624_v11, %v4471_v43 }
 0xeca   :  { %4485 = vst [vmem:[#allocation2 + $0x18] sm:$0xff] %v4481_v24 }
 0xecb   :  { %5138 = shalt.err (!%p5135_p4)
}
 0xecc   :  { %s5139_s8 = scalar_lea.hbm %s6416_s19, 512 }
 0xecd   :  { %p5140_p5 = scmp.ne.s32.totalorder %s6416_s19, %s5139_s8  ;;  %p5143_p6 = scmp.lt.u32.totalorder %s5139_s8, %s6416_s19 }
 0xecf   :  { %p5145_p7 = pnand %p5143_p6, %p5140_p5 }
 0xed1   :  { %5148 = shalt.err (!%p5145_p7)
}
 0xed2   :  { %s5160_s3 = smov 128   ;;  %s5161_s13 = smov 8  }
 0xed3   :  { %4497 = dma.vmem_to_hbm [thread:$0]  %s4492_s6, 512, %s6416_s19, [#allocation3], %s5160_s3, %s5160_s3, %s5161_s13  }
 0xed4   :  { %5149 = dma.done.wait [#allocation3], 512  }
 0xed5   :  { %5150 = vsyncadd [#allocation3], 4294966784 }
 0xed6   :  { %4501 = vsyncpa [#allocation3], 1 }

</bundles_post_ra>
